<compile_context>
chip_gen: v6e
topology: v6e:2x2x1
jax: 0.10.0
libtpu: 0.0.40
codegen_flags: <defaults>
</compile_context>

<pallas_src>
import functools
import math

import jax
import jax.numpy as jnp
from jax.experimental import pallas as pl
from jax.experimental.pallas import tpu as pltpu

_SQRT2 = math.sqrt(2.0)


def _erf(x):
    # Abramowitz-Stegun 7.1.26 polynomial erf (|abs err| < 1.5e-7 ~ f32 eps); composed only
    # of ops with guaranteed Mosaic lowerings (exp, mul, add, abs, where).
    a1, a2, a3, a4, a5 = (0.254829592, -0.284496736, 1.421413741,
                          -1.453152027, 1.061405429)
    p = 0.3275911
    sgn = jnp.where(x >= 0.0, 1.0, -1.0)
    ax = jnp.abs(x)
    t = 1.0 / (1.0 + p * ax)
    poly = ((((a5 * t + a4) * t + a3) * t + a2) * t + a1) * t
    return sgn * (1.0 - poly * jnp.exp(-ax * ax))


def _gelu_exact(x):
    # matches torch.nn.GELU() default ('none' approximation, erf-based)
    return 0.5 * x * (1.0 + _erf(x / _SQRT2))


def decoder_fused_kernel(x_ref, mhb_ref, mwb_ref,
                         w1_ref, w2_ref, w3_ref, w4_ref,
                         gb1_ref, gb2_ref, gb3_ref, gb4_ref,
                         o_ref,
                         opA_ref, opB_ref,
                         *, P, Hs, Ws, C, mid, Cout, F):
    """P images: upsample x2 -> ConvBlock(C,C,residual) -> ConvBlock(C,Cout,mid).

    Channel-interleaved layout: rows = (image, H), lanes = W*C.  Each 3x3 conv is one
    K = 3*Ws*Cin matmul against a precomputed banded (im2col) weight matrix; the operand
    lives in a bf16 VMEM scratch whose three lane blocks hold the row-above / row /
    row-below slabs (vertical padding = two permanently-zero scratch rows).
    """
    f32 = jnp.float32
    bf16 = jnp.bfloat16
    WC, WM, WO = Ws * C, Ws * mid, Ws * Cout
    M = P * Hs

    # Zero ONLY the two pad rows of each operand scratch (never written below).
    # Done every grid step => correct under megacore / 'parallel' grid sharding.
    opA_ref[:, 0:1, 0:WC] = jnp.zeros((P, 1, WC), bf16)
    opA_ref[:, Hs - 1:Hs, 2 * WC:3 * WC] = jnp.zeros((P, 1, WC), bf16)
    opB_ref[:, 0:1, 0:WM] = jnp.zeros((P, 1, WM), bf16)
    opB_ref[:, Hs - 1:Hs, 2 * WM:3 * WM] = jnp.zeros((P, 1, WM), bf16)

    # ---- bilinear x2 upsample (align_corners=True): separable -> two f32 MXU matmuls.
    # Column interp is one matmul over all P images; row interp uses kron(I_P, Mh).
    xw = jnp.dot(x_ref[...], mwb_ref[...], preferred_element_type=f32)     # (P*H, WC)
    x_up = jnp.dot(mhb_ref[...], xw, preferred_element_type=f32)           # (M,  WC)
    x_up3 = x_up.reshape(P, Hs, WC)

    def stage(op_ref, act3, w_ref, gb_ref, wc_in, wc_out,
              residual=None, apply_gelu=True):
        # --- build the concatenated-K operand (single bf16 cast per stage) ---
        a_bf = act3.astype(bf16)                                            # (P, Hs, wc_in)
        op_ref[:, 1:Hs, 0:wc_in] = a_bf[:, 0:Hs - 1, :]                     # row above
        op_ref[:, :, wc_in:2 * wc_in] = a_bf                                # row
        op_ref[:, 0:Hs - 1, 2 * wc_in:3 * wc_in] = a_bf[:, 1:Hs, :]         # row below

        # --- 3x3 conv == ONE banded matmul, K = 3*wc_in, M = P*Hs, f32 accumulation ---
        op2d = op_ref[...].reshape(M, 3 * wc_in)
        acc = jnp.dot(op2d, w_ref[...], preferred_element_type=f32)         # (M, wc_out)
        acc3 = acc.reshape(P, Hs, wc_out)

        # --- GroupNorm(num_groups=1): per-image stats, two-pass, folded affine ---
        n = float(Hs * wc_out)                                              # = Hs*Ws*cout
        s1 = jnp.sum(jnp.sum(acc3, axis=2, keepdims=True), axis=1, keepdims=True)
        mean = s1 / n                                                       # (P,1,1)
        diff = acc3 - mean
        s2 = jnp.sum(jnp.sum(diff * diff, axis=2, keepdims=True), axis=1, keepdims=True)
        inv = jax.lax.rsqrt(s2 / n + 1e-5)                                  # (P,1,1)
        y = diff * (gb_ref[0:1, :] * inv) + gb_ref[1:2, :]                  # (P,Hs,wc_out)

        if residual is not None:
            y = y + residual
        if apply_gelu:
            y = _gelu_exact(y)
        return y

    # ConvBlock(C, C, residual=True):  gelu(x_up + GN(conv(gelu(GN(conv(x_up))))))
    h1 = stage(opA_ref, x_up3, w1_ref, gb1_ref, WC, WC)
    r = stage(opA_ref, h1, w2_ref, gb2_ref, WC, WC, residual=x_up3)
    # ConvBlock(C, Cout, mid_channels=C//2):  GN(conv(gelu(GN(conv(r)))))
    h2 = stage(opA_ref, r, w3_ref, gb3_ref, WC, WM)
    out3 = stage(opB_ref, h2, w4_ref, gb4_ref, WM, WO, apply_gelu=False)

    # --- lane-dense output: pack F contiguous row-chunks side by side along lanes ---
    out2d = out3.reshape(M, WO)
    if F == 1:
        o_ref[...] = out2d
    else:
        rows = M // F
        o_ref[...] = jnp.concatenate(
            [out2d[i * rows:(i + 1) * rows, :] for i in range(F)], axis=1)


# ------------------------------ wrapper-side helpers ------------------------------

def _bilinear_matrix(n_in, n_out):
    # nn.Upsample(scale_factor=2, mode='bilinear', align_corners=True), separable 1-D op.
    scale = (n_in - 1) / (n_out - 1)
    src = jnp.arange(n_out, dtype=jnp.float32) * scale
    i0 = jnp.clip(jnp.floor(src).astype(jnp.int32), 0, n_in - 2)
    frac = src - i0.astype(jnp.float32)
    rows = jnp.arange(n_out)
    M = jnp.zeros((n_out, n_in), jnp.float32)
    M = M.at[rows, i0].add(1.0 - frac)
    M = M.at[rows, i0 + 1].add(frac)
    return M


def _banded_weights(w_hwio, Ws):
    """HWIO (3,3,cin,cout) conv weight -> (3, Ws*cin, Ws*cout) banded matrices.

    Horizontal zero padding is folded into the band structure (out-of-range taps are
    absent); vertical padding is handled by the zero rows of the operand scratch.
    """
    kh, kw, cin, cout = w_hwio.shape
    wi = jnp.arange(Ws)
    wo = jnp.arange(Ws)
    kx = wi[:, None] - wo[None, :] + 1
    valid = (kx >= 0) & (kx < kw)
    kx_c = jnp.clip(kx, 0, kw - 1)
    blk = w_hwio[:, kx_c, :, :]                          # (kh, Ws, Ws, cin, cout)
    blk = jnp.where(valid[None, :, :, None, None], blk, 0.0)
    blk = blk.transpose(0, 1, 3, 2, 4)                   # (kh, wi, cin, wo, cout)
    return blk.reshape(kh, Ws * cin, Ws * cout)


def _tiled_affine(gamma, beta, Ws):
    # per-channel GroupNorm affine tiled to the channel-interleaved lane layout
    return jnp.stack([jnp.tile(gamma, Ws), jnp.tile(beta, Ws)]).astype(jnp.float32)


def init_decoder_params(key, in_channels, out_channels):
    mid2 = in_channels // 2
    ks = jax.random.split(key, 12)

    def conv_w(k, cin, cout):
        fan_in = cin * 9
        return jax.random.normal(k, (3, 3, cin, cout), jnp.float32) / jnp.sqrt(fan_in)

    def affine(kg, kb, c):
        g = 1.0 + 0.1 * jax.random.normal(kg, (c,), jnp.float32)
        b = 0.1 * jax.random.normal(kb, (c,), jnp.float32)
        return g, b

    g1, be1 = affine(ks[4], ks[5], in_channels)
    g2, be2 = affine(ks[6], ks[7], in_channels)
    g3, be3 = affine(ks[8], ks[9], mid2)
    g4, be4 = affine(ks[10], ks[11], out_channels)
    return {
        # ConvBlock(in, in, residual=True)
        'b1_w1': conv_w(ks[0], in_channels, in_channels), 'b1_g1': g1, 'b1_be1': be1,
        'b1_w2': conv_w(ks[1], in_channels, in_channels), 'b1_g2': g2, 'b1_be2': be2,
        # ConvBlock(in, out, mid_channels=in // 2)
        'b2_w1': conv_w(ks[2], in_channels, mid2), 'b2_g1': g3, 'b2_be1': be3,
        'b2_w2': conv_w(ks[3], mid2, out_channels), 'b2_g2': g4, 'b2_be2': be4,
    }


def decoder_block_forward(params, x_nchw, *, images_per_step=None):
    """Decoder_block.forward: x -> Upsample x2 -> ConvBlock(res) -> ConvBlock."""
    N, C, H, W = x_nchw.shape
    mid = params['b2_w1'].shape[-1]
    Cout = params['b2_w2'].shape[-1]
    Hs, Ws = 2 * H, 2 * W
    WC, WM, WO = Ws * C, Ws * mid, Ws * Cout
    bf16 = jnp.bfloat16

    # Batch the matmul M-dimension, but keep >= 2 grid steps whenever N >= 2 so both
    # v7x TensorCores get work under "parallel" semantics.
    if images_per_step is None:
        images_per_step = max(1, N // 2)
    P = max(1, min(images_per_step, N))
    G = -(-N // P)
    N_pad = G * P

    # channel-interleaved (== NHWC memory order): rows = (n, h), lanes = w*C + c
    x_nhwc = jnp.transpose(x_nchw, (0, 2, 3, 1)).astype(jnp.float32)
    if N_pad != N:
        x_nhwc = jnp.concatenate(
            [x_nhwc, jnp.zeros((N_pad - N, H, W, C), jnp.float32)], axis=0)
    x2d = x_nhwc.reshape(N_pad * H, W * C)

    # bilinear (align_corners=True) interpolation operators for this layout
    mh = _bilinear_matrix(H, Hs)                                     # (Hs, H)
    mw = _bilinear_matrix(W, Ws)                                     # (Ws, W)
    mwb = jnp.kron(mw.T, jnp.eye(C, dtype=jnp.float32))              # (W*C, Ws*C)
    mhb = jnp.kron(jnp.eye(P, dtype=jnp.float32), mh)                # (P*Hs, P*H)

    # banded (im2col) conv weights, fused along K (3*Ws*Cin), bf16 for the MXU
    w1 = _banded_weights(params['b1_w1'], Ws).reshape(3 * WC, WC).astype(bf16)
    w2 = _banded_weights(params['b1_w2'], Ws).reshape(3 * WC, WC).astype(bf16)
    w3 = _banded_weights(params['b2_w1'], Ws).reshape(3 * WC, WM).astype(bf16)
    w4 = _banded_weights(params['b2_w2'], Ws).reshape(3 * WM, WO).astype(bf16)

    gb1 = _tiled_affine(params['b1_g1'], params['b1_be1'], Ws)
    gb2 = _tiled_affine(params['b1_g2'], params['b1_be2'], Ws)
    gb3 = _tiled_affine(params['b2_g1'], params['b2_be1'], Ws)
    gb4 = _tiled_affine(params['b2_g2'], params['b2_be2'], Ws)

    # lane-dense output packing factor
    M = P * Hs
    if WO % 128 == 0:
        F = 1
    elif 128 % WO == 0 and M % (128 // WO) == 0:
        F = 128 // WO
    else:
        F = 1
    out_rows, out_lanes = M // F, F * WO

    kernel = functools.partial(decoder_fused_kernel, P=P, Hs=Hs, Ws=Ws, C=C,
                               mid=mid, Cout=Cout, F=F)

    out_packed = pl.pallas_call(
        kernel,
        out_shape=jax.ShapeDtypeStruct((G * out_rows, out_lanes), jnp.float32),
        grid=(G,),
        in_specs=[
            pl.BlockSpec((P * H, W * C), lambda g: (g, 0)),      # P input images
            pl.BlockSpec((P * Hs, P * H), lambda g: (0, 0)),     # row interp (block diag)
            pl.BlockSpec((W * C, Ws * C), lambda g: (0, 0)),     # col interp (kron I_C)
            pl.BlockSpec((3 * WC, WC), lambda g: (0, 0)),
            pl.BlockSpec((3 * WC, WC), lambda g: (0, 0)),
            pl.BlockSpec((3 * WC, WM), lambda g: (0, 0)),
            pl.BlockSpec((3 * WM, WO), lambda g: (0, 0)),
            pl.BlockSpec((2, WC), lambda g: (0, 0)),
            pl.BlockSpec((2, WC), lambda g: (0, 0)),
            pl.BlockSpec((2, WM), lambda g: (0, 0)),
            pl.BlockSpec((2, WO), lambda g: (0, 0)),
        ],
        out_specs=pl.BlockSpec((out_rows, out_lanes), lambda g: (g, 0)),
        scratch_shapes=[
            pltpu.VMEM((P, Hs, 3 * WC), bf16),   # concatenated-K operand, stages 1-3
            pltpu.VMEM((P, Hs, 3 * WM), bf16),   # concatenated-K operand, stage 4
        ],
        compiler_params=pltpu.CompilerParams(
            dimension_semantics=("parallel",),
            # 32 MiB leaves headroom on v7x (64 MiB physical); fine on v5e/v6e (128 MiB).
            vmem_limit_bytes=32 * 1024 * 1024),
    )(x2d, mhb, mwb, w1, w2, w3, w4, gb1, gb2, gb3, gb4)

    # undo the lane packing: (G*rows, F*WO) -> (N_pad*Hs, WO) -> NHWC -> NCHW
    out2d = out_packed.reshape(G, out_rows, F, WO).transpose(0, 2, 1, 3)
    out2d = out2d.reshape(N_pad * Hs, WO)
    out = out2d.reshape(N_pad, Hs, Ws, Cout)[:N]
    return jnp.transpose(out, (0, 3, 1, 2))


def _reference_forward(params, x_nchw):
    """Pure-JAX (XLA) reference of Decoder_block.forward, f32 / highest precision."""
    N, C, H, W = x_nchw.shape
    Hs, Ws = 2 * H, 2 * W
    hi = jax.lax.Precision.HIGHEST
    x = jnp.transpose(x_nchw, (0, 2, 3, 1)).astype(jnp.float32)        # NHWC
    mh = _bilinear_matrix(H, Hs)
    mw = _bilinear_matrix(W, Ws)
    x = jnp.einsum('oh,nhwc->nowc', mh, x, precision=hi)
    x = jnp.einsum('ow,nhwc->nhoc', mw, x, precision=hi)

    def conv(t, w):
        return jax.lax.conv_general_dilated(
            t, w, (1, 1), 'SAME',
            dimension_numbers=('NHWC', 'HWIO', 'NHWC'), precision=hi)

    def gn(t, g, b):
        m = jnp.mean(t, axis=(1, 2, 3), keepdims=True)
        v = jnp.mean((t - m) ** 2, axis=(1, 2, 3), keepdims=True)
        return (t - m) * jax.lax.rsqrt(v + 1e-5) * g + b

    gelu = lambda t: jax.nn.gelu(t, approximate=False)

    t = gelu(gn(conv(x, params['b1_w1']), params['b1_g1'], params['b1_be1']))
    t = gn(conv(t, params['b1_w2']), params['b1_g2'], params['b1_be2'])
    r = gelu(x + t)
    t = gelu(gn(conv(r, params['b2_w1']), params['b2_g1'], params['b2_be1']))
    t = gn(conv(t, params['b2_w2']), params['b2_g2'], params['b2_be2'])
    return jnp.transpose(t, (0, 3, 1, 2))


if __name__ == "__main__":
    key = jax.random.PRNGKey(0)
    kx, kp = jax.random.split(key)

    in_channels, out_channels = 8, 4
    batch, H, W = 4, 8, 8
    x = jax.random.normal(kx, (batch, in_channels, H, W), jnp.float32)   # NCHW

    params = init_decoder_params(kp, in_channels, out_channels)

    fwd = jax.jit(functools.partial(decoder_block_forward, params))
    out = jax.block_until_ready(fwd(x))

    assert out.shape == (batch, out_channels, 2 * H, 2 * W), out.shape
    assert bool(jnp.all(jnp.isfinite(out)))

    # Loose functional check vs. an XLA reference (conv operands are bf16 in the kernel,
    # so expect ~1e-2 absolute deviation on unit-variance outputs).
    ref = _reference_forward(params, x)
    max_err = float(jnp.max(jnp.abs(out - ref)))
    assert max_err < 0.15, f"max abs err vs reference = {max_err}"

    print("KERNEL_OK")
</pallas_src>

<mosaic_0001>
module attributes {stable_mosaic.version = 11 : i64} {
  func.func private @main(%arg0: i32) attributes {dimension_semantics = [#tpu.dimension_semantics<core_parallel>], iteration_bounds = array<i64: 2>, tpu.core_type = #tpu.core_type<sc_scalar_subcore>, window_params = []} {
    return
  }
}

module attributes {stable_mosaic.version = 11 : i64} {
  func.func private @main(%arg0: i32) attributes {dimension_semantics = [#tpu.dimension_semantics<core_parallel>], iteration_bounds = array<i64: 2>, tpu.core_type = #tpu.core_type<sc_scalar_subcore>, window_params = []} {
    return
  }
}

module attributes {stable_mosaic.version = 11 : i64} {
  func.func @decoder_fused_kernel(%arg0: i32, %arg1: memref<16x64xf32, #tpu.memory_space<vmem>>, %arg2: memref<32x16xf32, #tpu.memory_space<vmem>>, %arg3: memref<64x128xf32, #tpu.memory_space<vmem>>, %arg4: memref<384x128xbf16, #tpu.memory_space<vmem>>, %arg5: memref<384x128xbf16, #tpu.memory_space<vmem>>, %arg6: memref<384x64xbf16, #tpu.memory_space<vmem>>, %arg7: memref<192x64xbf16, #tpu.memory_space<vmem>>, %arg8: memref<2x128xf32, #tpu.memory_space<vmem>>, %arg9: memref<2x128xf32, #tpu.memory_space<vmem>>, %arg10: memref<2x64xf32, #tpu.memory_space<vmem>>, %arg11: memref<2x64xf32, #tpu.memory_space<vmem>>, %arg12: memref<16x128xf32, #tpu.memory_space<vmem>>, %arg13: memref<2x16x384xbf16, #tpu.memory_space<vmem>>, %arg14: memref<2x16x192xbf16, #tpu.memory_space<vmem>>) attributes {dimension_semantics = [#tpu.dimension_semantics<parallel>], iteration_bounds = array<i64: 2>, scalar_prefetch = 0 : i64, scratch_operands = 2 : i64, tpu.core_type = #tpu.core_type<tc>, window_params = [{transform_indices = @transform_0, window_bounds = array<i64: 16, 64>}, {pipeline_mode = #tpu.pipeline_mode<synchronous>, transform_indices = @transform_1, window_bounds = array<i64: 32, 16>}, {pipeline_mode = #tpu.pipeline_mode<synchronous>, transform_indices = @transform_2, window_bounds = array<i64: 64, 128>}, {pipeline_mode = #tpu.pipeline_mode<synchronous>, transform_indices = @transform_3, window_bounds = array<i64: 384, 128>}, {pipeline_mode = #tpu.pipeline_mode<synchronous>, transform_indices = @transform_4, window_bounds = array<i64: 384, 128>}, {pipeline_mode = #tpu.pipeline_mode<synchronous>, transform_indices = @transform_5, window_bounds = array<i64: 384, 64>}, {pipeline_mode = #tpu.pipeline_mode<synchronous>, transform_indices = @transform_6, window_bounds = array<i64: 192, 64>}, {pipeline_mode = #tpu.pipeline_mode<synchronous>, transform_indices = @transform_7, window_bounds = array<i64: 2, 128>}, {pipeline_mode = #tpu.pipeline_mode<synchronous>, transform_indices = @transform_8, window_bounds = array<i64: 2, 128>}, {pipeline_mode = #tpu.pipeline_mode<synchronous>, transform_indices = @transform_9, window_bounds = array<i64: 2, 64>}, {pipeline_mode = #tpu.pipeline_mode<synchronous>, transform_indices = @transform_10, window_bounds = array<i64: 2, 64>}, {transform_indices = @transform_11, window_bounds = array<i64: 16, 128>}]} {
    %cst = arith.constant 0.000000e+00 : bf16
    %0 = vector.broadcast %cst : bf16 to vector<2x1x128xbf16>
    %c0 = arith.constant 0 : index
    %c0_0 = arith.constant 0 : index
    %c0_1 = arith.constant 0 : index
    %1 = vector.load %arg13[%c0, %c0_0, %c0_1] : memref<2x16x384xbf16, #tpu.memory_space<vmem>>, vector<2x1x128xbf16>
    tpu.vector_store %arg13[%c0, %c0_0, %c0_1], %0 {strides = array<i32>} : memref<2x16x384xbf16, #tpu.memory_space<vmem>>, vector<2x1x128xbf16>,
    %cst_2 = arith.constant 0.000000e+00 : bf16
    %2 = vector.broadcast %cst_2 : bf16 to vector<2x1x128xbf16>
    %c0_3 = arith.constant 0 : index
    %c15 = arith.constant 15 : index
    %c256 = arith.constant 256 : index
    %3 = vector.load %arg13[%c0_3, %c15, %c256] : memref<2x16x384xbf16, #tpu.memory_space<vmem>>, vector<2x1x128xbf16>
    tpu.vector_store %arg13[%c0_3, %c15, %c256], %2 {strides = array<i32>} : memref<2x16x384xbf16, #tpu.memory_space<vmem>>, vector<2x1x128xbf16>,
    %cst_4 = arith.constant 0.000000e+00 : bf16
    %4 = vector.broadcast %cst_4 : bf16 to vector<2x1x64xbf16>
    %c0_5 = arith.constant 0 : index
    %c0_6 = arith.constant 0 : index
    %c0_7 = arith.constant 0 : index
    %5 = vector.load %arg14[%c0_5, %c0_6, %c0_7] : memref<2x16x192xbf16, #tpu.memory_space<vmem>>, vector<2x1x64xbf16>
    tpu.vector_store %arg14[%c0_5, %c0_6, %c0_7], %4 {strides = array<i32>} : memref<2x16x192xbf16, #tpu.memory_space<vmem>>, vector<2x1x64xbf16>,
    %cst_8 = arith.constant 0.000000e+00 : bf16
    %6 = vector.broadcast %cst_8 : bf16 to vector<2x1x64xbf16>
    %c0_9 = arith.constant 0 : index
    %c15_10 = arith.constant 15 : index
    %c128 = arith.constant 128 : index
    %7 = vector.load %arg14[%c0_9, %c15_10, %c128] : memref<2x16x192xbf16, #tpu.memory_space<vmem>>, vector<2x1x64xbf16>
    tpu.vector_store %arg14[%c0_9, %c15_10, %c128], %6 {strides = array<i32>} : memref<2x16x192xbf16, #tpu.memory_space<vmem>>, vector<2x1x64xbf16>,
    %c0_11 = arith.constant 0 : index
    %c0_12 = arith.constant 0 : index
    %8 = vector.load %arg1[%c0_11, %c0_12] : memref<16x64xf32, #tpu.memory_space<vmem>>, vector<16x64xf32>
    %c0_13 = arith.constant 0 : index
    %c0_14 = arith.constant 0 : index
    %9 = vector.load %arg3[%c0_13, %c0_14] : memref<64x128xf32, #tpu.memory_space<vmem>>, vector<64x128xf32>
    %cst_15 = arith.constant dense<0.000000e+00> : vector<16x128xf32>
    %10 = tpu.matmul %8, %9, %cst_15 {dimension_numbers = #tpu.dot_dimension_numbers<[1], [0], [0], [1], [0, 0, 1, 1], [], []>} : vector<16x64xf32>, vector<64x128xf32>, vector<16x128xf32> -> vector<16x128xf32>
    %c0_16 = arith.constant 0 : index
    %c0_17 = arith.constant 0 : index
    %11 = vector.load %arg2[%c0_16, %c0_17] : memref<32x16xf32, #tpu.memory_space<vmem>>, vector<32x16xf32>
    %cst_18 = arith.constant dense<0.000000e+00> : vector<32x128xf32>
    %12 = tpu.matmul %11, %10, %cst_18 {dimension_numbers = #tpu.dot_dimension_numbers<[1], [0], [0], [1], [0, 0, 1, 1], [], []>} : vector<32x16xf32>, vector<16x128xf32>, vector<32x128xf32> -> vector<32x128xf32>
    %13 = vector.shape_cast %12 : vector<32x128xf32> to vector<2x16x128xf32>
    %14 = arith.truncf %13 : vector<2x16x128xf32> to vector<2x16x128xbf16>
    %15 = vector.extract_strided_slice %14 {offsets = [0, 0, 0], sizes = [2, 15, 128], strides = [1, 1, 1]} : vector<2x16x128xbf16> to vector<2x15x128xbf16>
    %c0_19 = arith.constant 0 : index
    %c1 = arith.constant 1 : index
    %c0_20 = arith.constant 0 : index
    %16 = vector.load %arg13[%c0_19, %c1, %c0_20] : memref<2x16x384xbf16, #tpu.memory_space<vmem>>, vector<2x15x128xbf16>
    tpu.vector_store %arg13[%c0_19, %c1, %c0_20], %15 {strides = array<i32>} : memref<2x16x384xbf16, #tpu.memory_space<vmem>>, vector<2x15x128xbf16>,
    %c0_21 = arith.constant 0 : index
    %c0_22 = arith.constant 0 : index
    %c128_23 = arith.constant 128 : index
    %17 = vector.load %arg13[%c0_21, %c0_22, %c128_23] : memref<2x16x384xbf16, #tpu.memory_space<vmem>>, vector<2x16x128xbf16>
    tpu.vector_store %arg13[%c0_21, %c0_22, %c128_23], %14 {strides = array<i32>} : memref<2x16x384xbf16, #tpu.memory_space<vmem>>, vector<2x16x128xbf16>,
    %18 = vector.extract_strided_slice %14 {offsets = [0, 1, 0], sizes = [2, 15, 128], strides = [1, 1, 1]} : vector<2x16x128xbf16> to vector<2x15x128xbf16>
    %c0_24 = arith.constant 0 : index
    %c0_25 = arith.constant 0 : index
    %c256_26 = arith.constant 256 : index
    %19 = vector.load %arg13[%c0_24, %c0_25, %c256_26] : memref<2x16x384xbf16, #tpu.memory_space<vmem>>, vector<2x15x128xbf16>
    tpu.vector_store %arg13[%c0_24, %c0_25, %c256_26], %18 {strides = array<i32>} : memref<2x16x384xbf16, #tpu.memory_space<vmem>>, vector<2x15x128xbf16>,
    %c0_27 = arith.constant 0 : index
    %c0_28 = arith.constant 0 : index
    %c0_29 = arith.constant 0 : index
    %20 = vector.load %arg13[%c0_27, %c0_28, %c0_29] : memref<2x16x384xbf16, #tpu.memory_space<vmem>>, vector<2x16x384xbf16>
    %21 = vector.shape_cast %20 : vector<2x16x384xbf16> to vector<32x384xbf16>
    %c0_30 = arith.constant 0 : index
    %c0_31 = arith.constant 0 : index
    %22 = vector.load %arg4[%c0_30, %c0_31] : memref<384x128xbf16, #tpu.memory_space<vmem>>, vector<384x128xbf16>
    %cst_32 = arith.constant dense<0.000000e+00> : vector<32x128xf32>
    %23 = tpu.matmul %21, %22, %cst_32 {dimension_numbers = #tpu.dot_dimension_numbers<[1], [0], [0], [1], [0, 0, 1, 1], [], []>} : vector<32x384xbf16>, vector<384x128xbf16>, vector<32x128xf32> -> vector<32x128xf32>
    %24 = vector.shape_cast %23 : vector<32x128xf32> to vector<2x16x128xf32>
    %cst_33 = arith.constant dense<0.000000e+00> : vector<2x16xf32>
    %25 = vector.multi_reduction <add>, %24, %cst_33 [2] : vector<2x16x128xf32> to vector<2x16xf32>
    %26 = vector.shape_cast %25 : vector<2x16xf32> to vector<2x16x1xf32>
    %cst_34 = arith.constant dense<0.000000e+00> : vector<2x1xf32>
    %27 = vector.multi_reduction <add>, %26, %cst_34 [1] : vector<2x16x1xf32> to vector<2x1xf32>
    %28 = vector.shape_cast %27 : vector<2x1xf32> to vector<2x1x1xf32>
    %cst_35 = arith.constant 2.048000e+03 : f32
    %29 = vector.broadcast %cst_35 : f32 to vector<2x1x1xf32>
    %30 = arith.divf %28, %29 : vector<2x1x1xf32>
    %31 = vector.broadcast %30 : vector<2x1x1xf32> to vector<2x16x128xf32>
    %32 = arith.subf %24, %31 : vector<2x16x128xf32>
    %33 = arith.mulf %32, %32 : vector<2x16x128xf32>
    %cst_36 = arith.constant dense<0.000000e+00> : vector<2x16xf32>
    %34 = vector.multi_reduction <add>, %33, %cst_36 [2] : vector<2x16x128xf32> to vector<2x16xf32>
    %35 = vector.shape_cast %34 : vector<2x16xf32> to vector<2x16x1xf32>
    %cst_37 = arith.constant dense<0.000000e+00> : vector<2x1xf32>
    %36 = vector.multi_reduction <add>, %35, %cst_37 [1] : vector<2x16x1xf32> to vector<2x1xf32>
    %37 = vector.shape_cast %36 : vector<2x1xf32> to vector<2x1x1xf32>
    %cst_38 = arith.constant 2.048000e+03 : f32
    %38 = vector.broadcast %cst_38 : f32 to vector<2x1x1xf32>
    %39 = arith.divf %37, %38 : vector<2x1x1xf32>
    %cst_39 = arith.constant 9.99999974E-6 : f32
    %40 = vector.broadcast %cst_39 : f32 to vector<2x1x1xf32>
    %41 = arith.addf %39, %40 : vector<2x1x1xf32>
    %42 = math.rsqrt %41 : vector<2x1x1xf32>
    %c0_40 = arith.constant 0 : index
    %c0_41 = arith.constant 0 : index
    %43 = vector.load %arg8[%c0_40, %c0_41] : memref<2x128xf32, #tpu.memory_space<vmem>>, vector<1x128xf32>
    %44 = vector.shape_cast %43 : vector<1x128xf32> to vector<1x1x128xf32>
    %45 = vector.broadcast %44 : vector<1x1x128xf32> to vector<2x1x128xf32>
    %46 = vector.broadcast %42 : vector<2x1x1xf32> to vector<2x1x128xf32>
    %47 = arith.mulf %45, %46 : vector<2x1x128xf32>
    %48 = vector.broadcast %47 : vector<2x1x128xf32> to vector<2x16x128xf32>
    %49 = arith.mulf %32, %48 : vector<2x16x128xf32>
    %c1_42 = arith.constant 1 : index
    %c0_43 = arith.constant 0 : index
    %50 = vector.load %arg8[%c1_42, %c0_43] : memref<2x128xf32, #tpu.memory_space<vmem>>, vector<1x128xf32>
    %51 = vector.shape_cast %50 : vector<1x128xf32> to vector<1x1x128xf32>
    %52 = vector.broadcast %51 : vector<1x1x128xf32> to vector<2x16x128xf32>
    %53 = arith.addf %49, %52 : vector<2x16x128xf32>
    %cst_44 = arith.constant 5.000000e-01 : f32
    %54 = vector.broadcast %cst_44 : f32 to vector<2x16x128xf32>
    %55 = arith.mulf %54, %53 : vector<2x16x128xf32>
    %cst_45 = arith.constant 1.41421354 : f32
    %56 = vector.broadcast %cst_45 : f32 to vector<2x16x128xf32>
    %57 = arith.divf %53, %56 : vector<2x16x128xf32>
    %cst_46 = arith.constant 0.000000e+00 : f32
    %58 = vector.broadcast %cst_46 : f32 to vector<2x16x128xf32>
    %59 = arith.cmpf oge, %57, %58 : vector<2x16x128xf32>
    %cst_47 = arith.constant 1.000000e+00 : f32
    %cst_48 = arith.constant -1.000000e+00 : f32
    %60 = vector.broadcast %cst_47 : f32 to vector<2x16x128xf32>
    %61 = vector.broadcast %cst_48 : f32 to vector<2x16x128xf32>
    %62 = arith.select %59, %60, %61 : vector<2x16x128xi1>, vector<2x16x128xf32>
    %63 = math.absf %57 : vector<2x16x128xf32>
    %cst_49 = arith.constant 0.327591091 : f32
    %64 = vector.broadcast %cst_49 : f32 to vector<2x16x128xf32>
    %65 = arith.mulf %64, %63 : vector<2x16x128xf32>
    %cst_50 = arith.constant 1.000000e+00 : f32
    %66 = vector.broadcast %cst_50 : f32 to vector<2x16x128xf32>
    %67 = arith.addf %66, %65 : vector<2x16x128xf32>
    %cst_51 = arith.constant 1.000000e+00 : f32
    %68 = vector.broadcast %cst_51 : f32 to vector<2x16x128xf32>
    %69 = arith.divf %68, %67 : vector<2x16x128xf32>
    %cst_52 = arith.constant 1.06140542 : f32
    %70 = vector.broadcast %cst_52 : f32 to vector<2x16x128xf32>
    %71 = arith.mulf %70, %69 : vector<2x16x128xf32>
    %cst_53 = arith.constant -1.45315206 : f32
    %72 = vector.broadcast %cst_53 : f32 to vector<2x16x128xf32>
    %73 = arith.addf %71, %72 : vector<2x16x128xf32>
    %74 = arith.mulf %73, %69 : vector<2x16x128xf32>
    %cst_54 = arith.constant 1.42141378 : f32
    %75 = vector.broadcast %cst_54 : f32 to vector<2x16x128xf32>
    %76 = arith.addf %74, %75 : vector<2x16x128xf32>
    %77 = arith.mulf %76, %69 : vector<2x16x128xf32>
    %cst_55 = arith.constant -0.284496725 : f32
    %78 = vector.broadcast %cst_55 : f32 to vector<2x16x128xf32>
    %79 = arith.addf %77, %78 : vector<2x16x128xf32>
    %80 = arith.mulf %79, %69 : vector<2x16x128xf32>
    %cst_56 = arith.constant 0.254829586 : f32
    %81 = vector.broadcast %cst_56 : f32 to vector<2x16x128xf32>
    %82 = arith.addf %80, %81 : vector<2x16x128xf32>
    %83 = arith.mulf %82, %69 : vector<2x16x128xf32>
    %cst_57 = arith.constant 0.000000e+00 : f32
    %84 = vector.broadcast %cst_57 : f32 to vector<2x16x128xf32>
    %85 = arith.subf %84, %63 : vector<2x16x128xf32>
    %86 = arith.mulf %85, %63 : vector<2x16x128xf32>
    %87 = math.exp %86 : vector<2x16x128xf32>
    %88 = arith.mulf %83, %87 : vector<2x16x128xf32>
    %cst_58 = arith.constant 1.000000e+00 : f32
    %89 = vector.broadcast %cst_58 : f32 to vector<2x16x128xf32>
    %90 = arith.subf %89, %88 : vector<2x16x128xf32>
    %91 = arith.mulf %62, %90 : vector<2x16x128xf32>
    %cst_59 = arith.constant 1.000000e+00 : f32
    %92 = vector.broadcast %cst_59 : f32 to vector<2x16x128xf32>
    %93 = arith.addf %92, %91 : vector<2x16x128xf32>
    %94 = arith.mulf %55, %93 : vector<2x16x128xf32>
    %95 = arith.truncf %94 : vector<2x16x128xf32> to vector<2x16x128xbf16>
    %96 = vector.extract_strided_slice %95 {offsets = [0, 0, 0], sizes = [2, 15, 128], strides = [1, 1, 1]} : vector<2x16x128xbf16> to vector<2x15x128xbf16>
    %c0_60 = arith.constant 0 : index
    %c1_61 = arith.constant 1 : index
    %c0_62 = arith.constant 0 : index
    %97 = vector.load %arg13[%c0_60, %c1_61, %c0_62] : memref<2x16x384xbf16, #tpu.memory_space<vmem>>, vector<2x15x128xbf16>
    tpu.vector_store %arg13[%c0_60, %c1_61, %c0_62], %96 {strides = array<i32>} : memref<2x16x384xbf16, #tpu.memory_space<vmem>>, vector<2x15x128xbf16>,
    %c0_63 = arith.constant 0 : index
    %c0_64 = arith.constant 0 : index
    %c128_65 = arith.constant 128 : index
    %98 = vector.load %arg13[%c0_63, %c0_64, %c128_65] : memref<2x16x384xbf16, #tpu.memory_space<vmem>>, vector<2x16x128xbf16>
    tpu.vector_store %arg13[%c0_63, %c0_64, %c128_65], %95 {strides = array<i32>} : memref<2x16x384xbf16, #tpu.memory_space<vmem>>, vector<2x16x128xbf16>,
    %99 = vector.extract_strided_slice %95 {offsets = [0, 1, 0], sizes = [2, 15, 128], strides = [1, 1, 1]} : vector<2x16x128xbf16> to vector<2x15x128xbf16>
    %c0_66 = arith.constant 0 : index
    %c0_67 = arith.constant 0 : index
    %c256_68 = arith.constant 256 : index
    %100 = vector.load %arg13[%c0_66, %c0_67, %c256_68] : memref<2x16x384xbf16, #tpu.memory_space<vmem>>, vector<2x15x128xbf16>
    tpu.vector_store %arg13[%c0_66, %c0_67, %c256_68], %99 {strides = array<i32>} : memref<2x16x384xbf16, #tpu.memory_space<vmem>>, vector<2x15x128xbf16>,
    %c0_69 = arith.constant 0 : index
    %c0_70 = arith.constant 0 : index
    %c0_71 = arith.constant 0 : index
    %101 = vector.load %arg13[%c0_69, %c0_70, %c0_71] : memref<2x16x384xbf16, #tpu.memory_space<vmem>>, vector<2x16x384xbf16>
    %102 = vector.shape_cast %101 : vector<2x16x384xbf16> to vector<32x384xbf16>
    %c0_72 = arith.constant 0 : index
    %c0_73 = arith.constant 0 : index
    %103 = vector.load %arg5[%c0_72, %c0_73] : memref<384x128xbf16, #tpu.memory_space<vmem>>, vector<384x128xbf16>
    %cst_74 = arith.constant dense<0.000000e+00> : vector<32x128xf32>
    %104 = tpu.matmul %102, %103, %cst_74 {dimension_numbers = #tpu.dot_dimension_numbers<[1], [0], [0], [1], [0, 0, 1, 1], [], []>} : vector<32x384xbf16>, vector<384x128xbf16>, vector<32x128xf32> -> vector<32x128xf32>
    %105 = vector.shape_cast %104 : vector<32x128xf32> to vector<2x16x128xf32>
    %cst_75 = arith.constant dense<0.000000e+00> : vector<2x16xf32>
    %106 = vector.multi_reduction <add>, %105, %cst_75 [2] : vector<2x16x128xf32> to vector<2x16xf32>
    %107 = vector.shape_cast %106 : vector<2x16xf32> to vector<2x16x1xf32>
    %cst_76 = arith.constant dense<0.000000e+00> : vector<2x1xf32>
    %108 = vector.multi_reduction <add>, %107, %cst_76 [1] : vector<2x16x1xf32> to vector<2x1xf32>
    %109 = vector.shape_cast %108 : vector<2x1xf32> to vector<2x1x1xf32>
    %cst_77 = arith.constant 2.048000e+03 : f32
    %110 = vector.broadcast %cst_77 : f32 to vector<2x1x1xf32>
    %111 = arith.divf %109, %110 : vector<2x1x1xf32>
    %112 = vector.broadcast %111 : vector<2x1x1xf32> to vector<2x16x128xf32>
    %113 = arith.subf %105, %112 : vector<2x16x128xf32>
    %114 = arith.mulf %113, %113 : vector<2x16x128xf32>
    %cst_78 = arith.constant dense<0.000000e+00> : vector<2x16xf32>
    %115 = vector.multi_reduction <add>, %114, %cst_78 [2] : vector<2x16x128xf32> to vector<2x16xf32>
    %116 = vector.shape_cast %115 : vector<2x16xf32> to vector<2x16x1xf32>
    %cst_79 = arith.constant dense<0.000000e+00> : vector<2x1xf32>
    %117 = vector.multi_reduction <add>, %116, %cst_79 [1] : vector<2x16x1xf32> to vector<2x1xf32>
    %118 = vector.shape_cast %117 : vector<2x1xf32> to vector<2x1x1xf32>
    %cst_80 = arith.constant 2.048000e+03 : f32
    %119 = vector.broadcast %cst_80 : f32 to vector<2x1x1xf32>
    %120 = arith.divf %118, %119 : vector<2x1x1xf32>
    %cst_81 = arith.constant 9.99999974E-6 : f32
    %121 = vector.broadcast %cst_81 : f32 to vector<2x1x1xf32>
    %122 = arith.addf %120, %121 : vector<2x1x1xf32>
    %123 = math.rsqrt %122 : vector<2x1x1xf32>
    %c0_82 = arith.constant 0 : index
    %c0_83 = arith.constant 0 : index
    %124 = vector.load %arg9[%c0_82, %c0_83] : memref<2x128xf32, #tpu.memory_space<vmem>>, vector<1x128xf32>
    %125 = vector.shape_cast %124 : vector<1x128xf32> to vector<1x1x128xf32>
    %126 = vector.broadcast %125 : vector<1x1x128xf32> to vector<2x1x128xf32>
    %127 = vector.broadcast %123 : vector<2x1x1xf32> to vector<2x1x128xf32>
    %128 = arith.mulf %126, %127 : vector<2x1x128xf32>
    %129 = vector.broadcast %128 : vector<2x1x128xf32> to vector<2x16x128xf32>
    %130 = arith.mulf %113, %129 : vector<2x16x128xf32>
    %c1_84 = arith.constant 1 : index
    %c0_85 = arith.constant 0 : index
    %131 = vector.load %arg9[%c1_84, %c0_85] : memref<2x128xf32, #tpu.memory_space<vmem>>, vector<1x128xf32>
    %132 = vector.shape_cast %131 : vector<1x128xf32> to vector<1x1x128xf32>
    %133 = vector.broadcast %132 : vector<1x1x128xf32> to vector<2x16x128xf32>
    %134 = arith.addf %130, %133 : vector<2x16x128xf32>
    %135 = arith.addf %134, %13 : vector<2x16x128xf32>
    %cst_86 = arith.constant 5.000000e-01 : f32
    %136 = vector.broadcast %cst_86 : f32 to vector<2x16x128xf32>
    %137 = arith.mulf %136, %135 : vector<2x16x128xf32>
    %cst_87 = arith.constant 1.41421354 : f32
    %138 = vector.broadcast %cst_87 : f32 to vector<2x16x128xf32>
    %139 = arith.divf %135, %138 : vector<2x16x128xf32>
    %cst_88 = arith.constant 0.000000e+00 : f32
    %140 = vector.broadcast %cst_88 : f32 to vector<2x16x128xf32>
    %141 = arith.cmpf oge, %139, %140 : vector<2x16x128xf32>
    %cst_89 = arith.constant 1.000000e+00 : f32
    %cst_90 = arith.constant -1.000000e+00 : f32
    %142 = vector.broadcast %cst_89 : f32 to vector<2x16x128xf32>
    %143 = vector.broadcast %cst_90 : f32 to vector<2x16x128xf32>
    %144 = arith.select %141, %142, %143 : vector<2x16x128xi1>, vector<2x16x128xf32>
    %145 = math.absf %139 : vector<2x16x128xf32>
    %cst_91 = arith.constant 0.327591091 : f32
    %146 = vector.broadcast %cst_91 : f32 to vector<2x16x128xf32>
    %147 = arith.mulf %146, %145 : vector<2x16x128xf32>
    %cst_92 = arith.constant 1.000000e+00 : f32
    %148 = vector.broadcast %cst_92 : f32 to vector<2x16x128xf32>
    %149 = arith.addf %148, %147 : vector<2x16x128xf32>
    %cst_93 = arith.constant 1.000000e+00 : f32
    %150 = vector.broadcast %cst_93 : f32 to vector<2x16x128xf32>
    %151 = arith.divf %150, %149 : vector<2x16x128xf32>
    %cst_94 = arith.constant 1.06140542 : f32
    %152 = vector.broadcast %cst_94 : f32 to vector<2x16x128xf32>
    %153 = arith.mulf %152, %151 : vector<2x16x128xf32>
    %cst_95 = arith.constant -1.45315206 : f32
    %154 = vector.broadcast %cst_95 : f32 to vector<2x16x128xf32>
    %155 = arith.addf %153, %154 : vector<2x16x128xf32>
    %156 = arith.mulf %155, %151 : vector<2x16x128xf32>
    %cst_96 = arith.constant 1.42141378 : f32
    %157 = vector.broadcast %cst_96 : f32 to vector<2x16x128xf32>
    %158 = arith.addf %156, %157 : vector<2x16x128xf32>
    %159 = arith.mulf %158, %151 : vector<2x16x128xf32>
    %cst_97 = arith.constant -0.284496725 : f32
    %160 = vector.broadcast %cst_97 : f32 to vector<2x16x128xf32>
    %161 = arith.addf %159, %160 : vector<2x16x128xf32>
    %162 = arith.mulf %161, %151 : vector<2x16x128xf32>
    %cst_98 = arith.constant 0.254829586 : f32
    %163 = vector.broadcast %cst_98 : f32 to vector<2x16x128xf32>
    %164 = arith.addf %162, %163 : vector<2x16x128xf32>
    %165 = arith.mulf %164, %151 : vector<2x16x128xf32>
    %cst_99 = arith.constant 0.000000e+00 : f32
    %166 = vector.broadcast %cst_99 : f32 to vector<2x16x128xf32>
    %167 = arith.subf %166, %145 : vector<2x16x128xf32>
    %168 = arith.mulf %167, %145 : vector<2x16x128xf32>
    %169 = math.exp %168 : vector<2x16x128xf32>
    %170 = arith.mulf %165, %169 : vector<2x16x128xf32>
    %cst_100 = arith.constant 1.000000e+00 : f32
    %171 = vector.broadcast %cst_100 : f32 to vector<2x16x128xf32>
    %172 = arith.subf %171, %170 : vector<2x16x128xf32>
    %173 = arith.mulf %144, %172 : vector<2x16x128xf32>
    %cst_101 = arith.constant 1.000000e+00 : f32
    %174 = vector.broadcast %cst_101 : f32 to vector<2x16x128xf32>
    %175 = arith.addf %174, %173 : vector<2x16x128xf32>
    %176 = arith.mulf %137, %175 : vector<2x16x128xf32>
    %177 = arith.truncf %176 : vector<2x16x128xf32> to vector<2x16x128xbf16>
    %178 = vector.extract_strided_slice %177 {offsets = [0, 0, 0], sizes = [2, 15, 128], strides = [1, 1, 1]} : vector<2x16x128xbf16> to vector<2x15x128xbf16>
    %c0_102 = arith.constant 0 : index
    %c1_103 = arith.constant 1 : index
    %c0_104 = arith.constant 0 : index
    %179 = vector.load %arg13[%c0_102, %c1_103, %c0_104] : memref<2x16x384xbf16, #tpu.memory_space<vmem>>, vector<2x15x128xbf16>
    tpu.vector_store %arg13[%c0_102, %c1_103, %c0_104], %178 {strides = array<i32>} : memref<2x16x384xbf16, #tpu.memory_space<vmem>>, vector<2x15x128xbf16>,
    %c0_105 = arith.constant 0 : index
    %c0_106 = arith.constant 0 : index
    %c128_107 = arith.constant 128 : index
    %180 = vector.load %arg13[%c0_105, %c0_106, %c128_107] : memref<2x16x384xbf16, #tpu.memory_space<vmem>>, vector<2x16x128xbf16>
    tpu.vector_store %arg13[%c0_105, %c0_106, %c128_107], %177 {strides = array<i32>} : memref<2x16x384xbf16, #tpu.memory_space<vmem>>, vector<2x16x128xbf16>,
    %181 = vector.extract_strided_slice %177 {offsets = [0, 1, 0], sizes = [2, 15, 128], strides = [1, 1, 1]} : vector<2x16x128xbf16> to vector<2x15x128xbf16>
    %c0_108 = arith.constant 0 : index
    %c0_109 = arith.constant 0 : index
    %c256_110 = arith.constant 256 : index
    %182 = vector.load %arg13[%c0_108, %c0_109, %c256_110] : memref<2x16x384xbf16, #tpu.memory_space<vmem>>, vector<2x15x128xbf16>
    tpu.vector_store %arg13[%c0_108, %c0_109, %c256_110], %181 {strides = array<i32>} : memref<2x16x384xbf16, #tpu.memory_space<vmem>>, vector<2x15x128xbf16>,
    %c0_111 = arith.constant 0 : index
    %c0_112 = arith.constant 0 : index
    %c0_113 = arith.constant 0 : index
    %183 = vector.load %arg13[%c0_111, %c0_112, %c0_113] : memref<2x16x384xbf16, #tpu.memory_space<vmem>>, vector<2x16x384xbf16>
    %184 = vector.shape_cast %183 : vector<2x16x384xbf16> to vector<32x384xbf16>
    %c0_114 = arith.constant 0 : index
    %c0_115 = arith.constant 0 : index
    %185 = vector.load %arg6[%c0_114, %c0_115] : memref<384x64xbf16, #tpu.memory_space<vmem>>, vector<384x64xbf16>
    %cst_116 = arith.constant dense<0.000000e+00> : vector<32x64xf32>
    %186 = tpu.matmul %184, %185, %cst_116 {dimension_numbers = #tpu.dot_dimension_numbers<[1], [0], [0], [1], [0, 0, 1, 1], [], []>} : vector<32x384xbf16>, vector<384x64xbf16>, vector<32x64xf32> -> vector<32x64xf32>
    %187 = vector.shape_cast %186 : vector<32x64xf32> to vector<2x16x64xf32>
    %cst_117 = arith.constant dense<0.000000e+00> : vector<2x16xf32>
    %188 = vector.multi_reduction <add>, %187, %cst_117 [2] : vector<2x16x64xf32> to vector<2x16xf32>
    %189 = vector.shape_cast %188 : vector<2x16xf32> to vector<2x16x1xf32>
    %cst_118 = arith.constant dense<0.000000e+00> : vector<2x1xf32>
    %190 = vector.multi_reduction <add>, %189, %cst_118 [1] : vector<2x16x1xf32> to vector<2x1xf32>
    %191 = vector.shape_cast %190 : vector<2x1xf32> to vector<2x1x1xf32>
    %cst_119 = arith.constant 1.024000e+03 : f32
    %192 = vector.broadcast %cst_119 : f32 to vector<2x1x1xf32>
    %193 = arith.divf %191, %192 : vector<2x1x1xf32>
    %194 = vector.broadcast %193 : vector<2x1x1xf32> to vector<2x16x64xf32>
    %195 = arith.subf %187, %194 : vector<2x16x64xf32>
    %196 = arith.mulf %195, %195 : vector<2x16x64xf32>
    %cst_120 = arith.constant dense<0.000000e+00> : vector<2x16xf32>
    %197 = vector.multi_reduction <add>, %196, %cst_120 [2] : vector<2x16x64xf32> to vector<2x16xf32>
    %198 = vector.shape_cast %197 : vector<2x16xf32> to vector<2x16x1xf32>
    %cst_121 = arith.constant dense<0.000000e+00> : vector<2x1xf32>
    %199 = vector.multi_reduction <add>, %198, %cst_121 [1] : vector<2x16x1xf32> to vector<2x1xf32>
    %200 = vector.shape_cast %199 : vector<2x1xf32> to vector<2x1x1xf32>
    %cst_122 = arith.constant 1.024000e+03 : f32
    %201 = vector.broadcast %cst_122 : f32 to vector<2x1x1xf32>
    %202 = arith.divf %200, %201 : vector<2x1x1xf32>
    %cst_123 = arith.constant 9.99999974E-6 : f32
    %203 = vector.broadcast %cst_123 : f32 to vector<2x1x1xf32>
    %204 = arith.addf %202, %203 : vector<2x1x1xf32>
    %205 = math.rsqrt %204 : vector<2x1x1xf32>
    %c0_124 = arith.constant 0 : index
    %c0_125 = arith.constant 0 : index
    %206 = vector.load %arg10[%c0_124, %c0_125] : memref<2x64xf32, #tpu.memory_space<vmem>>, vector<1x64xf32>
    %207 = vector.shape_cast %206 : vector<1x64xf32> to vector<1x1x64xf32>
    %208 = vector.broadcast %207 : vector<1x1x64xf32> to vector<2x1x64xf32>
    %209 = vector.broadcast %205 : vector<2x1x1xf32> to vector<2x1x64xf32>
    %210 = arith.mulf %208, %209 : vector<2x1x64xf32>
    %211 = vector.broadcast %210 : vector<2x1x64xf32> to vector<2x16x64xf32>
    %212 = arith.mulf %195, %211 : vector<2x16x64xf32>
    %c1_126 = arith.constant 1 : index
    %c0_127 = arith.constant 0 : index
    %213 = vector.load %arg10[%c1_126, %c0_127] : memref<2x64xf32, #tpu.memory_space<vmem>>, vector<1x64xf32>
    %214 = vector.shape_cast %213 : vector<1x64xf32> to vector<1x1x64xf32>
    %215 = vector.broadcast %214 : vector<1x1x64xf32> to vector<2x16x64xf32>
    %216 = arith.addf %212, %215 : vector<2x16x64xf32>
    %cst_128 = arith.constant 5.000000e-01 : f32
    %217 = vector.broadcast %cst_128 : f32 to vector<2x16x64xf32>
    %218 = arith.mulf %217, %216 : vector<2x16x64xf32>
    %cst_129 = arith.constant 1.41421354 : f32
    %219 = vector.broadcast %cst_129 : f32 to vector<2x16x64xf32>
    %220 = arith.divf %216, %219 : vector<2x16x64xf32>
    %cst_130 = arith.constant 0.000000e+00 : f32
    %221 = vector.broadcast %cst_130 : f32 to vector<2x16x64xf32>
    %222 = arith.cmpf oge, %220, %221 : vector<2x16x64xf32>
    %cst_131 = arith.constant 1.000000e+00 : f32
    %cst_132 = arith.constant -1.000000e+00 : f32
    %223 = vector.broadcast %cst_131 : f32 to vector<2x16x64xf32>
    %224 = vector.broadcast %cst_132 : f32 to vector<2x16x64xf32>
    %225 = arith.select %222, %223, %224 : vector<2x16x64xi1>, vector<2x16x64xf32>
    %226 = math.absf %220 : vector<2x16x64xf32>
    %cst_133 = arith.constant 0.327591091 : f32
    %227 = vector.broadcast %cst_133 : f32 to vector<2x16x64xf32>
    %228 = arith.mulf %227, %226 : vector<2x16x64xf32>
    %cst_134 = arith.constant 1.000000e+00 : f32
    %229 = vector.broadcast %cst_134 : f32 to vector<2x16x64xf32>
    %230 = arith.addf %229, %228 : vector<2x16x64xf32>
    %cst_135 = arith.constant 1.000000e+00 : f32
    %231 = vector.broadcast %cst_135 : f32 to vector<2x16x64xf32>
    %232 = arith.divf %231, %230 : vector<2x16x64xf32>
    %cst_136 = arith.constant 1.06140542 : f32
    %233 = vector.broadcast %cst_136 : f32 to vector<2x16x64xf32>
    %234 = arith.mulf %233, %232 : vector<2x16x64xf32>
    %cst_137 = arith.constant -1.45315206 : f32
    %235 = vector.broadcast %cst_137 : f32 to vector<2x16x64xf32>
    %236 = arith.addf %234, %235 : vector<2x16x64xf32>
    %237 = arith.mulf %236, %232 : vector<2x16x64xf32>
    %cst_138 = arith.constant 1.42141378 : f32
    %238 = vector.broadcast %cst_138 : f32 to vector<2x16x64xf32>
    %239 = arith.addf %237, %238 : vector<2x16x64xf32>
    %240 = arith.mulf %239, %232 : vector<2x16x64xf32>
    %cst_139 = arith.constant -0.284496725 : f32
    %241 = vector.broadcast %cst_139 : f32 to vector<2x16x64xf32>
    %242 = arith.addf %240, %241 : vector<2x16x64xf32>
    %243 = arith.mulf %242, %232 : vector<2x16x64xf32>
    %cst_140 = arith.constant 0.254829586 : f32
    %244 = vector.broadcast %cst_140 : f32 to vector<2x16x64xf32>
    %245 = arith.addf %243, %244 : vector<2x16x64xf32>
    %246 = arith.mulf %245, %232 : vector<2x16x64xf32>
    %cst_141 = arith.constant 0.000000e+00 : f32
    %247 = vector.broadcast %cst_141 : f32 to vector<2x16x64xf32>
    %248 = arith.subf %247, %226 : vector<2x16x64xf32>
    %249 = arith.mulf %248, %226 : vector<2x16x64xf32>
    %250 = math.exp %249 : vector<2x16x64xf32>
    %251 = arith.mulf %246, %250 : vector<2x16x64xf32>
    %cst_142 = arith.constant 1.000000e+00 : f32
    %252 = vector.broadcast %cst_142 : f32 to vector<2x16x64xf32>
    %253 = arith.subf %252, %251 : vector<2x16x64xf32>
    %254 = arith.mulf %225, %253 : vector<2x16x64xf32>
    %cst_143 = arith.constant 1.000000e+00 : f32
    %255 = vector.broadcast %cst_143 : f32 to vector<2x16x64xf32>
    %256 = arith.addf %255, %254 : vector<2x16x64xf32>
    %257 = arith.mulf %218, %256 : vector<2x16x64xf32>
    %258 = arith.truncf %257 : vector<2x16x64xf32> to vector<2x16x64xbf16>
    %259 = vector.extract_strided_slice %258 {offsets = [0, 0, 0], sizes = [2, 15, 64], strides = [1, 1, 1]} : vector<2x16x64xbf16> to vector<2x15x64xbf16>
    %c0_144 = arith.constant 0 : index
    %c1_145 = arith.constant 1 : index
    %c0_146 = arith.constant 0 : index
    %260 = vector.load %arg14[%c0_144, %c1_145, %c0_146] : memref<2x16x192xbf16, #tpu.memory_space<vmem>>, vector<2x15x64xbf16>
    tpu.vector_store %arg14[%c0_144, %c1_145, %c0_146], %259 {strides = array<i32>} : memref<2x16x192xbf16, #tpu.memory_space<vmem>>, vector<2x15x64xbf16>,
    %c0_147 = arith.constant 0 : index
    %c0_148 = arith.constant 0 : index
    %c64 = arith.constant 64 : index
    %261 = vector.load %arg14[%c0_147, %c0_148, %c64] : memref<2x16x192xbf16, #tpu.memory_space<vmem>>, vector<2x16x64xbf16>
    tpu.vector_store %arg14[%c0_147, %c0_148, %c64], %258 {strides = array<i32>} : memref<2x16x192xbf16, #tpu.memory_space<vmem>>, vector<2x16x64xbf16>,
    %262 = vector.extract_strided_slice %258 {offsets = [0, 1, 0], sizes = [2, 15, 64], strides = [1, 1, 1]} : vector<2x16x64xbf16> to vector<2x15x64xbf16>
    %c0_149 = arith.constant 0 : index
    %c0_150 = arith.constant 0 : index
    %c128_151 = arith.constant 128 : index
    %263 = vector.load %arg14[%c0_149, %c0_150, %c128_151] : memref<2x16x192xbf16, #tpu.memory_space<vmem>>, vector<2x15x64xbf16>
    tpu.vector_store %arg14[%c0_149, %c0_150, %c128_151], %262 {strides = array<i32>} : memref<2x16x192xbf16, #tpu.memory_space<vmem>>, vector<2x15x64xbf16>,
    %c0_152 = arith.constant 0 : index
    %c0_153 = arith.constant 0 : index
    %c0_154 = arith.constant 0 : index
    %264 = vector.load %arg14[%c0_152, %c0_153, %c0_154] : memref<2x16x192xbf16, #tpu.memory_space<vmem>>, vector<2x16x192xbf16>
    %265 = vector.shape_cast %264 : vector<2x16x192xbf16> to vector<32x192xbf16>
    %c0_155 = arith.constant 0 : index
    %c0_156 = arith.constant 0 : index
    %266 = vector.load %arg7[%c0_155, %c0_156] : memref<192x64xbf16, #tpu.memory_space<vmem>>, vector<192x64xbf16>
    %cst_157 = arith.constant dense<0.000000e+00> : vector<32x64xf32>
    %267 = tpu.matmul %265, %266, %cst_157 {dimension_numbers = #tpu.dot_dimension_numbers<[1], [0], [0], [1], [0, 0, 1, 1], [], []>} : vector<32x192xbf16>, vector<192x64xbf16>, vector<32x64xf32> -> vector<32x64xf32>
    %268 = vector.shape_cast %267 : vector<32x64xf32> to vector<2x16x64xf32>
    %cst_158 = arith.constant dense<0.000000e+00> : vector<2x16xf32>
    %269 = vector.multi_reduction <add>, %268, %cst_158 [2] : vector<2x16x64xf32> to vector<2x16xf32>
    %270 = vector.shape_cast %269 : vector<2x16xf32> to vector<2x16x1xf32>
    %cst_159 = arith.constant dense<0.000000e+00> : vector<2x1xf32>
    %271 = vector.multi_reduction <add>, %270, %cst_159 [1] : vector<2x16x1xf32> to vector<2x1xf32>
    %272 = vector.shape_cast %271 : vector<2x1xf32> to vector<2x1x1xf32>
    %cst_160 = arith.constant 1.024000e+03 : f32
    %273 = vector.broadcast %cst_160 : f32 to vector<2x1x1xf32>
    %274 = arith.divf %272, %273 : vector<2x1x1xf32>
    %275 = vector.broadcast %274 : vector<2x1x1xf32> to vector<2x16x64xf32>
    %276 = arith.subf %268, %275 : vector<2x16x64xf32>
    %277 = arith.mulf %276, %276 : vector<2x16x64xf32>
    %cst_161 = arith.constant dense<0.000000e+00> : vector<2x16xf32>
    %278 = vector.multi_reduction <add>, %277, %cst_161 [2] : vector<2x16x64xf32> to vector<2x16xf32>
    %279 = vector.shape_cast %278 : vector<2x16xf32> to vector<2x16x1xf32>
    %cst_162 = arith.constant dense<0.000000e+00> : vector<2x1xf32>
    %280 = vector.multi_reduction <add>, %279, %cst_162 [1] : vector<2x16x1xf32> to vector<2x1xf32>
    %281 = vector.shape_cast %280 : vector<2x1xf32> to vector<2x1x1xf32>
    %cst_163 = arith.constant 1.024000e+03 : f32
    %282 = vector.broadcast %cst_163 : f32 to vector<2x1x1xf32>
    %283 = arith.divf %281, %282 : vector<2x1x1xf32>
    %cst_164 = arith.constant 9.99999974E-6 : f32
    %284 = vector.broadcast %cst_164 : f32 to vector<2x1x1xf32>
    %285 = arith.addf %283, %284 : vector<2x1x1xf32>
    %286 = math.rsqrt %285 : vector<2x1x1xf32>
    %c0_165 = arith.constant 0 : index
    %c0_166 = arith.constant 0 : index
    %287 = vector.load %arg11[%c0_165, %c0_166] : memref<2x64xf32, #tpu.memory_space<vmem>>, vector<1x64xf32>
    %288 = vector.shape_cast %287 : vector<1x64xf32> to vector<1x1x64xf32>
    %289 = vector.broadcast %288 : vector<1x1x64xf32> to vector<2x1x64xf32>
    %290 = vector.broadcast %286 : vector<2x1x1xf32> to vector<2x1x64xf32>
    %291 = arith.mulf %289, %290 : vector<2x1x64xf32>
    %292 = vector.broadcast %291 : vector<2x1x64xf32> to vector<2x16x64xf32>
    %293 = arith.mulf %276, %292 : vector<2x16x64xf32>
    %c1_167 = arith.constant 1 : index
    %c0_168 = arith.constant 0 : index
    %294 = vector.load %arg11[%c1_167, %c0_168] : memref<2x64xf32, #tpu.memory_space<vmem>>, vector<1x64xf32>
    %295 = vector.shape_cast %294 : vector<1x64xf32> to vector<1x1x64xf32>
    %296 = vector.broadcast %295 : vector<1x1x64xf32> to vector<2x16x64xf32>
    %297 = arith.addf %293, %296 : vector<2x16x64xf32>
    %298 = vector.shape_cast %297 : vector<2x16x64xf32> to vector<32x64xf32>
    %299 = vector.extract_strided_slice %298 {offsets = [0, 0], sizes = [16, 64], strides = [1, 1]} : vector<32x64xf32> to vector<16x64xf32>
    %300 = vector.extract_strided_slice %298 {offsets = [16, 0], sizes = [16, 64], strides = [1, 1]} : vector<32x64xf32> to vector<16x64xf32>
    %301 = tpu.concatenate %299, %300 in 1 : vector<16x64xf32>, vector<16x64xf32> -> vector<16x128xf32>
    %c0_169 = arith.constant 0 : index
    %c0_170 = arith.constant 0 : index
    %302 = vector.load %arg12[%c0_169, %c0_170] : memref<16x128xf32, #tpu.memory_space<vmem>>, vector<16x128xf32>
    tpu.vector_store %arg12[%c0_169, %c0_170], %301 {strides = array<i32>} : memref<16x128xf32, #tpu.memory_space<vmem>>, vector<16x128xf32>,
    return
  }
  func.func @transform_0(%arg0: i32) -> (i32, i32) {
    %c0_i32 = arith.constant 0 : i32
    %c0_i32_0 = arith.constant 0 : i32
    return %arg0, %c0_i32 : i32, i32
  }
  func.func @transform_1(%arg0: i32) -> (i32, i32) {
    %c0_i32 = arith.constant 0 : i32
    %c0_i32_0 = arith.constant 0 : i32
    %c0_i32_1 = arith.constant 0 : i32
    return %c0_i32, %c0_i32_0 : i32, i32
  }
  func.func @transform_2(%arg0: i32) -> (i32, i32) {
    %c0_i32 = arith.constant 0 : i32
    %c0_i32_0 = arith.constant 0 : i32
    %c0_i32_1 = arith.constant 0 : i32
    return %c0_i32, %c0_i32_0 : i32, i32
  }
  func.func @transform_3(%arg0: i32) -> (i32, i32) {
    %c0_i32 = arith.constant 0 : i32
    %c0_i32_0 = arith.constant 0 : i32
    %c0_i32_1 = arith.constant 0 : i32
    return %c0_i32, %c0_i32_0 : i32, i32
  }
  func.func @transform_4(%arg0: i32) -> (i32, i32) {
    %c0_i32 = arith.constant 0 : i32
    %c0_i32_0 = arith.constant 0 : i32
    %c0_i32_1 = arith.constant 0 : i32
    return %c0_i32, %c0_i32_0 : i32, i32
  }
  func.func @transform_5(%arg0: i32) -> (i32, i32) {
    %c0_i32 = arith.constant 0 : i32
    %c0_i32_0 = arith.constant 0 : i32
    %c0_i32_1 = arith.constant 0 : i32
    return %c0_i32, %c0_i32_0 : i32, i32
  }
  func.func @transform_6(%arg0: i32) -> (i32, i32) {
    %c0_i32 = arith.constant 0 : i32
    %c0_i32_0 = arith.constant 0 : i32
    %c0_i32_1 = arith.constant 0 : i32
    return %c0_i32, %c0_i32_0 : i32, i32
  }
  func.func @transform_7(%arg0: i32) -> (i32, i32) {
    %c0_i32 = arith.constant 0 : i32
    %c0_i32_0 = arith.constant 0 : i32
    %c0_i32_1 = arith.constant 0 : i32
    return %c0_i32, %c0_i32_0 : i32, i32
  }
  func.func @transform_8(%arg0: i32) -> (i32, i32) {
    %c0_i32 = arith.constant 0 : i32
    %c0_i32_0 = arith.constant 0 : i32
    %c0_i32_1 = arith.constant 0 : i32
    return %c0_i32, %c0_i32_0 : i32, i32
  }
  func.func @transform_9(%arg0: i32) -> (i32, i32) {
    %c0_i32 = arith.constant 0 : i32
    %c0_i32_0 = arith.constant 0 : i32
    %c0_i32_1 = arith.constant 0 : i32
    return %c0_i32, %c0_i32_0 : i32, i32
  }
  func.func @transform_10(%arg0: i32) -> (i32, i32) {
    %c0_i32 = arith.constant 0 : i32
    %c0_i32_0 = arith.constant 0 : i32
    %c0_i32_1 = arith.constant 0 : i32
    return %c0_i32, %c0_i32_0 : i32, i32
  }
  func.func @transform_11(%arg0: i32) -> (i32, i32) {
    %c0_i32 = arith.constant 0 : i32
    %c0_i32_0 = arith.constant 0 : i32
    return %arg0, %c0_i32 : i32, i32
  }
}

</mosaic_0001>

<bundles_post_ra>
// kernel: tile.34
= control target key start
LH: loop header
LB: loop body
LE: loop exit
PB: predicated region body
PF: predicated region fallthrough
CT: control target
= control target key end

     0   :  { %s28_s0 = inlined_call_operand.vmem [shape: f32[8], index: 0, kind: input, shape index: {}]   ;;  %s29_s1 = inlined_call_operand.vmem [shape: f32[16,8], index: 1, kind: output, shape index: {}]  }
   0x1   :  { %v4_v0 = vld [vmem:[%s28_s0] ss:$0 sm:$0xff] }
   0x2   :  { %5 = vst [vmem:[%s29_s1] sm:$0xff] %v4_v0  ;;  %8 = vst [vmem:[%s29_s1 + $0x8] sm:$0xff] %v4_v0 }

// kernel: tile.38
= control target key start
LH: loop header
LB: loop body
LE: loop exit
PB: predicated region body
PF: predicated region fallthrough
CT: control target
= control target key end

     0   :  { %s133_s10 = smov 120   ;;  %s134_s11 = smov 104   ;;  %vm3_vm0 = vcmask 64512   ;;  %vm9_vm1 = vcmask 1048512   ;;  %vm15_vm2 = vcmask 982912   ;;  %vm21_vm3 = vcmask 917312   ;;  %s209_s0 = inlined_call_operand.vmem [shape: f32[16,8], index: 0, kind: input, shape index: {}]   ;;  %s210_s1 = inlined_call_operand.vmem [shape: f32[1,128], index: 1, kind: output, shape index: {}]  }
   0x1   :  { %v103_v0 = vld [vmem:[%s209_s0 + $0xf] sm:$0x1]   ;;  %v105_v1 = vld [vmem:[%s209_s0 + $0xd] sm:$0x1]   ;;  %v104_v2 = vld [vmem:[%s209_s0 + $0xe] sm:$0x1]  }
   0x2   :  { %7 = vrot.lane.b32.xlu0 %v103_v0, %s133_s10  ;;  %19 = vrot.lane.b32.xlu1 %v105_v1, %s134_s11  ;;  %v106_v3 = vld [vmem:[%s209_s0 + $0xc] sm:$0x1]   ;;  %s135_s16 = smov 112   ;;  %s136_s17 = smov 96   ;;  %v107_v4 = vld [vmem:[%s209_s0 + $0xb] sm:$0x1]  }
   0x3   :  { %v108_v5 = vld [vmem:[%s209_s0 + $0xa] sm:$0x1]   ;;  %v2_v6 = vld [vmem:[%s209_s0] sm:$0x1]   ;;  %s137_s24 = smov 88   ;;  %s138_s25 = smov 80  }
   0x4   :  { %4 = vst.msk [vmem:[#allocation0] sm:$0x1] %vm3_vm0, %v2_v6   ;;  %v109_v7 = vld [vmem:[%s209_s0 + $0x9] sm:$0x1]   ;;  %v110_v8 = vld [vmem:[%s209_s0 + $0x8] sm:$0x1]  }
   0x5   :  { %s139_s30 = smov 72   ;;  %s140_s2 = smov 64   ;;  %v111_v9 = vld [vmem:[%s209_s0 + $0x7] sm:$0x1]   ;;  %v112_v10 = vld [vmem:[%s209_s0 + $0x6] sm:$0x1]  }
   0x6   :  { %13 = vrot.lane.b32.xlu0 %v104_v2, %s135_s16  ;;  %25 = vrot.lane.b32.xlu1 %v106_v3, %s136_s17  ;;  %s141_s7 = smov 56   ;;  %s142_s8 = smov 48   ;;  %v113_v11 = vld [vmem:[%s209_s0 + $0x5] sm:$0x1]   ;;  %v114_v12 = vld [vmem:[%s209_s0 + $0x4] sm:$0x1]  }
   0x7   :  { %s143_s13 = smov 40   ;;  %s144_s14 = smov 32   ;;  %v115_v13 = vld [vmem:[%s209_s0 + $0x3] sm:$0x1]   ;;  %v116_v14 = vld [vmem:[%s209_s0 + $0x2] sm:$0x1]  }
   0x8   :  { %s145_s19 = smov 24   ;;  %s146_s20 = smov 16   ;;  %v117_v15 = vld [vmem:[%s209_s0 + $0x1] sm:$0x1]   ;;  %vm27_vm4 = vcmask 851712   ;;  %vm33_vm5 = vcmask 786112  }
   0x9   :  { %s147_s0 = smov 8   ;;  %vm39_vm6 = vcmask 720512   ;;  %vm45_vm7 = vcmask 654912   ;;  %vm51_vm8 = vcmask 589312   ;;  %vm57_vm9 = vcmask 523712  }
   0xa   :  { %31 = vrot.lane.b32.xlu0 %v107_v4, %s137_s24  ;;  %37 = vrot.lane.b32.xlu1 %v108_v5, %s138_s25  ;;  %vm63_vm10 = vcmask 458112   ;;  %vm69_vm11 = vcmask 392512   ;;  %vm75_vm12 = vcmask 326912   ;;  %vm81_vm13 = vcmask 261312  }
   0xb   :  { %vm87_vm14 = vcmask 195712   ;;  %vm93_vm15 = vcmask 130112  }
   0xe   :  { %43 = vrot.lane.b32.xlu0 %v109_v7, %s139_s30  ;;  %49 = vrot.lane.b32.xlu1 %v110_v8, %s140_s2 }
  0x12   :  { %55 = vrot.lane.b32.xlu0 %v111_v9, %s141_s7  ;;  %61 = vrot.lane.b32.xlu1 %v112_v10, %s142_s8 }
  0x16   :  { %67 = vrot.lane.b32.xlu0 %v113_v11, %s143_s13  ;;  %73 = vrot.lane.b32.xlu1 %v114_v12, %s144_s14 }
  0x1a   :  { %79 = vrot.lane.b32.xlu0 %v115_v13, %s145_s19  ;;  %85 = vrot.lane.b32.xlu1 %v116_v14, %s146_s20 }
  0x1e   :  { %91 = vrot.lane.b32.xlu0 %v117_v15, %s147_s0 }
  0x74   :  { %v8_v16 = vpop.permute.xlu0 %7   ;;  %v20_v17 = vpop.permute.xlu1 %19  }
  0x75   :  { %10 = vst.msk [vmem:[#allocation0] sm:$0x1] %vm9_vm1, %v8_v16  }
  0x78   :  { %v14_v18 = vpop.permute.xlu0 %13   ;;  %v26_v19 = vpop.permute.xlu1 %25  }
  0x79   :  { %16 = vst.msk [vmem:[#allocation0] sm:$0x1] %vm15_vm2, %v14_v18  }
  0x7a   :  { %22 = vst.msk [vmem:[#allocation0] sm:$0x1] %vm21_vm3, %v20_v17  }
  0x7b   :  { %28 = vst.msk [vmem:[#allocation0] sm:$0x1] %vm27_vm4, %v26_v19  }
  0x7c   :  { %v32_v20 = vpop.permute.xlu0 %31   ;;  %v38_v21 = vpop.permute.xlu1 %37  }
  0x7d   :  { %34 = vst.msk [vmem:[#allocation0] sm:$0x1] %vm33_vm5, %v32_v20  }
  0x7e   :  { %40 = vst.msk [vmem:[#allocation0] sm:$0x1] %vm39_vm6, %v38_v21  }
  0x80   :  { %v44_v22 = vpop.permute.xlu0 %43   ;;  %v50_v23 = vpop.permute.xlu1 %49  }
  0x81   :  { %46 = vst.msk [vmem:[#allocation0] sm:$0x1] %vm45_vm7, %v44_v22  }
  0x82   :  { %52 = vst.msk [vmem:[#allocation0] sm:$0x1] %vm51_vm8, %v50_v23  }
  0x84   :  { %v56_v24 = vpop.permute.xlu0 %55   ;;  %v62_v25 = vpop.permute.xlu1 %61  }
  0x85   :  { %58 = vst.msk [vmem:[#allocation0] sm:$0x1] %vm57_vm9, %v56_v24  }
  0x86   :  { %64 = vst.msk [vmem:[#allocation0] sm:$0x1] %vm63_vm10, %v62_v25  }
  0x88   :  { %v68_v26 = vpop.permute.xlu0 %67   ;;  %v74_v27 = vpop.permute.xlu1 %73  }
  0x89   :  { %70 = vst.msk [vmem:[#allocation0] sm:$0x1] %vm69_vm11, %v68_v26  }
  0x8a   :  { %76 = vst.msk [vmem:[#allocation0] sm:$0x1] %vm75_vm12, %v74_v27  }
  0x8c   :  { %v80_v28 = vpop.permute.xlu0 %79   ;;  %v86_v29 = vpop.permute.xlu1 %85  }
  0x8d   :  { %82 = vst.msk [vmem:[#allocation0] sm:$0x1] %vm81_vm13, %v80_v28  }
  0x8e   :  { %88 = vst.msk [vmem:[#allocation0] sm:$0x1] %vm87_vm14, %v86_v29  }
  0x90   :  { %v92_v30 = vpop.permute.xlu0 %91  }
  0x91   :  { %94 = vst.msk [vmem:[#allocation0] sm:$0x1] %vm93_vm15, %v92_v30  }
  0x98   :  { %v99_v31 = vld [vmem:[#allocation0] sm:$0x1] }
  0x99   :  { %102 = vst [vmem:[%s210_s1] sm:$0x1] %v99_v31 }

// kernel: tile.50
= control target key start
LH: loop header
LB: loop body
LE: loop exit
PB: predicated region body
PF: predicated region fallthrough
CT: control target
= control target key end

     0   :  { %s28_s0 = inlined_call_operand.vmem [shape: f32[4], index: 0, kind: input, shape index: {}]   ;;  %s29_s1 = inlined_call_operand.vmem [shape: f32[16,4], index: 1, kind: output, shape index: {}]  }
   0x1   :  { %v4_v0 = vld [vmem:[%s28_s0] ss:$0 sm:$0xff] }
   0x2   :  { %5 = vst [vmem:[%s29_s1] sm:$0xff] %v4_v0  ;;  %8 = vst [vmem:[%s29_s1 + $0x8] sm:$0xff] %v4_v0 }

// kernel: tile.54
= control target key start
LH: loop header
LB: loop body
LE: loop exit
PB: predicated region body
PF: predicated region fallthrough
CT: control target
= control target key end

     0   :  { %s133_s10 = smov 60   ;;  %s134_s11 = smov 52   ;;  %vm3_vm0 = vcmask 31744   ;;  %vm9_vm1 = vcmask 523744   ;;  %vm15_vm2 = vcmask 490944   ;;  %vm21_vm3 = vcmask 458144   ;;  %s209_s0 = inlined_call_operand.vmem [shape: f32[16,4], index: 0, kind: input, shape index: {}]   ;;  %s210_s1 = inlined_call_operand.vmem [shape: f32[1,64], index: 1, kind: output, shape index: {}]  }
   0x1   :  { %v103_v0 = vld [vmem:[%s209_s0 + $0xf] sm:$0x1]   ;;  %v105_v1 = vld [vmem:[%s209_s0 + $0xd] sm:$0x1]   ;;  %v104_v2 = vld [vmem:[%s209_s0 + $0xe] sm:$0x1]  }
   0x2   :  { %7 = vrot.lane.b32.xlu0 %v103_v0, %s133_s10  ;;  %19 = vrot.lane.b32.xlu1 %v105_v1, %s134_s11  ;;  %v106_v3 = vld [vmem:[%s209_s0 + $0xc] sm:$0x1]   ;;  %s135_s16 = smov 56   ;;  %s136_s17 = smov 48   ;;  %v107_v4 = vld [vmem:[%s209_s0 + $0xb] sm:$0x1]  }
   0x3   :  { %v108_v5 = vld [vmem:[%s209_s0 + $0xa] sm:$0x1]   ;;  %v2_v6 = vld [vmem:[%s209_s0] sm:$0x1]   ;;  %s137_s24 = smov 44   ;;  %s138_s25 = smov 40  }
   0x4   :  { %4 = vst.msk [vmem:[#allocation0] sm:$0x1] %vm3_vm0, %v2_v6   ;;  %v109_v7 = vld [vmem:[%s209_s0 + $0x9] sm:$0x1]   ;;  %v110_v8 = vld [vmem:[%s209_s0 + $0x8] sm:$0x1]  }
   0x5   :  { %s139_s30 = smov 36   ;;  %s140_s2 = smov 32   ;;  %v111_v9 = vld [vmem:[%s209_s0 + $0x7] sm:$0x1]   ;;  %v112_v10 = vld [vmem:[%s209_s0 + $0x6] sm:$0x1]  }
   0x6   :  { %13 = vrot.lane.b32.xlu0 %v104_v2, %s135_s16  ;;  %25 = vrot.lane.b32.xlu1 %v106_v3, %s136_s17  ;;  %s141_s7 = smov 28   ;;  %s142_s8 = smov 24   ;;  %v113_v11 = vld [vmem:[%s209_s0 + $0x5] sm:$0x1]   ;;  %v114_v12 = vld [vmem:[%s209_s0 + $0x4] sm:$0x1]  }
   0x7   :  { %s143_s13 = smov 20   ;;  %s144_s14 = smov 16   ;;  %v115_v13 = vld [vmem:[%s209_s0 + $0x3] sm:$0x1]   ;;  %v116_v14 = vld [vmem:[%s209_s0 + $0x2] sm:$0x1]  }
   0x8   :  { %s145_s19 = smov 12   ;;  %s146_s20 = smov 8   ;;  %v117_v15 = vld [vmem:[%s209_s0 + $0x1] sm:$0x1]   ;;  %vm27_vm4 = vcmask 425344   ;;  %vm33_vm5 = vcmask 392544  }
   0x9   :  { %s147_s0 = smov 4   ;;  %vm39_vm6 = vcmask 359744   ;;  %vm45_vm7 = vcmask 326944   ;;  %vm51_vm8 = vcmask 294144   ;;  %vm57_vm9 = vcmask 261344  }
   0xa   :  { %31 = vrot.lane.b32.xlu0 %v107_v4, %s137_s24  ;;  %37 = vrot.lane.b32.xlu1 %v108_v5, %s138_s25  ;;  %vm63_vm10 = vcmask 228544   ;;  %vm69_vm11 = vcmask 195744   ;;  %vm75_vm12 = vcmask 162944   ;;  %vm81_vm13 = vcmask 130144  }
   0xb   :  { %vm87_vm14 = vcmask 97344   ;;  %vm93_vm15 = vcmask 64544  }
   0xe   :  { %43 = vrot.lane.b32.xlu0 %v109_v7, %s139_s30  ;;  %49 = vrot.lane.b32.xlu1 %v110_v8, %s140_s2 }
  0x12   :  { %55 = vrot.lane.b32.xlu0 %v111_v9, %s141_s7  ;;  %61 = vrot.lane.b32.xlu1 %v112_v10, %s142_s8 }
  0x16   :  { %67 = vrot.lane.b32.xlu0 %v113_v11, %s143_s13  ;;  %73 = vrot.lane.b32.xlu1 %v114_v12, %s144_s14 }
  0x1a   :  { %79 = vrot.lane.b32.xlu0 %v115_v13, %s145_s19  ;;  %85 = vrot.lane.b32.xlu1 %v116_v14, %s146_s20 }
  0x1e   :  { %91 = vrot.lane.b32.xlu0 %v117_v15, %s147_s0 }
  0x74   :  { %v8_v16 = vpop.permute.xlu0 %7   ;;  %v20_v17 = vpop.permute.xlu1 %19  }
  0x75   :  { %10 = vst.msk [vmem:[#allocation0] sm:$0x1] %vm9_vm1, %v8_v16  }
  0x78   :  { %v14_v18 = vpop.permute.xlu0 %13   ;;  %v26_v19 = vpop.permute.xlu1 %25  }
  0x79   :  { %16 = vst.msk [vmem:[#allocation0] sm:$0x1] %vm15_vm2, %v14_v18  }
  0x7a   :  { %22 = vst.msk [vmem:[#allocation0] sm:$0x1] %vm21_vm3, %v20_v17  }
  0x7b   :  { %28 = vst.msk [vmem:[#allocation0] sm:$0x1] %vm27_vm4, %v26_v19  }
  0x7c   :  { %v32_v20 = vpop.permute.xlu0 %31   ;;  %v38_v21 = vpop.permute.xlu1 %37  }
  0x7d   :  { %34 = vst.msk [vmem:[#allocation0] sm:$0x1] %vm33_vm5, %v32_v20  }
  0x7e   :  { %40 = vst.msk [vmem:[#allocation0] sm:$0x1] %vm39_vm6, %v38_v21  }
  0x80   :  { %v44_v22 = vpop.permute.xlu0 %43   ;;  %v50_v23 = vpop.permute.xlu1 %49  }
  0x81   :  { %46 = vst.msk [vmem:[#allocation0] sm:$0x1] %vm45_vm7, %v44_v22  }
  0x82   :  { %52 = vst.msk [vmem:[#allocation0] sm:$0x1] %vm51_vm8, %v50_v23  }
  0x84   :  { %v56_v24 = vpop.permute.xlu0 %55   ;;  %v62_v25 = vpop.permute.xlu1 %61  }
  0x85   :  { %58 = vst.msk [vmem:[#allocation0] sm:$0x1] %vm57_vm9, %v56_v24  }
  0x86   :  { %64 = vst.msk [vmem:[#allocation0] sm:$0x1] %vm63_vm10, %v62_v25  }
  0x88   :  { %v68_v26 = vpop.permute.xlu0 %67   ;;  %v74_v27 = vpop.permute.xlu1 %73  }
  0x89   :  { %70 = vst.msk [vmem:[#allocation0] sm:$0x1] %vm69_vm11, %v68_v26  }
  0x8a   :  { %76 = vst.msk [vmem:[#allocation0] sm:$0x1] %vm75_vm12, %v74_v27  }
  0x8c   :  { %v80_v28 = vpop.permute.xlu0 %79   ;;  %v86_v29 = vpop.permute.xlu1 %85  }
  0x8d   :  { %82 = vst.msk [vmem:[#allocation0] sm:$0x1] %vm81_vm13, %v80_v28  }
  0x8e   :  { %88 = vst.msk [vmem:[#allocation0] sm:$0x1] %vm87_vm14, %v86_v29  }
  0x90   :  { %v92_v30 = vpop.permute.xlu0 %91  }
  0x91   :  { %94 = vst.msk [vmem:[#allocation0] sm:$0x1] %vm93_vm15, %v92_v30  }
  0x98   :  { %v99_v31 = vld [vmem:[#allocation0] sm:$0x1] }
  0x99   :  { %102 = vst [vmem:[%s210_s1] sm:$0x1] %v99_v31 }

// kernel: decoder_block_forward.1
= control target key start
LH: loop header
LB: loop body
LE: loop exit
PB: predicated region body
PF: predicated region fallthrough
CT: control target
= control target key end

     0   :  { %s3569_s17 = smov 0   ;;  %s4273_s0 = inlined_call_operand.vmem [shape: f32[32,64], index: 0, kind: input, shape index: {}]   ;;  %s4274_s1 = inlined_call_operand.vmem [shape: f32[32,16], index: 1, kind: input, shape index: {}]   ;;  %s4275_s2 = inlined_call_operand.vmem [shape: f32[64,128], index: 2, kind: input, shape index: {}]   ;;  %s4276_s3 = inlined_call_operand.vmem [shape: bf16[384,128], index: 3, kind: input, shape index: {}]   ;;  %s4277_s4 = inlined_call_operand.vmem [shape: bf16[384,128], index: 4, kind: input, shape index: {}]   ;;  %s4278_s5 = inlined_call_operand.vmem [shape: bf16[384,64], index: 5, kind: input, shape index: {}]   ;;  %s4279_s6 = inlined_call_operand.vmem [shape: bf16[192,64], index: 6, kind: input, shape index: {}]   ;;  %s4280_s7 = inlined_call_operand.vmem [shape: f32[2,128], index: 7, kind: input, shape index: {}]   ;;  %s4281_s8 = inlined_call_operand.vmem [shape: f32[2,128], index: 8, kind: input, shape index: {}]   ;;  %s4282_s9 = inlined_call_operand.vmem [shape: f32[2,64], index: 9, kind: input, shape index: {}]   ;;  %s4283_s10 = inlined_call_operand.vmem [shape: f32[2,64], index: 10, kind: input, shape index: {}]   ;;  %s4284_s11 = inlined_call_operand.vmem [shape: f32[32,128], index: 11, kind: output, shape index: {}]  }
   0x1 LB: > { %s2931_s18 = sadd.s32 4294967295, %s3504_s17   ;;  %p2935_p0 = scmp.ge.s32.totalorder %s3504_s17, 1  ;;  %s3504_s17 = sphi %s3569_s17, %s21_s17  }
   0x2   : > { %p338_p1 = scmp.lt.s32.totalorder %s3504_s17, 3 }
   0x4   : > { %p339_p2 = pnand %p2935_p0, %p338_p1 }
   0x5   : > { %s2936_s23 = sshll.u32 (!%p339_p2), %s2931_s18, 1  ;;  %s3508_s18 = smov (!%p339_p2), 64  }
   0x6   : > { %342 = sbr.rel (%p339_p2) target bundleno = 3071 (0xbff), region = 64  ;;  %p379_p3 = scmp.lt.s32.totalorder (!%p339_p2), %s2936_s23, 3 }
   0xb   : > { %v434_v0 = vld [vmem:[%s4275_s2 + $0x38] sm:$0xff]  ;;  %v433_v1 = vld [vmem:[%s4275_s2 + $0x30] sm:$0xff]  ;;  %v432_v2 = vld [vmem:[%s4275_s2 + $0x28] sm:$0xff]  ;;  %vm435_vm0 = vcmask 523264   ;;  %s4302_s23 = smov (!%p379_p3, %s2936_s23), 3  ;;  %vm521_vm1 = vcmask 130048  }
   0xc   : > { %3222 = vmatprep.subr.mxu1 %v434_v0  ;;  %v431_v3 = vld [vmem:[%s4275_s2 + $0x20] sm:$0xff]  ;;  %v430_v4 = vld [vmem:[%s4275_s2 + $0x18] sm:$0xff]  ;;  %s2937_s30 = sshll.u32 %s4302_s23, 3  ;;  %v429_v5 = vld [vmem:[%s4275_s2 + $0x10] sm:$0xff]  ;;  %vm400_vm2 = vcmask 1043459   ;;  %vm417_vm4 = vcmask 519171  }
   0xd   : > { %3223 = vmatpush3.msra.mxu1 %v434_v0  ;;  %s382_s14 = scalar_lea.vmem %s4273_s0, %s2937_s30  ;;  %v428_v7 = vld [vmem:[%s4275_s2 + $0x8] sm:$0xff]  ;;  %v427_v8 = vld [vmem:[%s4275_s2] sm:$0xff]  ;;  %vm401_vm3 = vsmask.f32 7950  ;;  %v403_v11 = vld [vmem:[#allocation2 + $0x14] sm:$0x8]  ;;  %s388_s26 = scalar_lea.vmem %s4284_s11, %s2937_s30 }
   0xe   : > { %3224 = vmatprep.subr.mxu1 %v433_v1  ;;  %v425_v6 = vld [vmem:[%s382_s14] sm:$0xff]  ;;  %v426_v9 = vld [vmem:[%s382_s14 + $0x8] sm:$0xff]  ;;  %vm3615_vm5 = vmand %vm400_vm2, %vm401_vm3  ;;  %vm391_vm7 = vcmask 1040384   ;;  %vm392_vm8 = vsmask.f32 256  ;;  %vm669_vm10 = vcmask 1043456  }
   0xf   : > { %3225 = vmatpush3.msra.mxu1 %v433_v1  ;;  %3238 = vmatprep.mubr.msk.f32.mxu1 %vm435_vm0, %v425_v6  ;;  %v517_v10 = vld [vmem:[%s4274_s1] sm:$0xff]  ;;  %v419_v13 = vld [vmem:[#allocation3 + $0xc] sm:$0x8]  ;;  %v422_v14 = vld [vmem:[#allocation3 + $0x1c] sm:$0x8]  ;;  %v404_v15 = vsel %vm3615_vm5, 0, %v403_v11 }
  0x10   : > { %3226 = vmatprep.subr.mxu1 %v432_v2  ;;  %3245 = vmatprep.mubr.msk.f32.mxu0 %vm521_vm1, %v517_v10  ;;  %vm418_vm6 = vmand %vm417_vm4, %vm401_vm3  ;;  %405 = vst [vmem:[#allocation2 + $0x14] sm:$0x8] %v404_v15  ;;  %v3322_v19 = vld [vmem:[%s4276_s3 + $0x78] sm:$0xff]   ;;  %v518_v21 = vld [vmem:[%s4274_s1 + $0x8] sm:$0xff]  ;;  %vm688_vm11 = vsmask.f32 3328 }
  0x11   : > { %3227 = vmatpush3.msra.mxu1 %v432_v2  ;;  %v420_v16 = vsel %vm418_vm6, 0, %v419_v13  ;;  %v423_v17 = vsel %vm418_vm6, 0, %v422_v14  ;;  %v3323_v22 = vld [vmem:[%s4276_s3 + $0x38] sm:$0xff]   ;;  %v519_v23 = vld [vmem:[%s4274_s1 + $0x10] sm:$0xff]  ;;  %v3326_v27 = vld [vmem:[%s4276_s3 + $0x68] sm:$0xff]  }
  0x12   : > { %3228 = vmatprep.subr.mxu1 %v431_v3  ;;  %421 = vst [vmem:[#allocation3 + $0xc] sm:$0x8] %v420_v16  ;;  %424 = vst [vmem:[#allocation3 + $0x1c] sm:$0x8] %v423_v17  ;;  %v3324_v24 = vld [vmem:[%s4276_s3 + $0x70] sm:$0xff]   ;;  %v520_v25 = vld [vmem:[%s4274_s1 + $0x18] sm:$0xff] }
  0x13   : > { %3229 = vmatpush3.msra.mxu1 %v431_v3  ;;  %v3325_v26 = vld [vmem:[%s4276_s3 + $0x30] sm:$0xff]   ;;  %v3327_v28 = vld [vmem:[%s4276_s3 + $0x28] sm:$0xff]   ;;  %v3328_v29 = vld [vmem:[%s4276_s3 + $0x60] sm:$0xff]   ;;  %vm631_vm12 = vsmask.f32 4368 }
  0x14   : > { %3230 = vmatprep.subr.mxu1 %v430_v4  ;;  %vm3655_vm9 = vmand %vm391_vm7, %vm392_vm8  ;;  %v394_v31 = vld [vmem:[#allocation2] sm:$0x1]  ;;  %v3330_v34 = vld [vmem:[%s4276_s3 + $0x58] sm:$0xff]   ;;  %vm670_vm13 = vsmask.f32 7938 }
  0x15   : > { %3231 = vmatpush3.msra.mxu1 %v430_v4  ;;  %v3329_v32 = vld [vmem:[%s4276_s3 + $0x20] sm:$0xff]   ;;  %v395_v33 = vsel %vm3655_vm9, 0, %v394_v31  ;;  %v3331_v35 = vld [vmem:[%s4276_s3 + $0x18] sm:$0xff]   ;;  %v3332_v36 = vld [vmem:[%s4276_s3 + $0x50] sm:$0xff]   ;;  %vm689_vm15 = vsmask.f32 7440 }
  0x16   : > { %3232 = vmatprep.subr.mxu1 %v429_v5  ;;  %396 = vst [vmem:[#allocation2] sm:$0x1] %v395_v33  ;;  %v3333_v37 = vld [vmem:[%s4276_s3 + $0x10] sm:$0xff]   ;;  %v397_v38 = vld [vmem:[#allocation2 + $0x18] sm:$0x1]  ;;  %v3334_v40 = vld [vmem:[%s4276_s3 + $0x48] sm:$0xff]  }
  0x17   : > { %3233 = vmatpush3.msra.mxu1 %v429_v5  ;;  %v398_v39 = vsel %vm3655_vm9, 0, %v397_v38  ;;  %v3335_v41 = vld [vmem:[%s4276_s3 + $0x8] sm:$0xff]   ;;  %v3336_v44 = vld [vmem:[%s4276_s3 + $0x40] sm:$0xff]   ;;  %v3695_v46 = vld [vmem:[%s4276_s3 + $0xb8] sm:$0xff]  }
  0x18   : > { %3234 = vmatprep.subr.mxu1 %v428_v7  ;;  %399 = vst [vmem:[#allocation2 + $0x18] sm:$0x1] %v398_v39  ;;  %v406_v42 = vld [vmem:[#allocation2 + $0x2c] sm:$0x8]  ;;  %v3337_v45 = vld [vmem:[%s4276_s3] sm:$0xff]   ;;  %vm3710_vm14 = vmand %vm669_vm10, %vm688_vm11 }
  0x19   : > { %3235 = vmatpush3.msra.mxu1 %v428_v7  ;;  %v407_v43 = vsel %vm3615_vm5, 0, %v406_v42  ;;  %v715_v63 = vld [vmem:[#allocation2 + $0x14] sm:$0xf]  ;;  %vm3726_vm2 = vmand %vm669_vm10, %vm670_vm13 }
  0x1a   : > { %3236 = vmatprep.subr.mxu1 %v427_v8  ;;  %408 = vst [vmem:[#allocation2 + $0x2c] sm:$0x8] %v407_v43  ;;  %vm3734_vm3 = vmor %vm688_vm11, %vm689_vm15  ;;  %v3342_v43 = vld [vmem:[%s4276_s3 + $0xb0] sm:$0xff]  }
  0x1b   : > { %3237 = vmatpush3.msra.mxu1 %v427_v8 }
  0x1c   : > { %3239 = vmatmul.mubr.msk.f32.vlgmr.msra.gmra.mxu1 %vm435_vm0, %v426_v9 }
  0x1d   : > { %v672_v4 = vld [vmem:[#allocation2] sm:$0xf] }
  0x1f   : > { %v676_v31 = vld [vmem:[#allocation2 + $0x18] sm:$0xf] }
  0xdc   : > { %v3240_v18 = vpop.f32.mrf.mxu1 }
  0xdd   : > { %3241 = vmatprep.subr.mxu0 %v3240_v18 }
  0xde   : > { %v508_v20 = vpop.f32.mrf.mxu1  ;;  %3242 = vmatpush3.msra.mxu0 %v3240_v18 }
  0xdf   : > { %3243 = vmatprep.subr.mxu0 %v508_v20 }
  0xe0   : > { %3244 = vmatpush3.msra.mxu0 %v508_v20 }
  0xe1   : > { %3246 = vmatmul.mubr.msk.f32.vlgmr.msra.gmra.mxu0 %vm521_vm1, %v518_v21  ;;  %3108 = vmatprep.subr.bf16.mxu0 %v3322_v19 }
  0xe2   : > { %3248 = vmatprep.mubr.msk.f32.mxu0 %vm521_vm1, %v519_v23  ;;  %3109 = vmatpush3.bf16.msra.mxu0 %v3323_v22 }
  0xe3   : > { %3110 = vmatprep.subr.bf16.mxu0 %v3324_v24 }
  0xe5   : > { %3249 = vmatmul.mubr.msk.f32.gmra.mxu0 %vm521_vm1, %v520_v25  ;;  %vm3720_vm1 = vmor %vm392_vm8, %vm631_vm12 }
  0xe6   : > { %3111 = vmatpush3.bf16.msra.mxu0 %v3325_v26  ;;  %v719_v26 = vld [vmem:[#allocation2 + $0x2c] sm:$0xf] }
  0xe7   : > { %3112 = vmatprep.subr.bf16.mxu0 %v3326_v27 }
  0xea   : > { %3113 = vmatpush3.bf16.msra.mxu0 %v3327_v28 }
  0xeb   : > { %3114 = vmatprep.subr.bf16.mxu0 %v3328_v29 }
  0xee   : > { %3115 = vmatpush3.bf16.msra.mxu0 %v3329_v32 }
  0xef   : > { %3116 = vmatprep.subr.bf16.mxu0 %v3330_v34 }
  0xf2   : > { %3117 = vmatpush3.bf16.msra.mxu0 %v3331_v35 }
  0xf3   : > { %3118 = vmatprep.subr.bf16.mxu0 %v3332_v36 }
  0xf6   : > { %3119 = vmatpush3.bf16.msra.mxu0 %v3333_v37 }
  0xf7   : > { %3120 = vmatprep.subr.bf16.mxu0 %v3334_v40 }
  0xfa   : > { %3121 = vmatpush3.bf16.msra.mxu0 %v3335_v41 }
  0xfb   : > { %3122 = vmatprep.subr.bf16.mxu0 %v3336_v44  ;;  %v3345_v44 = vld [vmem:[%s4276_s3 + $0xa8] sm:$0xff]  }
  0xfe   : > { %3123 = vmatpush3.bf16.msra.mxu0 %v3337_v45 }
  0xff   : > { %3251 = vmatprep.subr.bf16.mxu0 %v3695_v46 }
 0x1a1   : > { %v3698_v47 = vpop.f32.mrf.mxu0 }
 0x1a2   : > { %v3077_v48 = vpack.c.bf16 %v3698_v47, %v3698_v47 }
 0x1a3   : > { %v3702_v49 = vpop.f32.mrf.mxu0 }
 0x1a4   : > { %v642_v50 = vshrl.u32 %v3077_v48, 16  ;;  %v645_v51 = vshll.u32 %v3077_v48, 16  ;;  %685 = vst [vmem:[#allocation2 + $0x10] sm:$0xf] %v3077_v48  ;;  %v3076_v52 = vpack.c.bf16 %v3702_v49, %v3702_v49 }
 0x1a5   : > { %v3706_v53 = vpop.f32.mrf.mxu0 }
 0x1a6   : > { %v644_v54 = vrot.slane %v642_v50, 7  ;;  %v695_v55 = vrot.slane %v645_v51, 5  ;;  %v697_v56 = vrot.slane %v642_v50, 4  ;;  %v634_v57 = vshrl.u32 %v3076_v52, 16  ;;  %684 = vst [vmem:[#allocation2 + $0x4] sm:$0xf] %v3076_v52 }
 0x1a7   : > { %v637_v59 = vshll.u32 %v3076_v52, 16  ;;  %v3079_v60 = vpack.c.bf16 %v3706_v53, %v3706_v53  ;;  %v3716_v61 = vpop.f32.mrf.mxu0  ;;  %v3348_v50 = vld [vmem:[%s4276_s3 + $0xa0] sm:$0xff]   ;;  %v3350_v52 = vld [vmem:[%s4276_s3 + $0x90] sm:$0xff]  }
 0x1a8   : > { %v698_v62 = vor.u32 %v697_v56, %v695_v55  ;;  %v636_v1 = vrot.slane %v634_v57, 7  ;;  %v691_v2 = vrot.slane %v634_v57, 4  ;;  %v3078_v8 = vpack.c.bf16 %v3716_v61, %v3716_v61 }
 0x1a9   : > { %v692_v5 = vrot.slane %v637_v59, 5  ;;  %v658_v6 = vshrl.u32 %v3079_v60, 16  ;;  %v661_v7 = vshll.u32 %v3079_v60, 16  ;;  %687 = vst [vmem:[#allocation2 + $0x28] sm:$0xf] %v3079_v60  ;;  %v647_v9 = vor.u32 %v645_v51, %v644_v54  ;;  %v3351_v54 = vld [vmem:[%s4276_s3 + $0x88] sm:$0xff]  }
 0x1aa   : > { %v699_v10 = vrot.slane %v698_v62, 4  ;;  %v639_v11 = vor.u32 %v637_v59, %v636_v1  ;;  %v640_v12 = vrot.slane %v636_v1, 4  ;;  %686 = vst [vmem:[#allocation2 + $0x1c] sm:$0xf] %v3078_v8  ;;  %v650_v21 = vshrl.u32 %v3078_v8, 16 }
 0x1ab   : > { %v693_v13 = vor.u32 %v692_v5, %v691_v2  ;;  %v660_v14 = vrot.slane %v658_v6, 7  ;;  %v704_v15 = vrot.slane %v661_v7, 5  ;;  %v706_v16 = vrot.slane %v658_v6, 4 }
 0x1ac   : > { %v716_v18 = vsel %vm3710_vm14, %v699_v10, %v715_v63  ;;  %v648_v19 = vsel %vm3720_vm1, %v640_v12, %v647_v9  ;;  %v673_v20 = vsel %vm3726_vm2, %v639_v11, %v672_v4  ;;  %v653_v24 = vshll.u32 %v3078_v8, 16 }
 0x1ad   : > { %717 = vst [vmem:[#allocation2 + $0x14] sm:$0xf] %v716_v18  ;;  %674 = vst [vmem:[#allocation2] sm:$0xf] %v673_v20  ;;  %v694_v22 = vrot.slane %v693_v13, 4  ;;  %v707_v23 = vor.u32 %v706_v16, %v704_v15  ;;  %v663_v25 = vor.u32 %v661_v7, %v660_v14  ;;  %v652_v27 = vrot.slane %v650_v21, 7 }
 0x1ae   : > { %675 = vst [vmem:[#allocation2 + $0xc] sm:$0xf] %v648_v19  ;;  %v700_v28 = vrot.slane %v650_v21, 4  ;;  %v701_v32 = vrot.slane %v653_v24, 5  ;;  %v3338_v40 = vld [vmem:[#allocation2 + $0x4] ss:$12 sps:$4 sm:$0xff]  }
 0x1af   : > { %v696_v29 = vsel %vm3734_vm3, %v694_v22, %v695_v55  ;;  %v708_v30 = vrot.slane %v707_v23, 4  ;;  %v655_v33 = vor.u32 %v653_v24, %v652_v27  ;;  %v656_v34 = vrot.slane %v652_v27, 4  ;;  %986 = vmatprep.mubr.bf16.mxu0 %v3338_v40  ;;  %v3352_v55 = vld [vmem:[%s4276_s3 + $0x80] sm:$0xff]  }
 0x1b0   : > { %713 = vst [vmem:[#allocation2 + $0x8] sm:$0xf] %v696_v29  ;;  %v702_v36 = vor.u32 %v701_v32, %v700_v28 }
 0x1b1   : > { %v720_v35 = vsel %vm3710_vm14, %v708_v30, %v719_v26  ;;  %v664_v37 = vsel %vm3720_vm1, %v656_v34, %v663_v25  ;;  %v677_v38 = vsel %vm3726_vm2, %v655_v33, %v676_v31  ;;  %v3343_v45 = vld [vmem:[#allocation2 + $0x1c] ss:$12 sps:$4 sm:$0xff]  }
 0x1b2   : > { %721 = vst [vmem:[#allocation2 + $0x2c] sm:$0xf] %v720_v35  ;;  %678 = vst [vmem:[#allocation2 + $0x18] sm:$0xf] %v677_v38  ;;  %v703_v39 = vrot.slane %v702_v36, 4 }
 0x1b3   : > { %679 = vst [vmem:[#allocation2 + $0x24] sm:$0xf] %v664_v37 }
 0x1b4   : > { %v705_v41 = vsel %vm3734_vm3, %v703_v39, %v704_v15 }
 0x1b5   : > { %v3341_v42 = vld [vmem:[#allocation2] ss:$12 sps:$4 sm:$0xff]   ;;  %718 = vst [vmem:[#allocation2 + $0x20] sm:$0xf] %v705_v41 }
 0x1b6   : > { %987 = vmatmul.mubr.bf16.vlgmr.msra.gmra.mxu0 %v3341_v42 }
 0x1b7   : > { %3252 = vmatpush3.bf16.msra.mxu0 %v3695_v46  ;;  %994 = vmatprep.mubr.bf16.mxu0 %v3343_v45  ;;  %v3347_v51 = vld [vmem:[#allocation2 + $0x8] ss:$12 sps:$4 sm:$0xff]   ;;  %v3349_v46 = vld [vmem:[%s4276_s3 + $0x98] sm:$0xff]  }
 0x1b8   : > { %3253 = vmatprep.subr.bf16.mxu0 %v3342_v43 }
 0x1ba   : > { %v3346_v48 = vld [vmem:[#allocation2 + $0x18] ss:$12 sps:$4 sm:$0xff]  }
 0x1bb   : > { %3254 = vmatpush3.bf16.msra.mxu0 %v3342_v43 }
 0x1bc   : > { %3255 = vmatprep.subr.bf16.mxu0 %v3345_v44  ;;  %v3353_v56 = vld [vmem:[#allocation2 + $0x20] ss:$12 sps:$4 sm:$0xff]  }
 0x1be   : > { %995 = vmatmul.mubr.bf16.gmra.mxu0 %v3346_v48  ;;  %v3354_v48 = vld [vmem:[%s4277_s4 + $0x78] sm:$0xff]  }
 0x1bf   : > { %3256 = vmatpush3.bf16.msra.mxu0 %v3345_v44  ;;  %3267 = vmatprep.mubr.bf16.mxu0 %v3347_v51  ;;  %v3356_v51 = vld [vmem:[%s4277_s4 + $0x70] sm:$0xff]  }
 0x1c0   : > { %3257 = vmatprep.subr.bf16.mxu0 %v3348_v50  ;;  %3146 = vmatprep.subr.bf16.mxu1 %v3354_v48 }
 0x1c3   : > { %3258 = vmatpush3.bf16.msra.mxu0 %v3348_v50  ;;  %v3355_v50 = vld [vmem:[%s4277_s4 + $0x38] sm:$0xff]  }
 0x1c4   : > { %3259 = vmatprep.subr.bf16.mxu0 %v3349_v46  ;;  %3147 = vmatpush3.bf16.msra.mxu1 %v3355_v50 }
 0x1c5   : > { %3148 = vmatprep.subr.bf16.mxu1 %v3356_v51  ;;  %v2980_v51 = vld [vmem:[%s4280_s7 + $0x1] ss:$0 sm:$0xff] }
 0x1c7   : > { %3260 = vmatpush3.bf16.msra.mxu0 %v3349_v46  ;;  %v3357_v46 = vld [vmem:[%s4277_s4 + $0x30] sm:$0xff]  }
 0x1c8   : > { %3261 = vmatprep.subr.bf16.mxu0 %v3350_v52  ;;  %3149 = vmatpush3.bf16.msra.mxu1 %v3357_v46 }
 0x1cb   : > { %3262 = vmatpush3.bf16.msra.mxu0 %v3350_v52  ;;  %v3358_v52 = vld [vmem:[%s4277_s4 + $0xb8] sm:$0xff]  }
 0x1cc   : > { %3263 = vmatprep.subr.bf16.mxu0 %v3351_v54 }
 0x1cf   : > { %3264 = vmatpush3.bf16.msra.mxu0 %v3351_v54  ;;  %v3359_v54 = vld [vmem:[%s4277_s4 + $0x68] sm:$0xff]  }
 0x1d0   : > { %3265 = vmatprep.subr.bf16.mxu0 %v3352_v55  ;;  %3150 = vmatprep.subr.bf16.mxu1 %v3359_v54 }
 0x1d3   : > { %3266 = vmatpush3.bf16.msra.mxu0 %v3352_v55  ;;  %v3360_v55 = vld [vmem:[%s4277_s4 + $0x28] sm:$0xff]  }
 0x1d4   : > { %3271 = vmatprep.subr.bf16.mxu0 %v3358_v52  ;;  %3151 = vmatpush3.bf16.msra.mxu1 %v3360_v55 }
 0x1d6   : > { %3268 = vmatmul.mubr.bf16.vlgmr.msra.gmra.mxu0 %v3353_v56  ;;  %v3361_v56 = vld [vmem:[%s4277_s4 + $0xb0] sm:$0xff]  }
 0x1d7   : > { %3272 = vmatpush3.bf16.msra.mxu0 %v3358_v52 }
 0x1d8   : > { %3273 = vmatprep.subr.bf16.mxu0 %v3361_v56 }
 0x1db   : > { %3274 = vmatpush3.bf16.msra.mxu0 %v3361_v56 }
 0x276   : > { %v3124_v57 = vpop.f32.mrf.mxu0 }
 0x278   : > { %v3125_v59 = vpop.f32.mrf.mxu0 }
 0x279   : > { %v3126_v7 = vadd.f32 %v3125_v59, %v3124_v57  ;;  %v3362_v57 = vld [vmem:[%s4277_s4 + $0x60] sm:$0xff]  }
 0x27a   : > { %v3127_v60 = vpop.f32.mrf.mxu0  ;;  %v3363_v59 = vld [vmem:[%s4277_s4 + $0x20] sm:$0xff]   ;;  %3152 = vmatprep.subr.bf16.mxu1 %v3362_v57 }
 0x27b   : > { %3153 = vmatpush3.bf16.msra.mxu1 %v3363_v59 }
 0x27c   : > { %v3128_v62 = vpop.f32.mrf.mxu0 }
 0x27d   : > { %v3129_v13 = vadd.f32 %v3128_v62, %v3127_v60  ;;  %v3364_v60 = vld [vmem:[%s4277_s4 + $0xa8] sm:$0xff]   ;;  %v3365_v62 = vld [vmem:[%s4277_s4 + $0x58] sm:$0xff]  }
 0x27e   : > { %v3130_v63 = vpop.f32.mrf.mxu0  ;;  %3275 = vmatprep.subr.bf16.mxu0 %v3364_v60  ;;  %3154 = vmatprep.subr.bf16.mxu1 %v3365_v62 }
 0x27f   : > { %3276 = vmatpush3.bf16.msra.mxu0 %v3364_v60 }
 0x280   : > { %v3131_v1 = vpop.f32.mrf.mxu0 }
 0x281   : > { %v3132_v5 = vadd.f32 %v3131_v1, %v3130_v63  ;;  %v3366_v63 = vld [vmem:[%s4277_s4 + $0x18] sm:$0xff]   ;;  %v3367_v1 = vld [vmem:[%s4277_s4 + $0xa0] sm:$0xff]  }
 0x282   : > { %v3133_v2 = vpop.f32.mrf.mxu0  ;;  %3155 = vmatpush3.bf16.msra.mxu1 %v3366_v63  ;;  %3277 = vmatprep.subr.bf16.mxu0 %v3367_v1 }
 0x283   : > { %3278 = vmatpush3.bf16.msra.mxu0 %v3367_v1 }
 0x284   : > { %v3134_v4 = vpop.f32.mrf.mxu0 }
 0x285   : > { %v3135_v10 = vadd.f32 %v3134_v4, %v3133_v2  ;;  %v3368_v2 = vld [vmem:[%s4277_s4 + $0x50] sm:$0xff]  }
 0x286   : > { %v3369_v4 = vld [vmem:[%s4277_s4 + $0x10] sm:$0xff]   ;;  %3156 = vmatprep.subr.bf16.mxu1 %v3368_v2 }
 0x287   : > { %3157 = vmatpush3.bf16.msra.mxu1 %v3369_v4 }
 0x296   : > { %v3269_v6 = vpop.f32.mrf.mxu0 }
 0x297   : > { %v1046_v8 = vadd.f32 %v3269_v6, %v3132_v5  ;;  %v3370_v5 = vld [vmem:[%s4277_s4 + $0x98] sm:$0xff]   ;;  %v3371_v6 = vld [vmem:[%s4277_s4 + $0x48] sm:$0xff]  }
 0x298   : > { %v1037_v9 = vpop.f32.mrf.mxu0  ;;  %3279 = vmatprep.subr.bf16.mxu0 %v3370_v5  ;;  %3158 = vmatprep.subr.bf16.mxu1 %v3371_v6 }
 0x299   : > { %v1038_v11 = vadd.f32 %v3126_v7, %v1037_v9  ;;  %1056 = vadd.xlane.f32.xlu1 %v1046_v8  ;;  %3280 = vmatpush3.bf16.msra.mxu0 %v3370_v5  ;;  %v3372_v7 = vld [vmem:[%s4277_s4 + $0x8] sm:$0xff]   ;;  %v3374_v9 = vld [vmem:[%s4277_s4 + $0x40] sm:$0xff]  }
 0x29a   : > { %v3270_v12 = vpop.f32.mrf.mxu0  ;;  %3159 = vmatpush3.bf16.msra.mxu1 %v3372_v7 }
 0x29b   : > { %v1049_v14 = vadd.f32 %v3270_v12, %v3135_v10  ;;  %1052 = vadd.xlane.f32.xlu0 %v1038_v11  ;;  %v3375_v10 = vld [vmem:[%s4277_s4] sm:$0xff]   ;;  %3160 = vmatprep.subr.bf16.mxu1 %v3374_v9 }
 0x29c   : > { %v1040_v15 = vpop.f32.mrf.mxu0  ;;  %v3380_v12 = vld [vmem:[%s4277_s4 + $0x80] sm:$0xff]  }
 0x29d   : > { %v1041_v16 = vadd.f32 %v3129_v13, %v1040_v15  ;;  %1058 = vadd.xlane.f32.xlu1 %v1049_v14 }
 0x29e   : > { %3161 = vmatpush3.bf16.msra.mxu1 %v3375_v10 }
 0x29f   : > { %1054 = vadd.xlane.f32.xlu0 %v1041_v16 }
 0x322   : > { %v1057_v18 = vpop.xlane.xlu1 %1056 }
 0x324   : > { %v1053_v19 = vpop.xlane.xlu0 %1052 }
 0x326   : > { %v1059_v20 = vpop.xlane.xlu1 %1058 }
 0x327   : > { %v1067_v21 = vadd.f32 %v1059_v20, %v1057_v18 }
 0x328   : > { %v1055_v22 = vpop.xlane.xlu0 %1054 }
 0x329   : > { %v1068_v23 = vrot.slane %v1067_v21, 4  ;;  %v1060_v24 = vadd.f32 %v1055_v22, %v1053_v19 }
 0x32b   : > { %v1069_v25 = vadd.f32 %v1068_v23, %v1067_v21  ;;  %v1061_v26 = vrot.slane %v1060_v24, 4 }
 0x32d   : > { %v1070_v27 = vrot.slane %v1069_v25, 2  ;;  %v1062_v28 = vadd.f32 %v1061_v26, %v1060_v24 }
 0x32f   : > { %v1071_v29 = vadd.f32 %v1070_v27, %v1069_v25  ;;  %v1063_v30 = vrot.slane %v1062_v28, 2 }
 0x331   : > { %v1072_v31 = vrot.slane %v1071_v29, 1  ;;  %v1064_v32 = vadd.f32 %v1063_v30, %v1062_v28 }
 0x333   : > { %v1065_v33 = vrot.slane %v1064_v32, 1  ;;  %v1073_v34 = vadd.f32 %v1072_v31, %v1071_v29 }
 0x335   : > { %v1066_v35 = vadd.f32 %v1065_v33, %v1064_v32  ;;  %v1076_v37 = vmul.f32 0.00048828125, %v1073_v34 }
 0x337   : > { %v1075_v36 = vmul.f32 0.00048828125, %v1066_v35  ;;  %v3784_v42 = vsub.f32 %v1049_v14, %v1076_v37  ;;  %v3786_v43 = vsub.f32 %v1046_v8, %v1076_v37  ;;  %v3373_v8 = vld [vmem:[%s4277_s4 + $0x90] sm:$0xff]  }
 0x338   : > { %3281 = vmatprep.subr.bf16.mxu0 %v3373_v8 }
 0x339   : > { %v3776_v38 = vsub.f32 %v1038_v11, %v1075_v36  ;;  %v3778_v39 = vsub.f32 %v1041_v16, %v1075_v36  ;;  %v1084_v44 = vmul.f32 %v3784_v42, %v3784_v42  ;;  %v1083_v45 = vmul.f32 %v3786_v43, %v3786_v43  ;;  %3282 = vmatpush3.bf16.msra.mxu0 %v3373_v8  ;;  %v3376_v11 = vld [vmem:[%s4277_s4 + $0x88] sm:$0xff]  }
 0x33a   : > { %3283 = vmatprep.subr.bf16.mxu0 %v3376_v11  ;;  %v1116_v36 = vlaneseq }
 0x33b   : > { %v1081_v40 = vmul.f32 %v3776_v38, %v3776_v38  ;;  %v1082_v41 = vmul.f32 %v3778_v39, %v3778_v39 }
 0x33c   : > { %v1117_v37 = vshrl.u32 %v1116_v36, 7 }
 0x33d   : > { %1085 = vadd.xlane.f32.xlu0 %v1081_v40  ;;  %1087 = vadd.xlane.f32.xlu1 %v1082_v41  ;;  %v1113_v40 = vld [vmem:[%s4280_s7] sm:$0x1] }
 0x33e   : > { %3284 = vmatpush3.bf16.msra.mxu0 %v3376_v11  ;;  %v3867_v41 = vsub.s32 0, %v1117_v37 }
 0x33f   : > { %3285 = vmatprep.subr.bf16.mxu0 %v3380_v12 }
 0x341   : > { %1091 = vadd.xlane.f32.xlu1 %v1084_v44  ;;  %1089 = vadd.xlane.f32.xlu0 %v1083_v45 }
 0x342   : > { %3286 = vmatpush3.bf16.msra.mxu0 %v3380_v12 }
 0x3c6   : > { %v1086_v13 = vpop.xlane.xlu0 %1085  ;;  %v1088_v14 = vpop.xlane.xlu1 %1087 }
 0x3c7   : > { %v1093_v15 = vadd.f32 %v1088_v14, %v1086_v13 }
 0x3c9   : > { %v1094_v16 = vrot.slane %v1093_v15, 4 }
 0x3ca   : > { %v1090_v18 = vpop.xlane.xlu0 %1089  ;;  %v1092_v19 = vpop.xlane.xlu1 %1091 }
 0x3cb   : > { %v1095_v20 = vadd.f32 %v1094_v16, %v1093_v15  ;;  %v1100_v21 = vadd.f32 %v1092_v19, %v1090_v18 }
 0x3cd   : > { %v1096_v22 = vrot.slane %v1095_v20, 2  ;;  %v1101_v23 = vrot.slane %v1100_v21, 4 }
 0x3cf   : > { %v1097_v24 = vadd.f32 %v1096_v22, %v1095_v20  ;;  %v1102_v25 = vadd.f32 %v1101_v23, %v1100_v21 }
 0x3d1   : > { %v1098_v26 = vrot.slane %v1097_v24, 1  ;;  %v1103_v27 = vrot.slane %v1102_v25, 2 }
 0x3d3   : > { %v1099_v28 = vadd.f32 %v1098_v26, %v1097_v24  ;;  %v1104_v29 = vadd.f32 %v1103_v27, %v1102_v25 }
 0x3d5   : > { %v1107_v30 = vmul.f32 0.00048828125, %v1099_v28  ;;  %v1105_v31 = vrot.slane %v1104_v29, 1 }
 0x3d7   : > { %v1109_v32 = vadd.f32 1e-05, %v1107_v30  ;;  %v1106_v33 = vadd.f32 %v1105_v31, %v1104_v29 }
 0x3d9   : > { %3434 = vrsqrt.f32 %v1109_v32  ;;  %v1108_v34 = vmul.f32 0.00048828125, %v1106_v33 }
 0x3db   : > { %v1110_v35 = vadd.f32 1e-05, %v1108_v34 }
 0x3dd   : > { %3436 = vrsqrt.f32 %v1110_v35 }
 0x3e6   : > { %v3435_v44 = vpop.eup %3434 }
 0x3e7   : > { %v1114_v45 = vmul.f32 %v3435_v44, %v1113_v40 }
 0x3e9   : > { %v1119_v48 = vrot.slane %v1114_v45, %v3867_v41 }
 0x3ea   : > { %v3437_v50 = vpop.eup %3436 }
 0x3eb   : > { %v1124_v46 = vmul.f32 %v1119_v48, %v3776_v38  ;;  %v1125_v52 = vmul.f32 %v1119_v48, %v3778_v39  ;;  %v1115_v54 = vmul.f32 %v3437_v50, %v1113_v40 }
 0x3ed   : > { %v3875_v55 = vadd.f32 %v2980_v51, %v1124_v46  ;;  %v3877_v56 = vadd.f32 %v2980_v51, %v1125_v52  ;;  %v1123_v57 = vrot.slane %v1115_v54, %v3867_v41 }
 0x3ef   : > { %v3881_v59 = vmul.f32 0.70710677, %v3875_v55  ;;  %v3884_v60 = vmul.f32 0.70710677, %v3877_v56  ;;  %v1126_v62 = vmul.f32 %v1123_v57, %v3786_v43  ;;  %v1127_v63 = vmul.f32 %v1123_v57, %v3784_v42 }
 0x3f1   : > { %v1154_v38 = vand.u32 2147483647, %v3881_v59  ;;  %v1155_v39 = vand.u32 2147483647, %v3884_v60  ;;  %v3890_v1 = vadd.f32 %v2980_v51, %v1126_v62  ;;  %v3892_v2 = vadd.f32 %v2980_v51, %v1127_v63 }
 0x3f2   : > { %vm1146_vm4 = vcmp.ge.f32.partialorder %v3881_v59, 0.0  ;;  %vm1147_vm5 = vcmp.ge.f32.partialorder %v3884_v60, 0.0  ;;  %v1137_v60 = vmul.f32 0.5, %v3875_v55 }
 0x3f3   : > { %v1158_v4 = vmul.f32 0.3275911, %v1154_v38  ;;  %v1159_v5 = vmul.f32 0.3275911, %v1155_v39  ;;  %v3895_v6 = vmul.f32 0.70710677, %v3890_v1 }
 0x3f4   : > { %v3898_v7 = vmul.f32 0.70710677, %v3892_v2  ;;  %v1210_v14 = vsub.f32 0.0, %v1154_v38  ;;  %v1211_v15 = vsub.f32 0.0, %v1155_v39  ;;  %v1139_v55 = vmul.f32 0.5, %v3890_v1 }
 0x3f5   : > { %v1162_v8 = vadd.f32 1.0, %v1158_v4  ;;  %v1163_v43 = vadd.f32 1.0, %v1159_v5  ;;  %v1156_v42 = vand.u32 2147483647, %v3895_v6  ;;  %vm1148_vm6 = vcmp.ge.f32.partialorder %v3895_v6, 0.0 }
 0x3f6   : > { %v1157_v9 = vand.u32 2147483647, %v3898_v7  ;;  %v1214_v16 = vmul.f32 %v1210_v14, %v1154_v38  ;;  %v1215_v18 = vmul.f32 %v1211_v15, %v1155_v39  ;;  %vm1149_vm7 = vcmp.ge.f32.partialorder %v3898_v7, 0.0 }
 0x3f7   : > { %3438 = vrcp.f32 %v1162_v8  ;;  %v1160_v10 = vmul.f32 0.3275911, %v1156_v42  ;;  %v1212_v19 = vsub.f32 0.0, %v1156_v42 }
 0x3f8   : > { %3440 = vrcp.f32 %v1163_v43  ;;  %v1161_v11 = vmul.f32 0.3275911, %v1157_v9  ;;  %v1213_v20 = vsub.f32 0.0, %v1157_v9  ;;  %v1218_v24 = vmul.f32 1.442695, %v1214_v16 }
 0x3f9   : > { %v1164_v12 = vadd.f32 1.0, %v1160_v10  ;;  %v1220_v26 = vmul.f32 1.442695, %v1215_v18  ;;  %v1216_v27 = vmul.f32 %v1212_v19, %v1156_v42 }
 0x3fa   : > { %v1165_v13 = vadd.f32 1.0, %v1161_v11  ;;  %v1217_v29 = vmul.f32 %v1213_v20, %v1157_v9 }
 0x3fb   : > { %3442 = vrcp.f32 %v1164_v12  ;;  %v1222_v36 = vmul.f32 1.442695, %v1216_v27 }
 0x3fc   : > { %3444 = vrcp.f32 %v1165_v13  ;;  %v1224_v44 = vmul.f32 1.442695, %v1217_v29 }
 0x3fd   : > { %3446 = vpow2.f32 %v1218_v24 }
 0x3fe   : > { %3448 = vpow2.f32 %v1220_v26 }
 0x3ff   : > { %3450 = vpow2.f32 %v1222_v36 }
 0x400   : > { %3452 = vpow2.f32 %v1224_v44 }
 0x404   : > { %v3439_v21 = vpop.eup %3438 }
 0x405   : > { %v3441_v22 = vpop.eup %3440  ;;  %v1174_v23 = vmul.f32 1.0614054, %v3439_v21 }
 0x406   : > { %v1175_v25 = vmul.f32 1.0614054, %v3441_v22 }
 0x407   : > { %v1178_v28 = vadd.f32 -1.4531521, %v1174_v23 }
 0x408   : > { %v1179_v30 = vadd.f32 -1.4531521, %v1175_v25  ;;  %v3443_v31 = vpop.eup %3442  ;;  %v3506_v25 = vmov -1.0  }
 0x409   : > { %v1182_v32 = vmul.f32 %v3439_v21, %v1178_v28  ;;  %v3445_v33 = vpop.eup %3444  ;;  %v1176_v35 = vmul.f32 1.0614054, %v3443_v31  ;;  %v1150_v26 = vsel %vm1146_vm4, 1.0, %v3506_v25 }
 0x40a   : > { %v1183_v34 = vmul.f32 %v3441_v22, %v1179_v30  ;;  %v1177_v40 = vmul.f32 1.0614054, %v3445_v33  ;;  %v3447_v12 = vpop.eup %3446 }
 0x40b   : > { %v1186_v37 = vadd.f32 1.4214138, %v1182_v32  ;;  %v1180_v48 = vadd.f32 -1.4531521, %v1176_v35  ;;  %v3449_v15 = vpop.eup %3448 }
 0x40c   : > { %v1187_v45 = vadd.f32 1.4214138, %v1183_v34  ;;  %v1181_v51 = vadd.f32 -1.4531521, %v1177_v40  ;;  %v3451_v28 = vpop.eup %3450 }
 0x40d   : > { %v1190_v50 = vmul.f32 %v3439_v21, %v1186_v37  ;;  %v1184_v52 = vmul.f32 %v3443_v31, %v1180_v48  ;;  %v3453_v32 = vpop.eup %3452  ;;  %v1138_v37 = vmul.f32 0.5, %v3877_v56  ;;  %v1140_v56 = vmul.f32 0.5, %v3892_v2 }
 0x40e   : > { %v1191_v46 = vmul.f32 %v3441_v22, %v1187_v45  ;;  %v1185_v57 = vmul.f32 %v3445_v33, %v1181_v51  ;;  %v1152_v45 = vsel %vm1148_vm6, 1.0, %v3506_v25 }
 0x40f   : > { %v1194_v54 = vadd.f32 -0.28449672, %v1190_v50  ;;  %v1188_v63 = vadd.f32 1.4214138, %v1184_v52  ;;  %v1153_v50 = vsel %vm1149_vm7, 1.0, %v3506_v25  ;;  %vm2539_vm7 = vcmask 519168  }
 0x410   : > { %v1195_v62 = vadd.f32 -0.28449672, %v1191_v46  ;;  %v1189_v39 = vadd.f32 1.4214138, %v1185_v57 }
 0x411   : > { %v1198_v38 = vmul.f32 %v3439_v21, %v1194_v54  ;;  %v1192_v5 = vmul.f32 %v3443_v31, %v1188_v63 }
 0x412   : > { %v1199_v4 = vmul.f32 %v3441_v22, %v1195_v62  ;;  %v1193_v43 = vmul.f32 %v3445_v33, %v1189_v39 }
 0x413   : > { %v1202_v8 = vadd.f32 0.2548296, %v1198_v38  ;;  %v1196_v9 = vadd.f32 -0.28449672, %v1192_v5 }
 0x414   : > { %v1203_v42 = vadd.f32 0.2548296, %v1199_v4  ;;  %v1197_v11 = vadd.f32 -0.28449672, %v1193_v43 }
 0x415   : > { %v1206_v10 = vmul.f32 %v3439_v21, %v1202_v8  ;;  %v1200_v14 = vmul.f32 %v3443_v31, %v1196_v9 }
 0x416   : > { %v1207_v13 = vmul.f32 %v3441_v22, %v1203_v42  ;;  %v1201_v18 = vmul.f32 %v3445_v33, %v1197_v11  ;;  %v1151_v22 = vsel %vm1147_vm5, 1.0, %v3506_v25 }
 0x417   : > { %v1226_v16 = vmul.f32 %v3447_v12, %v1206_v10  ;;  %v1204_v20 = vadd.f32 0.2548296, %v1200_v14 }
 0x418   : > { %v1227_v19 = vmul.f32 %v3449_v15, %v1207_v13  ;;  %v1205_v24 = vadd.f32 0.2548296, %v1201_v18  ;;  %v1294_v15 = vld [vmem:[#allocation2] sm:$0xf] }
 0x419   : > { %v1230_v23 = vsub.f32 1.0, %v1226_v16  ;;  %v1208_v21 = vmul.f32 %v3443_v31, %v1204_v20 }
 0x41a   : > { %v1231_v27 = vsub.f32 1.0, %v1227_v19  ;;  %v1209_v30 = vmul.f32 %v3445_v33, %v1205_v24 }
 0x41b   : > { %v1234_v29 = vmul.f32 %v1230_v23, %v1150_v26  ;;  %v1228_v34 = vmul.f32 %v3451_v28, %v1208_v21 }
 0x41c   : > { %v1235_v59 = vmul.f32 %v1231_v27, %v1151_v22  ;;  %v1229_v36 = vmul.f32 %v3453_v32, %v1209_v30 }
 0x41d   : > { %v1238_v35 = vadd.f32 1.0, %v1234_v29  ;;  %v1232_v31 = vsub.f32 1.0, %v1228_v34 }
 0x41e   : > { %v1239_v40 = vadd.f32 1.0, %v1235_v59  ;;  %v1233_v48 = vsub.f32 1.0, %v1229_v36 }
 0x41f   : > { %v1242_v44 = vmul.f32 %v1238_v35, %v1137_v60  ;;  %v1236_v51 = vmul.f32 %v1232_v31, %v1152_v45 }
 0x420   : > { %v1243_v33 = vmul.f32 %v1239_v40, %v1138_v37  ;;  %v1237_v46 = vmul.f32 %v1233_v48, %v1153_v50  ;;  %v1333_v37 = vld [vmem:[#allocation2 + $0x14] sm:$0xf]  ;;  %v1298_v40 = vld [vmem:[#allocation2 + $0x18] sm:$0xf] }
 0x421   : > { %v3080_v6 = vpack.c.bf16 %v1242_v44, %v1242_v44  ;;  %v1240_v54 = vadd.f32 1.0, %v1236_v51 }
 0x422   : > { %v3081_v52 = vpack.c.bf16 %v1243_v33, %v1243_v33  ;;  %v1241_v62 = vadd.f32 1.0, %v1237_v46 }
 0x423   : > { %v1259_v7 = vshrl.u32 %v3080_v6, 16  ;;  %v1262_v57 = vshll.u32 %v3080_v6, 16  ;;  %1306 = vst [vmem:[#allocation2 + $0x4] sm:$0xf] %v3080_v6  ;;  %v1244_v39 = vmul.f32 %v1240_v54, %v1139_v55  ;;  %v1337_v6 = vld [vmem:[#allocation2 + $0x2c] sm:$0xf] }
 0x424   : > { %v1267_v63 = vshrl.u32 %v3081_v52, 16  ;;  %v1270_v38 = vshll.u32 %v3081_v52, 16  ;;  %1307 = vst [vmem:[#allocation2 + $0x10] sm:$0xf] %v3081_v52  ;;  %v1245_v43 = vmul.f32 %v1241_v62, %v1140_v56 }
 0x425   : > { %v1261_v4 = vrot.slane %v1259_v7, 7  ;;  %v1310_v5 = vrot.slane %v1259_v7, 4  ;;  %v1311_v8 = vrot.slane %v1262_v57, 5  ;;  %v3082_v11 = vpack.c.bf16 %v1244_v39, %v1244_v39 }
 0x426   : > { %v1269_v42 = vrot.slane %v1267_v63, 7  ;;  %v1314_v9 = vrot.slane %v1270_v38, 5  ;;  %v1316_v10 = vrot.slane %v1267_v63, 4  ;;  %v3083_v14 = vpack.c.bf16 %v1245_v43, %v1245_v43 }
 0x427   : > { %v1264_v1 = vor.u32 %v1262_v57, %v1261_v4  ;;  %v1265_v12 = vrot.slane %v1261_v4, 4  ;;  %v1312_v13 = vor.u32 %v1311_v8, %v1310_v5  ;;  %v1275_v18 = vshrl.u32 %v3082_v11, 16  ;;  %1308 = vst [vmem:[#allocation2 + $0x1c] sm:$0xf] %v3082_v11 }
 0x428   : > { %v1272_v16 = vor.u32 %v1270_v38, %v1269_v42  ;;  %v1317_v2 = vor.u32 %v1316_v10, %v1314_v9  ;;  %v1278_v19 = vshll.u32 %v3082_v11, 16  ;;  %v1283_v24 = vshrl.u32 %v3083_v14, 16  ;;  %1309 = vst [vmem:[#allocation2 + $0x28] sm:$0xf] %v3083_v14 }
 0x429   : > { %v1295_v20 = vsel %vm3726_vm2, %v1264_v1, %v1294_v15  ;;  %v1313_v23 = vrot.slane %v1312_v13, 4  ;;  %v1286_v26 = vshll.u32 %v3083_v14, 16  ;;  %v1277_v21 = vrot.slane %v1275_v18, 7 }
 0x42a   : > { %v1318_v27 = vrot.slane %v1317_v2, 4  ;;  %1296 = vst [vmem:[#allocation2] sm:$0xf] %v1295_v20  ;;  %v1319_v28 = vrot.slane %v1275_v18, 4  ;;  %v1320_v22 = vrot.slane %v1278_v19, 5  ;;  %v1285_v29 = vrot.slane %v1283_v24, 7 }
 0x42b   : > { %v1323_v30 = vrot.slane %v1286_v26, 5  ;;  %v1325_v32 = vrot.slane %v1283_v24, 4  ;;  %v1273_v59 = vsel %vm3720_vm1, %v1265_v12, %v1272_v16  ;;  %v1280_v34 = vor.u32 %v1278_v19, %v1277_v21  ;;  %v3377_v55 = vld [vmem:[#allocation2 + $0x4] ss:$12 sps:$4 sm:$0xff]  }
 0x42c   : > { %v1281_v60 = vrot.slane %v1277_v21, 4  ;;  %v1321_v35 = vor.u32 %v1320_v22, %v1319_v28  ;;  %1297 = vst [vmem:[#allocation2 + $0xc] sm:$0xf] %v1273_v59  ;;  %v1315_v36 = vsel %vm3734_vm3, %v1313_v23, %v1314_v9  ;;  %v1288_v31 = vor.u32 %v1286_v26, %v1285_v29  ;;  %1604 = vmatprep.mubr.bf16.mxu1 %v3377_v55 }
 0x42d   : > { %v1326_v44 = vor.u32 %v1325_v32, %v1323_v30  ;;  %1332 = vst [vmem:[#allocation2 + $0x8] sm:$0xf] %v1315_v36  ;;  %v1334_v45 = vsel %vm3710_vm14, %v1318_v27, %v1333_v37  ;;  %v1299_v48 = vsel %vm3726_vm2, %v1280_v34, %v1298_v40 }
 0x42e   : > { %v1322_v33 = vrot.slane %v1321_v35, 4  ;;  %1335 = vst [vmem:[#allocation2 + $0x14] sm:$0xf] %v1334_v45  ;;  %1300 = vst [vmem:[#allocation2 + $0x18] sm:$0xf] %v1299_v48  ;;  %v1289_v51 = vsel %vm3720_vm1, %v1281_v60, %v1288_v31 }
 0x42f   : > { %v1327_v50 = vrot.slane %v1326_v44, 4  ;;  %1301 = vst [vmem:[#allocation2 + $0x24] sm:$0xf] %v1289_v51  ;;  %v3382_v57 = vld [vmem:[#allocation2 + $0x1c] ss:$12 sps:$4 sm:$0xff]  }
 0x430   : > { %v1324_v46 = vsel %vm3734_vm3, %v1322_v33, %v1323_v30 }
 0x431   : > { %v1338_v52 = vsel %vm3710_vm14, %v1327_v50, %v1337_v6  ;;  %1336 = vst [vmem:[#allocation2 + $0x20] sm:$0xf] %v1324_v46 }
 0x432   : > { %1339 = vst [vmem:[#allocation2 + $0x2c] sm:$0xf] %v1338_v52 }
 0x433   : > { %v3379_v54 = vld [vmem:[#allocation2] ss:$12 sps:$4 sm:$0xff]  }
 0x434   : > { %1605 = vmatmul.mubr.bf16.vlgmr.msra.gmra.mxu1 %v3379_v54 }
 0x435   : > { %v3381_v7 = vld [vmem:[#allocation2 + $0x8] ss:$12 sps:$4 sm:$0xff]   ;;  %v1344_v56 = vld [vmem:[#allocation2 + $0x18] sm:$0xff]  ;;  %1612 = vmatprep.mubr.bf16.mxu1 %v3382_v57 }
 0x436   : > { %3287 = vmatprep.mubr.bf16.mxu0 %v3381_v7  ;;  %v1346_v62 = vld [vmem:[#allocation2 + $0x24] sm:$0xff]  ;;  %v3385_v7 = vld [vmem:[%s4278_s5 + $0x78] sm:$0xff]  }
 0x437   : > { %v2988_v38 = vcombine.low %v1344_v56, %v1346_v62  ;;  %v3386_v57 = vld [vmem:[%s4278_s5 + $0x38] sm:$0xff]   ;;  %3184 = vmatprep.subr.bf16.mxu1 %v3385_v7  ;;  %v3387_v56 = vld [vmem:[%s4278_s5 + $0x70] sm:$0xff]   ;;  %v3015_v7 = vld [vmem:[%s4281_s8 + $0x1] ss:$0 sm:$0xff] }
 0x438   : > { %3185 = vmatpush3.bf16.msra.mxu1 %v3386_v57  ;;  %v3388_v62 = vld [vmem:[%s4278_s5 + $0x30] sm:$0xff]  }
 0x439   : > { %v3384_v63 = vld [vmem:[#allocation2 + $0x20] ss:$12 sps:$4 sm:$0xff]   ;;  %3186 = vmatprep.subr.bf16.mxu1 %v3387_v56 }
 0x43a   : > { %3288 = vmatmul.mubr.bf16.vlgmr.msra.gmra.mxu0 %v3384_v63  ;;  %v3389_v63 = vld [vmem:[%s4278_s5 + $0xb8] sm:$0xff]  }
 0x43b   : > { %3291 = vmatprep.subr.bf16.mxu0 %v3389_v63 }
 0x43c   : > { %1613 = vmatmul.mubr.bf16.gmra.mxu1 %v2988_v38  ;;  %v3390_v38 = vld [vmem:[%s4278_s5 + $0x68] sm:$0xff]   ;;  %3292 = vmatpush3.bf16.msra.mxu0 %v3389_v63 }
 0x43d   : > { %3187 = vmatpush3.bf16.msra.mxu1 %v3388_v62 }
 0x43e   : > { %3188 = vmatprep.subr.bf16.mxu1 %v3390_v38 }
 0x4f4   : > { %v3162_v39 = vpop.f32.mrf.mxu1 }
 0x4f6   : > { %v3163_v4 = vpop.f32.mrf.mxu1 }
 0x4f7   : > { %v3164_v43 = vadd.f32 %v3163_v4, %v3162_v39  ;;  %v3391_v39 = vld [vmem:[%s4278_s5 + $0x28] sm:$0xff]   ;;  %v3392_v4 = vld [vmem:[%s4278_s5 + $0xb0] sm:$0xff]  }
 0x4f8   : > { %v3165_v5 = vpop.f32.mrf.mxu1  ;;  %3189 = vmatpush3.bf16.msra.mxu1 %v3391_v39  ;;  %3293 = vmatprep.subr.bf16.mxu0 %v3392_v4 }
 0x4f9   : > { %3294 = vmatpush3.bf16.msra.mxu0 %v3392_v4 }
 0x4fa   : > { %v3289_v8 = vpop.f32.mrf.mxu0  ;;  %v3166_v42 = vpop.f32.mrf.mxu1 }
 0x4fb   : > { %v3167_v12 = vadd.f32 %v3166_v42, %v3165_v5  ;;  %v3393_v5 = vld [vmem:[%s4278_s5 + $0x60] sm:$0xff]   ;;  %v3396_v42 = vld [vmem:[%s4278_s5 + $0x58] sm:$0xff]  }
 0x4fc   : > { %v1655_v9 = vpop.f32.mrf.mxu0  ;;  %v3168_v11 = vpop.f32.mrf.mxu1  ;;  %3190 = vmatprep.subr.bf16.mxu1 %v3393_v5 }
 0x4fd   : > { %v1656_v10 = vadd.f32 %v3164_v43, %v1655_v9  ;;  %v3395_v43 = vld [vmem:[%s4278_s5 + $0xa8] sm:$0xff]   ;;  %v3397_v9 = vld [vmem:[%s4278_s5 + $0x18] sm:$0xff]  }
 0x4fe   : > { %v3290_v1 = vpop.f32.mrf.mxu0  ;;  %v3169_v13 = vpop.f32.mrf.mxu1  ;;  %3295 = vmatprep.subr.bf16.mxu0 %v3395_v43 }
 0x4ff   : > { %1670 = vadd.xlane.f32.xlu0 %v1656_v10  ;;  %v3170_v14 = vadd.f32 %v3169_v13, %v3168_v11  ;;  %3296 = vmatpush3.bf16.msra.mxu0 %v3395_v43  ;;  %v3399_v11 = vld [vmem:[%s4278_s5 + $0x50] sm:$0xff]   ;;  %v3402_v13 = vld [vmem:[%s4278_s5 + $0x48] sm:$0xff]  }
 0x500   : > { %v1658_v15 = vpop.f32.mrf.mxu0  ;;  %v3171_v2 = vpop.f32.mrf.mxu1 }
 0x501   : > { %v1659_v16 = vadd.f32 %v3167_v12, %v1658_v15  ;;  %v1664_v18 = vadd.f32 %v3289_v8, %v3170_v14  ;;  %v3394_v8 = vld [vmem:[%s4278_s5 + $0x20] sm:$0xff]   ;;  %v3401_v12 = vld [vmem:[%s4278_s5 + $0x98] sm:$0xff]   ;;  %v3403_v14 = vld [vmem:[%s4278_s5 + $0x8] sm:$0xff]  }
 0x502   : > { %v3172_v19 = vpop.f32.mrf.mxu1  ;;  %3191 = vmatpush3.bf16.msra.mxu1 %v3394_v8  ;;  %v3404_v15 = vld [vmem:[%s4278_s5 + $0x90] sm:$0xff]  }
 0x503   : > { %1672 = vadd.xlane.f32.xlu1 %v1659_v16  ;;  %v3173_v20 = vadd.f32 %v3172_v19, %v3171_v2  ;;  %1674 = vadd.xlane.f32.xlu0 %v1664_v18  ;;  %v3406_v2 = vld [vmem:[%s4278_s5] sm:$0xff]  }
 0x504   : > { %3192 = vmatprep.subr.bf16.mxu1 %v3396_v42  ;;  %v3412_v19 = vld [vmem:[%s4278_s5 + $0x80] sm:$0xff]  }
 0x505   : > { %v1667_v23 = vadd.f32 %v3290_v1, %v3173_v20  ;;  %v3400_v1 = vld [vmem:[%s4278_s5 + $0x10] sm:$0xff]  }
 0x506   : > { %3193 = vmatpush3.bf16.msra.mxu1 %v3397_v9 }
 0x507   : > { %1676 = vadd.xlane.f32.xlu1 %v1667_v23  ;;  %3194 = vmatprep.subr.bf16.mxu1 %v3399_v11 }
 0x50a   : > { %3195 = vmatpush3.bf16.msra.mxu1 %v3400_v1 }
 0x50b   : > { %3196 = vmatprep.subr.bf16.mxu1 %v3402_v13 }
 0x50e   : > { %3197 = vmatpush3.bf16.msra.mxu1 %v3403_v14 }
 0x588   : > { %v1671_v24 = vpop.xlane.xlu0 %1670 }
 0x58c   : > { %v1673_v26 = vpop.xlane.xlu1 %1672  ;;  %v1675_v22 = vpop.xlane.xlu0 %1674 }
 0x58d   : > { %v1678_v27 = vadd.f32 %v1673_v26, %v1671_v24 }
 0x58f   : > { %v1679_v21 = vrot.slane %v1678_v27, 4 }
 0x590   : > { %v1677_v29 = vpop.xlane.xlu1 %1676 }
 0x591   : > { %v1680_v28 = vadd.f32 %v1679_v21, %v1678_v27  ;;  %v1685_v30 = vadd.f32 %v1677_v29, %v1675_v22 }
 0x593   : > { %v1681_v32 = vrot.slane %v1680_v28, 2  ;;  %v1686_v59 = vrot.slane %v1685_v30, 4 }
 0x595   : > { %v1682_v34 = vadd.f32 %v1681_v32, %v1680_v28  ;;  %v1687_v60 = vadd.f32 %v1686_v59, %v1685_v30 }
 0x597   : > { %v1683_v35 = vrot.slane %v1682_v34, 1  ;;  %v1688_v36 = vrot.slane %v1687_v60, 2 }
 0x599   : > { %v1684_v37 = vadd.f32 %v1683_v35, %v1682_v34  ;;  %v1689_v40 = vadd.f32 %v1688_v36, %v1687_v60 }
 0x59b   : > { %v1692_v31 = vmul.f32 0.00048828125, %v1684_v37  ;;  %v1690_v44 = vrot.slane %v1689_v40, 1 }
 0x59d   : > { %v3930_v45 = vsub.f32 %v1659_v16, %v1692_v31  ;;  %v3932_v48 = vsub.f32 %v1656_v10, %v1692_v31  ;;  %v1691_v33 = vadd.f32 %v1690_v44, %v1689_v40  ;;  %v3398_v10 = vld [vmem:[%s4278_s5 + $0xa0] sm:$0xff]  }
 0x59e   : > { %3297 = vmatprep.subr.bf16.mxu0 %v3398_v10  ;;  %v3405_v16 = vld [vmem:[%s4278_s5 + $0x40] sm:$0xff]  }
 0x59f   : > { %v1699_v50 = vmul.f32 %v3930_v45, %v3930_v45  ;;  %v1698_v51 = vmul.f32 %v3932_v48, %v3932_v48  ;;  %v1693_v6 = vmul.f32 0.00048828125, %v1691_v33  ;;  %3298 = vmatpush3.bf16.msra.mxu0 %v3398_v10  ;;  %3198 = vmatprep.subr.bf16.mxu1 %v3405_v16 }
 0x5a0   : > { %3299 = vmatprep.subr.bf16.mxu0 %v3401_v12  ;;  %3199 = vmatpush3.bf16.msra.mxu1 %v3406_v2 }
 0x5a1   : > { %1704 = vadd.xlane.f32.xlu1 %v1699_v50  ;;  %1702 = vadd.xlane.f32.xlu0 %v1698_v51  ;;  %v3938_v46 = vsub.f32 %v1667_v23, %v1693_v6  ;;  %v3940_v52 = vsub.f32 %v1664_v18, %v1693_v6  ;;  %v3407_v18 = vld [vmem:[%s4278_s5 + $0x88] sm:$0xff]   ;;  %v1730_v51 = vld [vmem:[%s4281_s8] sm:$0x1] }
 0x5a3   : > { %v1701_v55 = vmul.f32 %v3938_v46, %v3938_v46  ;;  %v1700_v54 = vmul.f32 %v3940_v52, %v3940_v52  ;;  %3300 = vmatpush3.bf16.msra.mxu0 %v3401_v12 }
 0x5a4   : > { %3301 = vmatprep.subr.bf16.mxu0 %v3404_v15 }
 0x5a5   : > { %1708 = vadd.xlane.f32.xlu1 %v1701_v55  ;;  %1706 = vadd.xlane.f32.xlu0 %v1700_v54 }
 0x5a7   : > { %3302 = vmatpush3.bf16.msra.mxu0 %v3404_v15 }
 0x5a8   : > { %3303 = vmatprep.subr.bf16.mxu0 %v3407_v18 }
 0x5ab   : > { %3304 = vmatpush3.bf16.msra.mxu0 %v3407_v18 }
 0x5ac   : > { %3305 = vmatprep.subr.bf16.mxu0 %v3412_v19 }
 0x5af   : > { %3306 = vmatpush3.bf16.msra.mxu0 %v3412_v19 }
 0x62a   : > { %v1705_v20 = vpop.xlane.xlu1 %1704  ;;  %v1703_v23 = vpop.xlane.xlu0 %1702 }
 0x62b   : > { %v1710_v24 = vadd.f32 %v1705_v20, %v1703_v23 }
 0x62d   : > { %v1711_v26 = vrot.slane %v1710_v24, 4 }
 0x62e   : > { %v1709_v21 = vpop.xlane.xlu1 %1708  ;;  %v1707_v28 = vpop.xlane.xlu0 %1706 }
 0x62f   : > { %v1712_v27 = vadd.f32 %v1711_v26, %v1710_v24  ;;  %v1717_v22 = vadd.f32 %v1709_v21, %v1707_v28 }
 0x631   : > { %v1713_v29 = vrot.slane %v1712_v27, 2  ;;  %v1718_v30 = vrot.slane %v1717_v22, 4 }
 0x633   : > { %v1714_v32 = vadd.f32 %v1713_v29, %v1712_v27  ;;  %v1719_v59 = vadd.f32 %v1718_v30, %v1717_v22 }
 0x635   : > { %v1715_v34 = vrot.slane %v1714_v32, 1  ;;  %v1720_v60 = vrot.slane %v1719_v59, 2 }
 0x637   : > { %v1716_v35 = vadd.f32 %v1715_v34, %v1714_v32  ;;  %v1721_v36 = vadd.f32 %v1720_v60, %v1719_v59 }
 0x639   : > { %v1724_v37 = vmul.f32 0.00048828125, %v1716_v35  ;;  %v1722_v40 = vrot.slane %v1721_v36, 1 }
 0x63b   : > { %v1726_v31 = vadd.f32 1e-05, %v1724_v37  ;;  %v1723_v44 = vadd.f32 %v1722_v40, %v1721_v36 }
 0x63d   : > { %3454 = vrsqrt.f32 %v1726_v31  ;;  %v1725_v33 = vmul.f32 0.00048828125, %v1723_v44 }
 0x63f   : > { %v1727_v50 = vadd.f32 1e-05, %v1725_v33 }
 0x641   : > { %3456 = vrsqrt.f32 %v1727_v50 }
 0x64a   : > { %v3455_v6 = vpop.eup %3454 }
 0x64b   : > { %v1731_v55 = vmul.f32 %v3455_v6, %v1730_v51 }
 0x64d   : > { %v1736_v54 = vrot.slane %v1731_v55, %v3867_v41 }
 0x64e   : > { %v3457_v57 = vpop.eup %3456 }
 0x64f   : > { %v1741_v56 = vmul.f32 %v1736_v54, %v3932_v48  ;;  %v1742_v62 = vmul.f32 %v1736_v54, %v3930_v45  ;;  %v1732_v63 = vmul.f32 %v3457_v57, %v1730_v51 }
 0x651   : > { %v1750_v38 = vadd.f32 %v3015_v7, %v1741_v56  ;;  %v1751_v39 = vadd.f32 %v3015_v7, %v1742_v62  ;;  %v1740_v4 = vrot.slane %v1732_v63, %v3867_v41 }
 0x653   : > { %v4029_v5 = vadd.f32 %v1750_v38, %v3702_v49  ;;  %v4032_v8 = vadd.f32 %v3698_v47, %v1751_v39  ;;  %v1743_v43 = vmul.f32 %v1740_v4, %v3940_v52  ;;  %v1744_v42 = vmul.f32 %v1740_v4, %v3938_v46 }
 0x655   : > { %v4037_v9 = vmul.f32 0.70710677, %v4029_v5  ;;  %v4040_v45 = vmul.f32 0.70710677, %v4032_v8  ;;  %v1752_v48 = vadd.f32 %v3015_v7, %v1743_v43  ;;  %v1753_v10 = vadd.f32 %v3015_v7, %v1744_v42 }
 0x657   : > { %v1774_v11 = vand.u32 2147483647, %v4037_v9  ;;  %v1775_v49 = vand.u32 2147483647, %v4040_v45  ;;  %v4045_v1 = vadd.f32 %v1752_v48, %v3716_v61  ;;  %v4048_v47 = vadd.f32 %v3706_v53, %v1753_v10 }
 0x658   : > { %vm1766_vm9 = vcmp.ge.f32.partialorder %v4037_v9, 0.0  ;;  %vm1767_vm10 = vcmp.ge.f32.partialorder %v4040_v45, 0.0  ;;  %v1758_v45 = vmul.f32 0.5, %v4029_v5 }
 0x659   : > { %v1778_v52 = vmul.f32 0.3275911, %v1774_v11  ;;  %v1779_v46 = vmul.f32 0.3275911, %v1775_v49  ;;  %v4051_v12 = vmul.f32 0.70710677, %v4045_v1 }
 0x65a   : > { %v4054_v13 = vmul.f32 0.70710677, %v4048_v47  ;;  %v1830_v20 = vsub.f32 0.0, %v1774_v11  ;;  %v1831_v23 = vsub.f32 0.0, %v1775_v49  ;;  %v1760_v5 = vmul.f32 0.5, %v4045_v1 }
 0x65b   : > { %v1782_v14 = vadd.f32 1.0, %v1778_v52  ;;  %v1783_v15 = vadd.f32 1.0, %v1779_v46  ;;  %v1776_v16 = vand.u32 2147483647, %v4051_v12  ;;  %vm1768_vm12 = vcmp.ge.f32.partialorder %v4051_v12, 0.0 }
 0x65c   : > { %v1777_v2 = vand.u32 2147483647, %v4054_v13  ;;  %v1834_v24 = vmul.f32 %v1830_v20, %v1774_v11  ;;  %v1835_v26 = vmul.f32 %v1831_v23, %v1775_v49  ;;  %vm1769_vm15 = vcmp.ge.f32.partialorder %v4054_v13, 0.0 }
 0x65d   : > { %3458 = vrcp.f32 %v1782_v14  ;;  %v1780_v61 = vmul.f32 0.3275911, %v1776_v16  ;;  %v1832_v27 = vsub.f32 0.0, %v1776_v16 }
 0x65e   : > { %3460 = vrcp.f32 %v1783_v15  ;;  %v1781_v18 = vmul.f32 0.3275911, %v1777_v2  ;;  %v1833_v21 = vsub.f32 0.0, %v1777_v2  ;;  %v1838_v30 = vmul.f32 1.442695, %v1834_v24 }
 0x65f   : > { %v1784_v53 = vadd.f32 1.0, %v1780_v61  ;;  %v1840_v59 = vmul.f32 1.442695, %v1835_v26  ;;  %v1836_v34 = vmul.f32 %v1832_v27, %v1776_v16 }
 0x660   : > { %v1785_v19 = vadd.f32 1.0, %v1781_v18  ;;  %v1837_v35 = vmul.f32 %v1833_v21, %v1777_v2  ;;  %v1770_v21 = vsel %vm1766_vm9, 1.0, %v3506_v25  ;;  %vm4212_vm9 = vmand %vm2539_vm7, %vm688_vm11  ;;  %vm2562_vm11 = vcmask 1043968  }
 0x661   : > { %3462 = vrcp.f32 %v1784_v53  ;;  %v1842_v50 = vmul.f32 1.442695, %v1836_v34 }
 0x662   : > { %3464 = vrcp.f32 %v1785_v19  ;;  %v1844_v55 = vmul.f32 1.442695, %v1837_v35 }
 0x663   : > { %3466 = vpow2.f32 %v1838_v30 }
 0x664   : > { %3468 = vpow2.f32 %v1840_v59 }
 0x665   : > { %3470 = vpow2.f32 %v1842_v50  ;;  %v1772_v50 = vsel %vm1768_vm12, 1.0, %v3506_v25 }
 0x666   : > { %3472 = vpow2.f32 %v1844_v55 }
 0x66a   : > { %v3459_v28 = vpop.eup %3458 }
 0x66b   : > { %v3461_v22 = vpop.eup %3460  ;;  %v1794_v29 = vmul.f32 1.0614054, %v3459_v28 }
 0x66c   : > { %v1795_v32 = vmul.f32 1.0614054, %v3461_v22 }
 0x66d   : > { %v1798_v60 = vadd.f32 -1.4531521, %v1794_v29 }
 0x66e   : > { %v1799_v36 = vadd.f32 -1.4531521, %v1795_v32  ;;  %v3463_v37 = vpop.eup %3462  ;;  %v1771_v32 = vsel %vm1767_vm10, 1.0, %v3506_v25  ;;  %vm4218_vm10 = vmand %vm2539_vm7, %vm670_vm13 }
 0x66f   : > { %v1802_v40 = vmul.f32 %v3459_v28, %v1798_v60  ;;  %v3465_v31 = vpop.eup %3464  ;;  %v1796_v33 = vmul.f32 1.0614054, %v3463_v37 }
 0x670   : > { %v1803_v44 = vmul.f32 %v3461_v22, %v1799_v36  ;;  %v1797_v6 = vmul.f32 1.0614054, %v3465_v31  ;;  %v3467_v2 = vpop.eup %3466 }
 0x671   : > { %v1806_v51 = vadd.f32 1.4214138, %v1802_v40  ;;  %v1800_v7 = vadd.f32 -1.4531521, %v1796_v33  ;;  %v3469_v53 = vpop.eup %3468  ;;  %v1759_v40 = vmul.f32 0.5, %v4032_v8  ;;  %v1761_v8 = vmul.f32 0.5, %v4048_v47 }
 0x672   : > { %v1807_v54 = vadd.f32 1.4214138, %v1803_v44  ;;  %v1801_v56 = vadd.f32 -1.4531521, %v1797_v6  ;;  %v1773_v6 = vsel %vm1769_vm15, 1.0, %v3506_v25 }
 0x673   : > { %v1810_v57 = vmul.f32 %v3459_v28, %v1806_v51  ;;  %v1804_v63 = vmul.f32 %v3463_v37, %v1800_v7 }
 0x674   : > { %v1811_v62 = vmul.f32 %v3461_v22, %v1807_v54  ;;  %v1805_v39 = vmul.f32 %v3465_v31, %v1801_v56 }
 0x675   : > { %v1814_v38 = vadd.f32 -0.28449672, %v1810_v57  ;;  %v1808_v43 = vadd.f32 1.4214138, %v1804_v63 }
 0x676   : > { %v1815_v4 = vadd.f32 -0.28449672, %v1811_v62  ;;  %v1809_v48 = vadd.f32 1.4214138, %v1805_v39 }
 0x677   : > { %v1818_v42 = vmul.f32 %v3459_v28, %v1814_v38  ;;  %v1812_v11 = vmul.f32 %v3463_v37, %v1808_v43 }
 0x678   : > { %v1819_v10 = vmul.f32 %v3461_v22, %v1815_v4  ;;  %v1813_v52 = vmul.f32 %v3465_v31, %v1809_v48 }
 0x679   : > { %v1822_v49 = vadd.f32 0.2548296, %v1818_v42  ;;  %v1816_v14 = vadd.f32 -0.28449672, %v1812_v11 }
 0x67a   : > { %v1823_v46 = vadd.f32 0.2548296, %v1819_v10  ;;  %v1817_v16 = vadd.f32 -0.28449672, %v1813_v52 }
 0x67b   : > { %v1826_v15 = vmul.f32 %v3459_v28, %v1822_v49  ;;  %v1820_v18 = vmul.f32 %v3463_v37, %v1816_v14  ;;  %v3471_v28 = vpop.eup %3470 }
 0x67c   : > { %v1827_v61 = vmul.f32 %v3461_v22, %v1823_v46  ;;  %v1821_v20 = vmul.f32 %v3465_v31, %v1817_v16  ;;  %v3473_v34 = vpop.eup %3472  ;;  %v1914_v16 = vld [vmem:[#allocation2] sm:$0xf] }
 0x67d   : > { %v1846_v19 = vmul.f32 %v3467_v2, %v1826_v15  ;;  %v1824_v24 = vadd.f32 0.2548296, %v1820_v18 }
 0x67e   : > { %v1847_v23 = vmul.f32 %v3469_v53, %v1827_v61  ;;  %v1825_v27 = vadd.f32 0.2548296, %v1821_v20 }
 0x67f   : > { %v1850_v26 = vsub.f32 1.0, %v1846_v19  ;;  %v1828_v30 = vmul.f32 %v3463_v37, %v1824_v24 }
 0x680   : > { %v1851_v29 = vsub.f32 1.0, %v1847_v23  ;;  %v1829_v59 = vmul.f32 %v3465_v31, %v1825_v27 }
 0x681   : > { %v1854_v22 = vmul.f32 %v1850_v26, %v1770_v21  ;;  %v1848_v9 = vmul.f32 %v3471_v28, %v1828_v30 }
 0x682   : > { %v1855_v60 = vmul.f32 %v1851_v29, %v1771_v32  ;;  %v1849_v36 = vmul.f32 %v3473_v34, %v1829_v59  ;;  %v1953_v29 = vld [vmem:[#allocation2 + $0x14] sm:$0xf] }
 0x683   : > { %v1858_v35 = vadd.f32 1.0, %v1854_v22  ;;  %v1852_v37 = vsub.f32 1.0, %v1848_v9 }
 0x684   : > { %v1859_v44 = vadd.f32 1.0, %v1855_v60  ;;  %v1853_v51 = vsub.f32 1.0, %v1849_v36 }
 0x685   : > { %v1862_v33 = vmul.f32 %v1858_v35, %v1758_v45  ;;  %v1856_v55 = vmul.f32 %v1852_v37, %v1772_v50  ;;  %v1918_v45 = vld [vmem:[#allocation2 + $0x18] sm:$0xf] }
 0x686   : > { %v1863_v31 = vmul.f32 %v1859_v44, %v1759_v40  ;;  %v1857_v54 = vmul.f32 %v1853_v51, %v1773_v6  ;;  %v1957_v51 = vld [vmem:[#allocation2 + $0x2c] sm:$0xf] }
 0x687   : > { %v3084_v12 = vpack.c.bf16 %v1862_v33, %v1862_v33  ;;  %v1860_v57 = vadd.f32 1.0, %v1856_v55 }
 0x688   : > { %v3085_v7 = vpack.c.bf16 %v1863_v31, %v1863_v31  ;;  %v1861_v62 = vadd.f32 1.0, %v1857_v54 }
 0x689   : > { %v1879_v13 = vshrl.u32 %v3084_v12, 16  ;;  %v1882_v56 = vshll.u32 %v3084_v12, 16  ;;  %1926 = vst [vmem:[#allocation2 + $0x4] sm:$0xf] %v3084_v12  ;;  %v1864_v39 = vmul.f32 %v1860_v57, %v1760_v5 }
 0x68a   : > { %v1887_v63 = vshrl.u32 %v3085_v7, 16  ;;  %v1890_v38 = vshll.u32 %v3085_v7, 16  ;;  %1927 = vst [vmem:[#allocation2 + $0x10] sm:$0xf] %v3085_v7  ;;  %v1865_v48 = vmul.f32 %v1861_v62, %v1761_v8 }
 0x68b   : > { %v1881_v4 = vrot.slane %v1879_v13, 7  ;;  %v1930_v43 = vrot.slane %v1879_v13, 4  ;;  %v1931_v42 = vrot.slane %v1882_v56, 5  ;;  %v3086_v52 = vpack.c.bf16 %v1864_v39, %v1864_v39 }
 0x68c   : > { %v1889_v10 = vrot.slane %v1887_v63, 7  ;;  %v1934_v11 = vrot.slane %v1890_v38, 5  ;;  %v1936_v49 = vrot.slane %v1887_v63, 4  ;;  %v3087_v15 = vpack.c.bf16 %v1865_v48, %v1865_v48 }
 0x68d   : > { %v1884_v1 = vor.u32 %v1882_v56, %v1881_v4  ;;  %v1885_v46 = vrot.slane %v1881_v4, 4  ;;  %v1932_v14 = vor.u32 %v1931_v42, %v1930_v43  ;;  %v1895_v61 = vshrl.u32 %v3086_v52, 16  ;;  %1928 = vst [vmem:[#allocation2 + $0x1c] sm:$0xf] %v3086_v52 }
 0x68e   : > { %v1892_v2 = vor.u32 %v1890_v38, %v1889_v10  ;;  %v1937_v47 = vor.u32 %v1936_v49, %v1934_v11  ;;  %v1898_v18 = vshll.u32 %v3086_v52, 16  ;;  %v1903_v20 = vshrl.u32 %v3087_v15, 16  ;;  %1929 = vst [vmem:[#allocation2 + $0x28] sm:$0xf] %v3087_v15 }
 0x68f   : > { %v1915_v53 = vsel %vm3726_vm2, %v1884_v1, %v1914_v16  ;;  %v1933_v19 = vrot.slane %v1932_v14, 4  ;;  %v1906_v23 = vshll.u32 %v3087_v15, 16  ;;  %v1897_v26 = vrot.slane %v1895_v61, 7 }
 0x690   : > { %v1938_v24 = vrot.slane %v1937_v47, 4  ;;  %1916 = vst [vmem:[#allocation2] sm:$0xf] %v1915_v53  ;;  %v1939_v27 = vrot.slane %v1895_v61, 4  ;;  %v1940_v21 = vrot.slane %v1898_v18, 5  ;;  %v1905_v30 = vrot.slane %v1903_v20, 7 }
 0x691   : > { %v1943_v28 = vrot.slane %v1906_v23, 5  ;;  %v1945_v32 = vrot.slane %v1903_v20, 4  ;;  %v1893_v22 = vsel %vm3720_vm1, %v1885_v46, %v1892_v2  ;;  %v1900_v34 = vor.u32 %v1898_v18, %v1897_v26  ;;  %v3410_v3 = vld [vmem:[#allocation2 + $0x4] ss:$12 sps:$4 sm:$0xff]  }
 0x692   : > { %v1954_v59 = vsel %vm3710_vm14, %v1938_v24, %v1953_v29  ;;  %v1901_v60 = vrot.slane %v1897_v26, 4  ;;  %v1941_v9 = vor.u32 %v1940_v21, %v1939_v27  ;;  %1917 = vst [vmem:[#allocation2 + $0xc] sm:$0xf] %v1893_v22  ;;  %v1908_v35 = vor.u32 %v1906_v23, %v1905_v30  ;;  %2224 = vmatprep.mubr.bf16.mxu1 %v3410_v3 }
 0x693   : > { %1955 = vst [vmem:[#allocation2 + $0x14] sm:$0xf] %v1954_v59  ;;  %v1946_v36 = vor.u32 %v1945_v32, %v1943_v28  ;;  %v1935_v40 = vsel %vm3734_vm3, %v1933_v19, %v1934_v11  ;;  %v1919_v44 = vsel %vm3726_vm2, %v1900_v34, %v1918_v45 }
 0x694   : > { %v1942_v37 = vrot.slane %v1941_v9, 4  ;;  %1952 = vst [vmem:[#allocation2 + $0x8] sm:$0xf] %v1935_v40  ;;  %1920 = vst [vmem:[#allocation2 + $0x18] sm:$0xf] %v1919_v44  ;;  %v1909_v50 = vsel %vm3720_vm1, %v1901_v60, %v1908_v35 }
 0x695   : > { %v1947_v33 = vrot.slane %v1946_v36, 4  ;;  %1921 = vst [vmem:[#allocation2 + $0x24] sm:$0xf] %v1909_v50  ;;  %v3413_v54 = vld [vmem:[#allocation2 + $0x1c] ss:$12 sps:$4 sm:$0xff]  }
 0x696   : > { %v1944_v31 = vsel %vm3734_vm3, %v1942_v37, %v1943_v28 }
 0x697   : > { %v1958_v6 = vsel %vm3710_vm14, %v1947_v33, %v1957_v51  ;;  %1956 = vst [vmem:[#allocation2 + $0x20] sm:$0xf] %v1944_v31  ;;  %vm409_vm14 = vcmask 516096  }
 0x698   : > { %1959 = vst [vmem:[#allocation2 + $0x2c] sm:$0xf] %v1958_v6  ;;  %vm410_vm2 = vmand %vm409_vm14, %vm392_vm8 }
 0x699   : > { %v3408_v55 = vld [vmem:[#allocation2] ss:$12 sps:$4 sm:$0xff]  }
 0x69a   : > { %2225 = vmatmul.mubr.bf16.vlgmr.msra.gmra.mxu1 %v3408_v55 }
 0x69b   : > { %v3411_v12 = vld [vmem:[#allocation2 + $0x8] ss:$12 sps:$4 sm:$0xff]   ;;  %v1964_v7 = vld [vmem:[#allocation2 + $0x18] sm:$0xff]  ;;  %2232 = vmatprep.mubr.bf16.mxu1 %v3413_v54 }
 0x69c   : > { %3307 = vmatprep.mubr.bf16.mxu0 %v3411_v12  ;;  %v1966_v5 = vld [vmem:[#allocation2 + $0x24] sm:$0xff] }
 0x69d   : > { %v3023_v13 = vcombine.low %v1964_v7, %v1966_v5  ;;  %v411_v7 = vld [vmem:[#allocation3] sm:$0x1] }
 0x69e   : > { %v412_v5 = vsel %vm410_vm2, 0, %v411_v7 }
 0x69f   : > { %v3415_v57 = vld [vmem:[#allocation2 + $0x20] ss:$12 sps:$4 sm:$0xff]   ;;  %413 = vst [vmem:[#allocation3] sm:$0x1] %v412_v5 }
 0x6a0   : > { %3308 = vmatmul.mubr.bf16.vlgmr.msra.gmra.mxu0 %v3415_v57  ;;  %v414_v57 = vld [vmem:[#allocation3 + $0x10] sm:$0x1] }
 0x6a2   : > { %2233 = vmatmul.mubr.bf16.gmra.mxu1 %v3023_v13  ;;  %v415_v13 = vsel %vm410_vm2, 0, %v414_v57 }
 0x6a3   : > { %416 = vst [vmem:[#allocation3 + $0x10] sm:$0x1] %v415_v13 }
 0x75a   : > { %v3200_v56 = vpop.f32.mrf.mxu1 }
 0x75c   : > { %v3201_v8 = vpop.f32.mrf.mxu1 }
 0x75d   : > { %v3202_v63 = vadd.f32 %v3201_v8, %v3200_v56  ;;  %v3416_v56 = vld [vmem:[%s4279_s6 + $0x38] sm:$0xff]   ;;  %v3507_v8 = vmov 0  }
 0x75e   : > { %v3203_v58 = vpop.f32.mrf.mxu1  ;;  %2722 = vmatprep.subr.bf16.mxu1 %v3507_v8 }
 0x75f   : > { %2723 = vmatpush1.bf16.msra.mxu1 %v3416_v56 }
 0x760   : > { %v3309_v62 = vpop.f32.mrf.mxu0  ;;  %v3204_v38 = vpop.f32.mrf.mxu1  ;;  %2724 = vmatprep.subr.bf16.mxu1 %v3507_v8 }
 0x761   : > { %v3205_v48 = vadd.f32 %v3204_v38, %v3203_v58  ;;  %v3417_v58 = vld [vmem:[%s4279_s6 + $0x30] sm:$0xff]   ;;  %v3420_v38 = vld [vmem:[%s4279_s6 + $0x18] sm:$0xff]  }
 0x762   : > { %v2275_v39 = vpop.f32.mrf.mxu0  ;;  %v3206_v4 = vpop.f32.mrf.mxu1 }
 0x763   : > { %v2276_v43 = vadd.f32 %v3202_v63, %v2275_v39  ;;  %2725 = vmatpush1.bf16.msra.mxu1 %v3417_v58  ;;  %v3419_v63 = vld [vmem:[%s4279_s6 + $0x20] sm:$0xff]   ;;  %v3421_v39 = vld [vmem:[%s4279_s6 + $0x10] sm:$0xff]  }
 0x764   : > { %v3310_v42 = vpop.f32.mrf.mxu0  ;;  %v3207_v10 = vpop.f32.mrf.mxu1  ;;  %2726 = vmatprep.subr.bf16.mxu1 %v3507_v8 }
 0x765   : > { %v2290_v11 = vsel %vm435_vm0, %v2276_v43, 0.0  ;;  %v3208_v49 = vadd.f32 %v3207_v10, %v3206_v4 }
 0x766   : > { %v2278_v52 = vpop.f32.mrf.mxu0  ;;  %2291 = vadd.xlane.f32.xlu0 %v2290_v11  ;;  %v3209_v46 = vpop.f32.mrf.mxu1  ;;  %v3423_v11 = vld [vmem:[%s4279_s6] sm:$0xff]  }
 0x767   : > { %v2279_v1 = vadd.f32 %v3205_v48, %v2278_v52  ;;  %v2284_v14 = vadd.f32 %v3309_v62, %v3208_v49  ;;  %v3418_v62 = vld [vmem:[%s4279_s6 + $0x28] sm:$0xff]  }
 0x768   : > { %v3210_v15 = vpop.f32.mrf.mxu1  ;;  %2727 = vmatpush1.bf16.msra.mxu1 %v3418_v62 }
 0x769   : > { %v2293_v16 = vsel %vm435_vm0, %v2279_v1, 0.0  ;;  %v3211_v2 = vadd.f32 %v3210_v15, %v3209_v46  ;;  %v2296_v47 = vsel %vm435_vm0, %v2284_v14, 0.0  ;;  %2728 = vmatprep.subr.bf16.mxu1 %v3507_v8 }
 0x76a   : > { %2294 = vadd.xlane.f32.xlu1 %v2293_v16  ;;  %2297 = vadd.xlane.f32.xlu0 %v2296_v47  ;;  %v3424_v16 = vld [vmem:[%s4279_s6 + $0x58] sm:$0xff]  }
 0x76b   : > { %v2287_v61 = vadd.f32 %v3310_v42, %v3211_v2  ;;  %v3422_v42 = vld [vmem:[%s4279_s6 + $0x8] sm:$0xff]  }
 0x76c   : > { %2729 = vmatpush1.bf16.msra.mxu1 %v3419_v63 }
 0x76d   : > { %v2299_v18 = vsel %vm435_vm0, %v2287_v61, 0.0  ;;  %2730 = vmatprep.subr.bf16.mxu1 %v3507_v8 }
 0x76e   : > { %2300 = vadd.xlane.f32.xlu1 %v2299_v18 }
 0x770   : > { %2731 = vmatpush1.bf16.msra.mxu1 %v3420_v38 }
 0x771   : > { %2732 = vmatprep.subr.bf16.mxu1 %v3507_v8 }
 0x774   : > { %2733 = vmatpush1.bf16.msra.mxu1 %v3421_v39 }
 0x775   : > { %2734 = vmatprep.subr.bf16.mxu1 %v3507_v8 }
 0x778   : > { %2735 = vmatpush1.bf16.msra.mxu1 %v3422_v42 }
 0x779   : > { %2736 = vmatprep.subr.bf16.mxu1 %v3507_v8 }
 0x77c   : > { %2737 = vmatpush1.bf16.msra.mxu1 %v3423_v11 }
 0x77d   : > { %2746 = vmatprep.subr.bf16.mxu1 %v3507_v8 }
 0x780   : > { %2747 = vmatpush2.bf16.msra.mxu1 %v3424_v16 }
 0x781   : > { %2748 = vmatprep.subr.bf16.mxu1 %v3507_v8 }
 0x7ef   : > { %v2292_v53 = vpop.xlane.xlu0 %2291 }
 0x7f3   : > { %v2295_v19 = vpop.xlane.xlu1 %2294  ;;  %v2298_v26 = vpop.xlane.xlu0 %2297 }
 0x7f4   : > { %v2302_v20 = vadd.f32 %v2295_v19, %v2292_v53 }
 0x7f6   : > { %v2303_v23 = vrot.slane %v2302_v20, 4 }
 0x7f7   : > { %v2301_v27 = vpop.xlane.xlu1 %2300 }
 0x7f8   : > { %v2304_v24 = vadd.f32 %v2303_v23, %v2302_v20  ;;  %v2309_v21 = vadd.f32 %v2301_v27, %v2298_v26 }
 0x7fa   : > { %v2305_v29 = vrot.slane %v2304_v24, 2  ;;  %v2310_v30 = vrot.slane %v2309_v21, 4 }
 0x7fc   : > { %v2306_v28 = vadd.f32 %v2305_v29, %v2304_v24  ;;  %v2311_v32 = vadd.f32 %v2310_v30, %v2309_v21  ;;  %v2359_v29 = vld [vmem:[%s4282_s9] sm:$0x1] }
 0x7fe   : > { %v2307_v22 = vrot.slane %v2306_v28, 1  ;;  %v2312_v59 = vrot.slane %v2311_v32, 2 }
 0x800   : > { %v2308_v34 = vadd.f32 %v2307_v22, %v2306_v28  ;;  %v2313_v60 = vadd.f32 %v2312_v59, %v2311_v32  ;;  %v3050_v22 = vld [vmem:[%s4282_s9 + $0x1] ss:$0 sm:$0xff] }
 0x802   : > { %v2317_v9 = vmul.f32 0.0009765625, %v2308_v34  ;;  %v2314_v45 = vrot.slane %v2313_v60, 1 }
 0x804   : > { %v4090_v35 = vsub.f32 %v2279_v1, %v2317_v9  ;;  %v4092_v36 = vsub.f32 %v2276_v43, %v2317_v9  ;;  %v2315_v40 = vadd.f32 %v2314_v45, %v2313_v60 }
 0x806   : > { %v2324_v44 = vmul.f32 %v4090_v35, %v4090_v35  ;;  %v2323_v37 = vmul.f32 %v4092_v36, %v4092_v36  ;;  %v2318_v33 = vmul.f32 0.0009765625, %v2315_v40 }
 0x808   : > { %v2330_v50 = vsel %vm435_vm0, %v2324_v44, 0.0  ;;  %v2327_v51 = vsel %vm435_vm0, %v2323_v37, 0.0  ;;  %v4100_v31 = vsub.f32 %v2287_v61, %v2318_v33  ;;  %v4102_v6 = vsub.f32 %v2284_v14, %v2318_v33 }
 0x809   : > { %2331 = vadd.xlane.f32.xlu1 %v2330_v50  ;;  %2328 = vadd.xlane.f32.xlu0 %v2327_v51 }
 0x80a   : > { %v2326_v55 = vmul.f32 %v4100_v31, %v4100_v31  ;;  %v2325_v3 = vmul.f32 %v4102_v6, %v4102_v6 }
 0x80c   : > { %v2336_v12 = vsel %vm435_vm0, %v2326_v55, 0.0  ;;  %v2333_v54 = vsel %vm435_vm0, %v2325_v3, 0.0 }
 0x80d   : > { %2337 = vadd.xlane.f32.xlu1 %v2336_v12  ;;  %2334 = vadd.xlane.f32.xlu0 %v2333_v54 }
 0x892   : > { %v2332_v4 = vpop.xlane.xlu1 %2331  ;;  %v2329_v43 = vpop.xlane.xlu0 %2328 }
 0x893   : > { %v2339_v48 = vadd.f32 %v2332_v4, %v2329_v43 }
 0x895   : > { %v2340_v10 = vrot.slane %v2339_v48, 4 }
 0x896   : > { %v2338_v52 = vpop.xlane.xlu1 %2337  ;;  %v2335_v1 = vpop.xlane.xlu0 %2334 }
 0x897   : > { %v2341_v49 = vadd.f32 %v2340_v10, %v2339_v48  ;;  %v2346_v46 = vadd.f32 %v2338_v52, %v2335_v1 }
 0x899   : > { %v2342_v14 = vrot.slane %v2341_v49, 2  ;;  %v2347_v15 = vrot.slane %v2346_v46, 4 }
 0x89b   : > { %v2343_v2 = vadd.f32 %v2342_v14, %v2341_v49  ;;  %v2348_v47 = vadd.f32 %v2347_v15, %v2346_v46 }
 0x89d   : > { %v2344_v61 = vrot.slane %v2343_v2, 1  ;;  %v2349_v18 = vrot.slane %v2348_v47, 2 }
 0x89f   : > { %v2345_v53 = vadd.f32 %v2344_v61, %v2343_v2  ;;  %v2350_v19 = vadd.f32 %v2349_v18, %v2348_v47 }
 0x8a1   : > { %v2353_v20 = vmul.f32 0.0009765625, %v2345_v53  ;;  %v2351_v23 = vrot.slane %v2350_v19, 1 }
 0x8a3   : > { %v2355_v24 = vadd.f32 1e-05, %v2353_v20  ;;  %v2352_v26 = vadd.f32 %v2351_v23, %v2350_v19 }
 0x8a5   : > { %3474 = vrsqrt.f32 %v2355_v24  ;;  %v2354_v27 = vmul.f32 0.0009765625, %v2352_v26 }
 0x8a7   : > { %v2356_v21 = vadd.f32 1e-05, %v2354_v27 }
 0x8a9   : > { %3476 = vrsqrt.f32 %v2356_v21 }
 0x8b2   : > { %v3475_v30 = vpop.eup %3474 }
 0x8b3   : > { %v2360_v28 = vmul.f32 %v3475_v30, %v2359_v29 }
 0x8b5   : > { %v2365_v32 = vrot.slane %v2360_v28, %v3867_v41 }
 0x8b6   : > { %v3477_v59 = vpop.eup %3476 }
 0x8b7   : > { %v2371_v34 = vmul.f32 %v2365_v32, %v4090_v35  ;;  %v2370_v60 = vmul.f32 %v2365_v32, %v4092_v36  ;;  %v2361_v9 = vmul.f32 %v3477_v59, %v2359_v29 }
 0x8b9   : > { %v4157_v45 = vadd.f32 %v3050_v22, %v2371_v34  ;;  %v4159_v40 = vadd.f32 %v3050_v22, %v2370_v60  ;;  %v2369_v44 = vrot.slane %v2361_v9, %v3867_v41 }
 0x8bb   : > { %v4163_v37 = vmul.f32 0.70710677, %v4157_v45  ;;  %v4166_v33 = vmul.f32 0.70710677, %v4159_v40  ;;  %v2372_v50 = vmul.f32 %v2369_v44, %v4102_v6  ;;  %v2373_v51 = vmul.f32 %v2369_v44, %v4100_v31 }
 0x8bd   : > { %v2400_v35 = vand.u32 2147483647, %v4163_v37  ;;  %v2399_v36 = vand.u32 2147483647, %v4166_v33  ;;  %v4172_v55 = vadd.f32 %v3050_v22, %v2372_v50  ;;  %v4174_v3 = vadd.f32 %v3050_v22, %v2373_v51 }
 0x8be   : > { %vm2392_vm8 = vcmp.ge.f32.partialorder %v4163_v37, 0.0  ;;  %vm2391_vm4 = vcmp.ge.f32.partialorder %v4166_v33, 0.0  ;;  %v3426_v33 = vld [vmem:[%s4279_s6 + $0x48] sm:$0xff]  }
 0x8bf   : > { %v2404_v12 = vmul.f32 0.3275911, %v2400_v35  ;;  %v2403_v54 = vmul.f32 0.3275911, %v2399_v36  ;;  %v4177_v7 = vmul.f32 0.70710677, %v4172_v55 }
 0x8c0   : > { %v4180_v5 = vmul.f32 0.70710677, %v4174_v3  ;;  %v2456_v38 = vsub.f32 0.0, %v2400_v35  ;;  %v2455_v39 = vsub.f32 0.0, %v2399_v36 }
 0x8c1   : > { %v2408_v57 = vadd.f32 1.0, %v2404_v12  ;;  %v2407_v6 = vadd.f32 1.0, %v2403_v54  ;;  %v2401_v31 = vand.u32 2147483647, %v4177_v7  ;;  %vm2393_vm5 = vcmp.ge.f32.partialorder %v4177_v7, 0.0  ;;  %v3427_v7 = vld [vmem:[%s4279_s6 + $0x40] sm:$0xff]  }
 0x8c2   : > { %v2402_v13 = vand.u32 2147483647, %v4180_v5  ;;  %v2460_v4 = vmul.f32 %v2456_v38, %v2400_v35  ;;  %v2459_v43 = vmul.f32 %v2455_v39, %v2399_v36  ;;  %v3425_v38 = vld [vmem:[%s4279_s6 + $0x50] sm:$0xff]   ;;  %vm2394_vm6 = vcmp.ge.f32.partialorder %v4180_v5, 0.0 }
 0x8c3   : > { %3478 = vrcp.f32 %v2408_v57  ;;  %v2405_v56 = vmul.f32 0.3275911, %v2401_v31  ;;  %v2457_v42 = vsub.f32 0.0, %v2401_v31  ;;  %2749 = vmatpush2.bf16.msra.mxu1 %v3425_v38  ;;  %v2398_v5 = vsel %vm2394_vm6, 1.0, %v3506_v25 }
 0x8c4   : > { %3480 = vrcp.f32 %v2407_v6  ;;  %v2406_v58 = vmul.f32 0.3275911, %v2402_v13  ;;  %v2458_v48 = vsub.f32 0.0, %v2402_v13  ;;  %v2465_v52 = vmul.f32 1.442695, %v2460_v4  ;;  %2750 = vmatprep.subr.bf16.mxu1 %v3507_v8 }
 0x8c5   : > { %v2409_v62 = vadd.f32 1.0, %v2405_v56  ;;  %v2463_v46 = vmul.f32 1.442695, %v2459_v43  ;;  %v2461_v14 = vmul.f32 %v2457_v42, %v2401_v31 }
 0x8c6   : > { %v2410_v63 = vadd.f32 1.0, %v2406_v58  ;;  %v2462_v16 = vmul.f32 %v2458_v48, %v2402_v13  ;;  %v2396_v48 = vsel %vm2392_vm8, 1.0, %v3506_v25 }
 0x8c7   : > { %3482 = vrcp.f32 %v2409_v62  ;;  %v2467_v20 = vmul.f32 1.442695, %v2461_v14  ;;  %2751 = vmatpush2.bf16.msra.mxu1 %v3426_v33 }
 0x8c8   : > { %3484 = vrcp.f32 %v2410_v63  ;;  %v2469_v26 = vmul.f32 1.442695, %v2462_v16  ;;  %v2384_v16 = vmul.f32 0.5, %v4157_v45  ;;  %2752 = vmatprep.subr.bf16.mxu1 %v3507_v8 }
 0x8c9   : > { %3486 = vpow2.f32 %v2465_v52  ;;  %v2395_v52 = vsel %vm2391_vm4, 1.0, %v3506_v25 }
 0x8ca   : > { %3488 = vpow2.f32 %v2463_v46 }
 0x8cb   : > { %3490 = vpow2.f32 %v2467_v20  ;;  %v2397_v20 = vsel %vm2393_vm5, 1.0, %v3506_v25  ;;  %2753 = vmatpush2.bf16.msra.mxu1 %v3427_v7 }
 0x8cc   : > { %3492 = vpow2.f32 %v2469_v26 }
 0x8d0   : > { %v3479_v10 = vpop.eup %3478 }
 0x8d1   : > { %v3481_v11 = vpop.eup %3480  ;;  %v2420_v49 = vmul.f32 1.0614054, %v3479_v10 }
 0x8d2   : > { %v2419_v1 = vmul.f32 1.0614054, %v3481_v11 }
 0x8d3   : > { %v2424_v15 = vadd.f32 -1.4531521, %v2420_v49 }
 0x8d4   : > { %v2423_v2 = vadd.f32 -1.4531521, %v2419_v1  ;;  %v3483_v47 = vpop.eup %3482 }
 0x8d5   : > { %v2428_v61 = vmul.f32 %v3479_v10, %v2424_v15  ;;  %v3485_v18 = vpop.eup %3484  ;;  %v2421_v19 = vmul.f32 1.0614054, %v3483_v47 }
 0x8d6   : > { %v2427_v53 = vmul.f32 %v3481_v11, %v2423_v2  ;;  %v2422_v24 = vmul.f32 1.0614054, %v3485_v18  ;;  %v3487_v31 = vpop.eup %3486 }
 0x8d7   : > { %v2432_v23 = vadd.f32 1.4214138, %v2428_v61  ;;  %v2425_v21 = vadd.f32 -1.4531521, %v2421_v19  ;;  %v3489_v58 = vpop.eup %3488  ;;  %v2383_v61 = vmul.f32 0.5, %v4159_v40 }
 0x8d8   : > { %v2431_v27 = vadd.f32 1.4214138, %v2427_v53  ;;  %v2426_v30 = vadd.f32 -1.4531521, %v2422_v24  ;;  %v3491_v37 = vpop.eup %3490 }
 0x8d9   : > { %v2436_v29 = vmul.f32 %v3479_v10, %v2432_v23  ;;  %v2429_v32 = vmul.f32 %v3483_v47, %v2425_v21  ;;  %v3493_v46 = vpop.eup %3492  ;;  %v2385_v21 = vmul.f32 0.5, %v4172_v55 }
 0x8da   : > { %v2435_v28 = vmul.f32 %v3481_v11, %v2431_v27  ;;  %v2430_v59 = vmul.f32 %v3485_v18, %v2426_v30 }
 0x8db   : > { %v2440_v22 = vadd.f32 -0.28449672, %v2436_v29  ;;  %v2433_v60 = vadd.f32 1.4214138, %v2429_v32 }
 0x8dc   : > { %v2439_v34 = vadd.f32 -0.28449672, %v2435_v28  ;;  %v2434_v44 = vadd.f32 1.4214138, %v2430_v59  ;;  %v2386_v28 = vmul.f32 0.5, %v4174_v3 }
 0x8dd   : > { %v2444_v9 = vmul.f32 %v3479_v10, %v2440_v22  ;;  %v2437_v51 = vmul.f32 %v3483_v47, %v2433_v60 }
 0x8de   : > { %v2443_v50 = vmul.f32 %v3481_v11, %v2439_v34  ;;  %v2438_v36 = vmul.f32 %v3485_v18, %v2434_v44 }
 0x8df   : > { %v2448_v35 = vadd.f32 0.2548296, %v2444_v9  ;;  %v2441_v54 = vadd.f32 -0.28449672, %v2437_v51 }
 0x8e0   : > { %v2447_v12 = vadd.f32 0.2548296, %v2443_v50  ;;  %v2442_v6 = vadd.f32 -0.28449672, %v2438_v36 }
 0x8e1   : > { %v2452_v57 = vmul.f32 %v3479_v10, %v2448_v35  ;;  %v2445_v56 = vmul.f32 %v3483_v47, %v2441_v54 }
 0x8e2   : > { %v2451_v13 = vmul.f32 %v3481_v11, %v2447_v12  ;;  %v2446_v63 = vmul.f32 %v3485_v18, %v2442_v6 }
 0x8e3   : > { %v2472_v62 = vmul.f32 %v3487_v31, %v2452_v57  ;;  %v2449_v4 = vadd.f32 0.2548296, %v2445_v56 }
 0x8e4   : > { %v2471_v39 = vmul.f32 %v3489_v58, %v2451_v13  ;;  %v2450_v42 = vadd.f32 0.2548296, %v2446_v63  ;;  %v2591_v63 = vld [vmem:[#allocation3 + $0xc] sm:$0xf] }
 0x8e5   : > { %v2476_v43 = vsub.f32 1.0, %v2472_v62  ;;  %v2453_v11 = vmul.f32 %v3483_v47, %v2449_v4 }
 0x8e6   : > { %v2475_v10 = vsub.f32 1.0, %v2471_v39  ;;  %v2454_v1 = vmul.f32 %v3485_v18, %v2450_v42 }
 0x8e7   : > { %v2480_v49 = vmul.f32 %v2476_v43, %v2396_v48  ;;  %v2473_v15 = vmul.f32 %v3491_v37, %v2453_v11 }
 0x8e8   : > { %v2479_v14 = vmul.f32 %v2475_v10, %v2395_v52  ;;  %v2474_v47 = vmul.f32 %v3493_v46, %v2454_v1  ;;  %v2541_v10 = vld [vmem:[#allocation3] sm:$0xf]  ;;  %v2546_v1 = vld [vmem:[#allocation3 + $0x10] sm:$0xf] }
 0x8e9   : > { %v2484_v2 = vadd.f32 1.0, %v2480_v49  ;;  %v2477_v18 = vsub.f32 1.0, %v2473_v15 }
 0x8ea   : > { %v2483_v53 = vadd.f32 1.0, %v2479_v14  ;;  %v2478_v23 = vsub.f32 1.0, %v2474_v47 }
 0x8eb   : > { %v2488_v19 = vmul.f32 %v2484_v2, %v2384_v16  ;;  %v2481_v24 = vmul.f32 %v2477_v18, %v2397_v20  ;;  %v2595_v18 = vld [vmem:[#allocation3 + $0x1c] sm:$0xf] }
 0x8ec   : > { %v2487_v45 = vmul.f32 %v2483_v53, %v2383_v61  ;;  %v2482_v27 = vmul.f32 %v2478_v23, %v2398_v5 }
 0x8ed   : > { %v3089_v26 = vpack.c.bf16 %v2488_v19, %v2488_v19  ;;  %v2485_v29 = vadd.f32 1.0, %v2481_v24 }
 0x8ee   : > { %v3088_v40 = vpack.c.bf16 %v2487_v45, %v2487_v45  ;;  %v2486_v32 = vadd.f32 1.0, %v2482_v27 }
 0x8ef   : > { %2552 = vrot.lane.b32.xlu1 %v3089_v26, %s3508_s18  ;;  %v2512_v8 = vshrl.u32 %v3089_v26, 16  ;;  %v2515_v30 = vshll.u32 %v3089_v26, 16  ;;  %v2489_v25 = vmul.f32 %v2485_v29, %v2385_v21 }
 0x8f0   : > { %2550 = vrot.lane.b32.xlu0 %v3088_v40, %s3508_s18  ;;  %v2504_v22 = vshrl.u32 %v3088_v40, 16  ;;  %v2507_v59 = vshll.u32 %v3088_v40, 16  ;;  %v2490_v44 = vmul.f32 %v2486_v32, %v2386_v28 }
 0x8f1   : > { %v2514_v34 = vrot.slane %v2512_v8, 7  ;;  %v2571_v60 = vrot.slane %v2515_v30, 5  ;;  %v2573_v9 = vrot.slane %v2512_v8, 4  ;;  %v3090_v35 = vpack.c.bf16 %v2489_v25, %v2489_v25 }
 0x8f2   : > { %v2506_v50 = vrot.slane %v2504_v22, 7  ;;  %v2567_v55 = vrot.slane %v2504_v22, 4  ;;  %v2568_v51 = vrot.slane %v2507_v59, 5  ;;  %v3091_v12 = vpack.c.bf16 %v2490_v44, %v2490_v44 }
 0x8f3   : > { %v2574_v36 = vor.u32 %v2573_v9, %v2571_v60  ;;  %v2517_v54 = vor.u32 %v2515_v30, %v2514_v34  ;;  %2554 = vrot.lane.b32.xlu1 %v3090_v35, %s3508_s18  ;;  %v2520_v6 = vshrl.u32 %v3090_v35, 16  ;;  %v2523_v31 = vshll.u32 %v3090_v35, 16 }
 0x8f4   : > { %v2509_v57 = vor.u32 %v2507_v59, %v2506_v50  ;;  %v2569_v3 = vor.u32 %v2568_v51, %v2567_v55  ;;  %v2528_v56 = vshrl.u32 %v3091_v12, 16  ;;  %v2531_v58 = vshll.u32 %v3091_v12, 16 }
 0x8f5   : > { %v2575_v13 = vrot.slane %v2574_v36, 4  ;;  %v2510_v38 = vrot.slane %v2506_v50, 4  ;;  %v2522_v4 = vrot.slane %v2520_v6, 7  ;;  %v2576_v43 = vrot.slane %v2520_v6, 4 }
 0x8f6   : > { %v2570_v39 = vrot.slane %v2569_v3, 4  ;;  %v2577_v42 = vrot.slane %v2523_v31, 5  ;;  %v2530_v11 = vrot.slane %v2528_v56, 7  ;;  %v2580_v37 = vrot.slane %v2531_v58, 5 }
 0x8f7   : > { %v2582_v49 = vrot.slane %v2528_v56, 4  ;;  %v2518_v52 = vsel %vm3720_vm1, %v2510_v38, %v2517_v54  ;;  %v2525_v46 = vor.u32 %v2523_v31, %v2522_v4  ;;  %2556 = vrot.lane.b32.xlu1 %v3091_v12, %s3508_s18  ;;  %v2592_v15 = vsel %vm4212_vm9, %v2575_v13, %v2591_v63 }
 0x8f8   : > { %v2572_v33 = vsel %vm3734_vm3, %v2570_v39, %v2571_v60  ;;  %v2578_v14 = vor.u32 %v2577_v42, %v2576_v43  ;;  %2545 = vst.msk [vmem:[#allocation3 + $0x8] sm:$0xf] %vm2539_vm7, %v2518_v52  ;;  %2593 = vst [vmem:[#allocation3 + $0xc] sm:$0xf] %v2592_v15  ;;  %v2542_v2 = vsel %vm4218_vm10, %v2509_v57, %v2541_v10  ;;  %v2526_v61 = vrot.slane %v2522_v4, 4 }
 0x8f9   : > { %v2583_v16 = vor.u32 %v2582_v49, %v2580_v37  ;;  %2589 = vst.msk [vmem:[#allocation3 + $0x4] sm:$0xf] %vm2539_vm7, %v2572_v33  ;;  %v2533_v47 = vor.u32 %v2531_v58, %v2530_v11  ;;  %2543 = vst [vmem:[#allocation3] sm:$0xf] %v2542_v2  ;;  %v2547_v19 = vsel %vm4218_vm10, %v2525_v46, %v2546_v1 }
 0x8fa   : > { %v2579_v53 = vrot.slane %v2578_v14, 4  ;;  %2548 = vst [vmem:[#allocation3 + $0x10] sm:$0xf] %v2547_v19 }
 0x8fb   : > { %v2584_v20 = vrot.slane %v2583_v16, 4  ;;  %v2534_v23 = vsel %vm3720_vm1, %v2526_v61, %v2533_v47 }
 0x8fc   : > { %v2581_v7 = vsel %vm3734_vm3, %v2579_v53, %v2580_v37  ;;  %2549 = vst.msk [vmem:[#allocation3 + $0x18] sm:$0xf] %vm2539_vm7, %v2534_v23 }
 0x8fd   : > { %2594 = vst.msk [vmem:[#allocation3 + $0x14] sm:$0xf] %vm2539_vm7, %v2581_v7  ;;  %v2596_v45 = vsel %vm4212_vm9, %v2584_v20, %v2595_v18 }
 0x8fe   : > { %2597 = vst [vmem:[#allocation3 + $0x1c] sm:$0xf] %v2596_v45 }
 0x900   : > { %v3430_v40 = vld [vmem:[#allocation3 + $0x4] ss:$8 sps:$4 sm:$0xff]  }
 0x901   : > { %3071 = vmatprep.mubr.msk.bf16.mxu1 %vm435_vm0, %v3430_v40 }
 0x905   : > { %v3431_v17 = vld [vmem:[#allocation3 + $0x14] ss:$8 sps:$4 sm:$0xff]  }
 0x961   : > { %v2553_v24 = vpop.permute.xlu1 %2552 }
 0x962   : > { %2564 = vst.msk [vmem:[#allocation3 + $0x8] sm:$0xf] %vm2562_vm11, %v2553_v24  ;;  %v2551_v5 = vpop.permute.xlu0 %2550 }
 0x963   : > { %2563 = vst.msk [vmem:[#allocation3] sm:$0xf] %vm2562_vm11, %v2551_v5 }
 0x965   : > { %v2555_v26 = vpop.permute.xlu1 %2554 }
 0x966   : > { %2565 = vst.msk [vmem:[#allocation3 + $0x10] sm:$0xf] %vm2562_vm11, %v2555_v26 }
 0x969   : > { %v2557_v0 = vpop.permute.xlu1 %2556 }
 0x96a   : > { %v3428_v27 = vld [vmem:[#allocation3] ss:$8 sps:$4 sm:$0xff]   ;;  %2566 = vst.msk [vmem:[#allocation3 + $0x18] sm:$0xf] %vm2562_vm11, %v2557_v0 }
 0x96b   : > { %2755 = vmatmul.mubr.bf16.vlgmr.msra.gmra.mxu1 %v3428_v27 }
 0x96c   : > { %3072 = vmatprep.mubr.msk.bf16.mxu1 %vm435_vm0, %v3431_v17 }
 0x971   : > { %v3433_v21 = vld [vmem:[#allocation3 + $0x10] ss:$8 sps:$4 sm:$0xff]  }
 0x973   : > { %2763 = vmatmul.mubr.bf16.gmra.mxu1 %v3433_v21 }
 0xa2b   : > { %v2756_v29 = vpop.f32.mrf.mxu1 }
 0xa2c   : > { %v2771_v34 = vsel %vm435_vm0, %v2756_v29, 0.0 }
 0xa2d   : > { %v2758_v8 = vpop.f32.mrf.mxu1 }
 0xa2f   : > { %v2759_v30 = vpop.f32.mrf.mxu1 }
 0xa30   : > { %v2774_v44 = vsel %vm435_vm0, %v2759_v30, 0.0 }
 0xa31   : > { %v2761_v28 = vpop.f32.mrf.mxu1 }
 0xa32   : > { %v2839_v28 = vld [vmem:[%s4283_s10] sm:$0x1] }
 0xa33   : > { %v2764_v32 = vpop.f32.mrf.mxu1 }
 0xa34   : > { %v2777_v22 = vsel %vm435_vm0, %v2764_v32, 0.0 }
 0xa35   : > { %2778 = vadd.xlane.f32.xlu0 %v2777_v22  ;;  %v2766_v59 = vpop.f32.mrf.mxu1 }
 0xa37   : > { %v2767_v25 = vpop.f32.mrf.mxu1 }
 0xa38   : > { %v2780_v60 = vsel %vm435_vm0, %v2767_v25, 0.0 }
 0xa39   : > { %2772 = vadd.xlane.f32.xlu0 %v2771_v34  ;;  %2781 = vadd.xlane.f32.xlu1 %v2780_v60  ;;  %v2769_v9 = vpop.f32.mrf.mxu1  ;;  %v3073_v34 = vld [vmem:[%s4283_s10 + $0x1] ss:$0 sm:$0xff] }
 0xa3d   : > { %2775 = vadd.xlane.f32.xlu0 %v2774_v44 }
 0xabe   : > { %v2779_v50 = vpop.xlane.xlu0 %2778 }
 0xac2   : > { %v2773_v55 = vpop.xlane.xlu0 %2772  ;;  %v2782_v51 = vpop.xlane.xlu1 %2781 }
 0xac3   : > { %v2790_v35 = vadd.f32 %v2782_v51, %v2779_v50 }
 0xac5   : > { %v2791_v36 = vrot.slane %v2790_v35, 4 }
 0xac6   : > { %v2776_v12 = vpop.xlane.xlu0 %2775 }
 0xac7   : > { %v2792_v54 = vadd.f32 %v2791_v36, %v2790_v35  ;;  %v2783_v57 = vadd.f32 %v2776_v12, %v2773_v55 }
 0xac9   : > { %v2793_v3 = vrot.slane %v2792_v54, 2  ;;  %v2784_v6 = vrot.slane %v2783_v57, 4 }
 0xacb   : > { %v2794_v31 = vadd.f32 %v2793_v3, %v2792_v54  ;;  %v2785_v13 = vadd.f32 %v2784_v6, %v2783_v57 }
 0xacd   : > { %v2795_v56 = vrot.slane %v2794_v31, 1  ;;  %v2786_v58 = vrot.slane %v2785_v13, 2 }
 0xacf   : > { %v2796_v62 = vadd.f32 %v2795_v56, %v2794_v31  ;;  %v2787_v63 = vadd.f32 %v2786_v58, %v2785_v13 }
 0xad1   : > { %v2788_v38 = vrot.slane %v2787_v63, 1  ;;  %v2798_v39 = vmul.f32 0.0009765625, %v2796_v62 }
 0xad3   : > { %v2789_v4 = vadd.f32 %v2788_v38, %v2787_v63  ;;  %v2802_v43 = vsub.f32 %v2767_v25, %v2798_v39  ;;  %v2801_v42 = vsub.f32 %v2764_v32, %v2798_v39 }
 0xad5   : > { %v2806_v48 = vmul.f32 %v2802_v43, %v2802_v43  ;;  %v2805_v10 = vmul.f32 %v2801_v42, %v2801_v42  ;;  %v2797_v11 = vmul.f32 0.0009765625, %v2789_v4 }
 0xad7   : > { %v2816_v37 = vsel %vm435_vm0, %v2806_v48, 0.0  ;;  %v2813_v49 = vsel %vm435_vm0, %v2805_v10, 0.0  ;;  %v2800_v52 = vsub.f32 %v2759_v30, %v2797_v11  ;;  %v2799_v1 = vsub.f32 %v2756_v29, %v2797_v11 }
 0xad8   : > { %2817 = vadd.xlane.f32.xlu1 %v2816_v37  ;;  %2814 = vadd.xlane.f32.xlu0 %v2813_v49 }
 0xad9   : > { %v2804_v33 = vmul.f32 %v2800_v52, %v2800_v52  ;;  %v2803_v46 = vmul.f32 %v2799_v1, %v2799_v1 }
 0xadb   : > { %v2810_v14 = vsel %vm435_vm0, %v2804_v33, 0.0  ;;  %v2807_v15 = vsel %vm435_vm0, %v2803_v46, 0.0 }
 0xadc   : > { %2811 = vadd.xlane.f32.xlu1 %v2810_v14  ;;  %2808 = vadd.xlane.f32.xlu0 %v2807_v15 }
 0xb61   : > { %v2818_v16 = vpop.xlane.xlu1 %2817  ;;  %v2815_v2 = vpop.xlane.xlu0 %2814 }
 0xb62   : > { %v2826_v47 = vadd.f32 %v2818_v16, %v2815_v2 }
 0xb64   : > { %v2827_v61 = vrot.slane %v2826_v47, 4 }
 0xb65   : > { %v2812_v53 = vpop.xlane.xlu1 %2811  ;;  %v2809_v18 = vpop.xlane.xlu0 %2808 }
 0xb66   : > { %v2828_v19 = vadd.f32 %v2827_v61, %v2826_v47  ;;  %v2819_v20 = vadd.f32 %v2812_v53, %v2809_v18 }
 0xb68   : > { %v2829_v23 = vrot.slane %v2828_v19, 2  ;;  %v2820_v7 = vrot.slane %v2819_v20, 4 }
 0xb6a   : > { %v2830_v45 = vadd.f32 %v2829_v23, %v2828_v19  ;;  %v2821_v24 = vadd.f32 %v2820_v7, %v2819_v20 }
 0xb6c   : > { %v2831_v5 = vrot.slane %v2830_v45, 1  ;;  %v2822_v26 = vrot.slane %v2821_v24, 2 }
 0xb6e   : > { %v2832_v0 = vadd.f32 %v2831_v5, %v2830_v45  ;;  %v2823_v27 = vadd.f32 %v2822_v26, %v2821_v24 }
 0xb70   : > { %v2834_v40 = vmul.f32 0.0009765625, %v2832_v0  ;;  %v2824_v17 = vrot.slane %v2823_v27, 1 }
 0xb72   : > { %v2836_v21 = vadd.f32 1e-05, %v2834_v40  ;;  %v2825_v29 = vadd.f32 %v2824_v17, %v2823_v27 }
 0xb74   : > { %3494 = vrsqrt.f32 %v2836_v21  ;;  %v2833_v8 = vmul.f32 0.0009765625, %v2825_v29 }
 0xb76   : > { %v2835_v30 = vadd.f32 1e-05, %v2833_v8 }
 0xb78   : > { %3496 = vrsqrt.f32 %v2835_v30 }
 0xb81   : > { %v3495_v32 = vpop.eup %3494 }
 0xb82   : > { %v2841_v22 = vmul.f32 %v3495_v32, %v2839_v28 }
 0xb84   : > { %v2849_v59 = vrot.slane %v2841_v22, %v3867_v41 }
 0xb85   : > { %v3497_v25 = vpop.eup %3496 }
 0xb86   : > { %v2853_v60 = vmul.f32 %v2849_v59, %v2802_v43  ;;  %v2840_v9 = vmul.f32 %v3497_v25, %v2839_v28  ;;  %v2852_v44 = vmul.f32 %v2849_v59, %v2801_v42 }
 0xb88   : > { %v2862_v50 = vadd.f32 %v3073_v34, %v2853_v60  ;;  %v2861_v55 = vadd.f32 %v3073_v34, %v2852_v44  ;;  %v2845_v51 = vrot.slane %v2840_v9, %v3867_v41 }
 0xb8a   : > { %2867 = vrot.lane.b32.xlu1 %v2862_v50, %s3508_s18  ;;  %2865 = vrot.lane.b32.xlu0 %v2861_v55, %s3508_s18  ;;  %v2851_v35 = vmul.f32 %v2845_v51, %v2800_v52  ;;  %v2850_v36 = vmul.f32 %v2845_v51, %v2799_v1 }
 0xb8c   : > { %v2860_v12 = vadd.f32 %v3073_v34, %v2851_v35  ;;  %v2859_v54 = vadd.f32 %v3073_v34, %v2850_v36 }
 0xbfc   : > { %v2868_v57 = vpop.permute.xlu1 %2867  ;;  %v2866_v3 = vpop.permute.xlu0 %2865 }
 0xbfd   : > { %v2872_v6 = vsel %vm435_vm0, %v2860_v12, %v2868_v57  ;;  %v2871_v31 = vsel %vm435_vm0, %v2859_v54, %v2866_v3 }
 0xbfe   : > { %2873 = vst [vmem:[%s388_s26] sm:$0xff] %v2871_v31  ;;  %2874 = vst [vmem:[%s388_s26 + $0x8] sm:$0xff] %v2872_v6 }
 0xbff PF: > { %s21_s17 = sadd.s32 1, %s3504_s17  }
 0xc00   : > { %p18_p4 = scmp.ge.s32.totalorder %s21_s17, 4  }
 0xc02   :  { %20 = sbr.rel (!%p18_p4) target bundleno = 1 (0x1), region = 94 }

</bundles_post_ra>
